<compile_context>
chip_gen: v7x
topology: tpu7x:2x2x1
jax: 0.10.0
libtpu: 0.0.40
codegen_flags: <defaults>
</compile_context>

<pallas_src>
import functools

import jax
import jax.numpy as jnp
from jax.experimental import pallas as pl
from jax.experimental.pallas import tpu as pltpu

LEAK = 0.01  # nn.LeakyReLU default negative_slope
BN_EPS = 1e-5


def _lrelu(y):
    return jnp.where(y > 0, y, LEAK * y)


def _full(shape):
    """BlockSpec covering the whole array (grid=(1,))."""
    n = len(shape)
    return pl.BlockSpec(shape, lambda i: (0,) * n)


# ------------------- kernel A: fused trunk + 1x1 conv heads ------------------

def trunk_heads_kernel(x_ref, tw_ref, ts_ref, tb_ref,
                       hw_ref, hs_ref, hb_ref,
                       p_ref, v_ref, pad_a, pad_b):
    """Fused conv trunk + policy/value 1x1 conv heads, fully VMEM-resident.

    x_ref  : (B, H, W, C)      input, channel-padded to C = num_hidden
    tw_ref : (L, 9, C, C)      3x3 taps for conv1 + resblocks (conv1 cin zero-padded)
    ts_ref : (L, 1, C)         folded BN scale per layer
    tb_ref : (L, 1, C)         folded BN bias per layer (conv bias included)
    hw_ref : (C, NP+NV)        concatenated policy(32)/value(3) 1x1 weights
    hs_ref : (1, NP+NV)        folded BN scale for the heads
    hb_ref : (1, NP+NV)        folded BN bias for the heads
    p_ref  : (B, H*W, NP)      policy-conv activations (NHWC row order)
    v_ref  : (B, H*W, NV)      value-conv activations (NHWC row order)
    pad_a/pad_b : (B, H+2, W+2, C) VMEM halo ping-pong buffers
    """
    B, H, W, C = x_ref.shape
    L = tw_ref.shape[0]
    BHW = B * H * W
    NP = p_ref.shape[2]
    NV = v_ref.shape[2]

    # Zero both halo buffers once; the 1-pixel border stays zero for the whole
    # trunk (we only ever write interiors below).
    pad_a[...] = jnp.zeros(pad_a.shape, jnp.float32)
    pad_b[...] = jnp.zeros(pad_b.shape, jnp.float32)
    pad_a[:, 1:H + 1, 1:W + 1, :] = x_ref[...]

    bufs = (pad_a, pad_b)
    for l in range(L):                                # unrolled, L is static
        src = bufs[l % 2]
        dst = bufs[(l + 1) % 2]
        acc = jnp.zeros((BHW, C), jnp.float32)
        for k in range(9):                            # 3x3 taps, M = B*H*W
            dh, dw = k // 3, k % 3
            patch = src[:, dh:dh + H, dw:dw + W, :].reshape(BHW, C)
            acc = acc + jnp.dot(patch, tw_ref[l, k],
                                preferred_element_type=jnp.float32)
        y = _lrelu(acc * ts_ref[l] + tb_ref[l])       # folded BN + LeakyReLU
        dst[:, 1:H + 1, 1:W + 1, :] = y.reshape(B, H, W, C)

    # fused policy/value 1x1 conv + BN + LeakyReLU over the final activation
    xfin = bufs[L % 2][:, 1:H + 1, 1:W + 1, :].reshape(BHW, C)
    h = jnp.dot(xfin, hw_ref[...], preferred_element_type=jnp.float32)
    h = _lrelu(h * hs_ref[...] + hb_ref[...])
    p_ref[...] = h[:, :NP].reshape(B, H * W, NP)
    v_ref[...] = h[:, NP:NP + NV].reshape(B, H * W, NV)


def trunk_and_conv_heads(x, trunk_w, trunk_s, trunk_b,
                         head_w, head_s, head_b, n_policy):
    B, H, W, C = x.shape
    L = trunk_w.shape[0]
    NH = head_w.shape[1]
    NV = NH - n_policy
    return pl.pallas_call(
        trunk_heads_kernel,
        out_shape=(jax.ShapeDtypeStruct((B, H * W, n_policy), jnp.float32),
                   jax.ShapeDtypeStruct((B, H * W, NV), jnp.float32)),
        grid=(1,),
        in_specs=[
            _full((B, H, W, C)),
            _full((L, 9, C, C)),
            _full((L, 1, C)),
            _full((L, 1, C)),
            _full((C, NH)),
            _full((1, NH)),
            _full((1, NH)),
        ],
        out_specs=(_full((B, H * W, n_policy)), _full((B, H * W, NV))),
        scratch_shapes=[
            pltpu.VMEM((B, H + 2, W + 2, C), jnp.float32),
            pltpu.VMEM((B, H + 2, W + 2, C), jnp.float32),
        ],
        compiler_params=pltpu.CompilerParams(
            dimension_semantics=("arbitrary",)),
    )(x, trunk_w, trunk_s, trunk_b, head_w, head_s, head_b)


# ---------------- kernel B: fused FC heads (+ opponent model) ----------------

def fc_heads_kernel(pf_ref, vf_ref,
                    pw_ref, pb_ref, v1w_ref, v1b_ref, v2w_ref, v2b_ref,
                    policy_ref, value_ref):
    policy = jnp.dot(pf_ref[...], pw_ref[...],
                     preferred_element_type=jnp.float32) + pb_ref[...]
    v = jnp.dot(vf_ref[...], v1w_ref[...],
                preferred_element_type=jnp.float32) + v1b_ref[...]
    v = _lrelu(v)
    v = jnp.dot(v, v2w_ref[...],
                preferred_element_type=jnp.float32) + v2b_ref[...]
    value_ref[...] = jnp.tanh(v)
    policy_ref[...] = policy


def fc_heads_opp_kernel(pf_ref, vf_ref, oh_ref,
                        pw_ref, pb_ref, v1w_ref, v1b_ref, v2w_ref, v2b_ref,
                        o1w_ref, o1b_ref, o2w_ref, o2b_ref,
                        policy_ref, value_ref):
    policy = jnp.dot(pf_ref[...], pw_ref[...],
                     preferred_element_type=jnp.float32) + pb_ref[...]
    v = jnp.dot(vf_ref[...], v1w_ref[...],
                preferred_element_type=jnp.float32) + v1b_ref[...]
    v = _lrelu(v)
    v = jnp.dot(v, v2w_ref[...],
                preferred_element_type=jnp.float32) + v2b_ref[...]
    value_ref[...] = jnp.tanh(v)
    # opponent model (ReLU MLP) + softmax gating of the policy
    oh = jnp.dot(oh_ref[...], o1w_ref[...],
                 preferred_element_type=jnp.float32) + o1b_ref[...]
    oh = jnp.maximum(oh, 0.0)
    opp = jnp.dot(oh, o2w_ref[...],
                  preferred_element_type=jnp.float32) + o2b_ref[...]
    m = jnp.max(opp, axis=-1, keepdims=True)
    e = jnp.exp(opp - m)
    sm = e / jnp.sum(e, axis=-1, keepdims=True)
    policy_ref[...] = policy * sm


def fc_heads(p_flat, v_flat, prepared, opponent_history=None):
    B = p_flat.shape[0]
    A = prepared["pfc_w"].shape[1]
    if opponent_history is None:
        kernel = fc_heads_kernel
        args = [p_flat, v_flat,
                prepared["pfc_w"], prepared["pfc_b"],
                prepared["vfc1_w"], prepared["vfc1_b"],
                prepared["vfc2_w"], prepared["vfc2_b"]]
    else:
        kernel = fc_heads_opp_kernel
        args = [p_flat, v_flat, opponent_history,
                prepared["pfc_w"], prepared["pfc_b"],
                prepared["vfc1_w"], prepared["vfc1_b"],
                prepared["vfc2_w"], prepared["vfc2_b"],
                prepared["opp1_w"], prepared["opp1_b"],
                prepared["opp2_w"], prepared["opp2_b"]]
    return pl.pallas_call(
        kernel,
        out_shape=(jax.ShapeDtypeStruct((B, A), jnp.float32),
                   jax.ShapeDtypeStruct((B, 1), jnp.float32)),
        grid=(1,),
        in_specs=[_full(a.shape) for a in args],
        out_specs=(_full((B, A)), _full((B, 1))),
        compiler_params=pltpu.CompilerParams(
            dimension_semantics=("arbitrary",)),
    )(*args)


# ----------------------------- parameters ------------------------------------

def init_params(key, num_hidden, num_resblocks, max_game, max_action):
    """Parameters in 'PyTorch layout' (HWIO convs, NCHW-flatten FC rows)."""
    keys = iter(jax.random.split(key, 128))

    def conv_bn(cin, cout, k):
        fan = k * k * cin
        w = jax.random.normal(next(keys), (k, k, cin, cout), jnp.float32) * (
            0.5 / fan ** 0.5)
        conv_b = 0.05 * jax.random.normal(next(keys), (cout,), jnp.float32)
        gamma = 1.0 + 0.1 * jax.random.normal(next(keys), (cout,), jnp.float32)
        beta = 0.1 * jax.random.normal(next(keys), (cout,), jnp.float32)
        mean = 0.05 * jax.random.normal(next(keys), (cout,), jnp.float32)
        var = 1.0 + 0.1 * jnp.abs(
            jax.random.normal(next(keys), (cout,), jnp.float32))
        s = gamma / jnp.sqrt(var + BN_EPS)              # folded BN scale
        b = beta + (conv_b - mean) * s                  # folded BN bias
        if k == 1:
            w = w.reshape(cin, cout)
        return (w, s, b)

    def linear(cin, cout):
        w = jax.random.normal(next(keys), (cin, cout), jnp.float32) * (
            1.0 / cin ** 0.5)
        b = 0.05 * jax.random.normal(next(keys), (cout,), jnp.float32)
        return (w, b)

    params = {}
    params["conv1"] = conv_bn(3, num_hidden, 3)
    params["res"] = [conv_bn(num_hidden, num_hidden, 3)
                     for _ in range(num_resblocks)]
    params["policy_conv"] = conv_bn(num_hidden, 32, 1)
    params["policy_fc"] = linear(32 * max_game * max_game, max_action)
    params["value_conv"] = conv_bn(num_hidden, 3, 1)
    params["value_fc1"] = linear(3 * max_game * max_game, 32)
    params["value_fc2"] = linear(32, 1)
    params["opp_fc1"] = linear(max_game * max_game * 3, 128)
    params["opp_fc2"] = linear(128, max_action)
    return params


def prepare_params(params, H, W):
    """Repack params into the fused-kernel layout (done once, off the hot path)."""
    w1, s1, b1 = params["conv1"]                # (3,3,cin,C)
    C = w1.shape[-1]
    cin = w1.shape[2]
    assert C >= cin
    w1 = w1.reshape(9, cin, C)
    w1 = jnp.pad(w1, ((0, 0), (0, C - cin), (0, 0)))    # zero rows for padded cin
    ws, ss, bs = [w1], [s1], [b1]
    for (w, s, b) in params["res"]:
        ws.append(w.reshape(9, C, C))
        ss.append(s)
        bs.append(b)
    L = len(ws)
    prepared = {
        "trunk_w": jnp.stack(ws),                       # (L, 9, C, C)
        "trunk_s": jnp.stack(ss).reshape(L, 1, C),
        "trunk_b": jnp.stack(bs).reshape(L, 1, C),
    }

    pw, ps, pb = params["policy_conv"]                  # (C, 32)
    vw, vs, vb = params["value_conv"]                   # (C, 3)
    NP, NV = pw.shape[1], vw.shape[1]
    prepared["head_w"] = jnp.concatenate([pw, vw], axis=1)          # (C, 35)
    prepared["head_s"] = jnp.concatenate([ps, vs]).reshape(1, NP + NV)
    prepared["head_b"] = jnp.concatenate([pb, vb]).reshape(1, NP + NV)

    def nchw_to_nhwc_rows(w, c):
        # FC rows are in NCHW .view() order (c, h, w); reorder to (h, w, c) so
        # the NHWC flatten feeds them directly (no runtime transpose).
        n = w.shape[1]
        return w.reshape(c, H, W, n).transpose(1, 2, 0, 3).reshape(H * W * c, n)

    fw, fb = params["policy_fc"]
    prepared["pfc_w"] = nchw_to_nhwc_rows(fw, NP)
    prepared["pfc_b"] = fb.reshape(1, -1)
    w1_, b1_ = params["value_fc1"]
    prepared["vfc1_w"] = nchw_to_nhwc_rows(w1_, NV)
    prepared["vfc1_b"] = b1_.reshape(1, -1)
    w2_, b2_ = params["value_fc2"]
    prepared["vfc2_w"] = w2_
    prepared["vfc2_b"] = b2_.reshape(1, -1)
    ow1, ob1 = params["opp_fc1"]                        # history comes pre-flattened
    prepared["opp1_w"] = ow1
    prepared["opp1_b"] = ob1.reshape(1, -1)
    ow2, ob2 = params["opp_fc2"]
    prepared["opp2_w"] = ow2
    prepared["opp2_b"] = ob2.reshape(1, -1)
    return prepared


# ----------------------------- forward ----------------------------------------

def forward(prepared, state_nchw, game_phase=None, opponent_history=None):
    # `game_phase` is accepted but unused, exactly like the PyTorch forward().
    del game_phase
    x = jnp.transpose(state_nchw, (0, 2, 3, 1)).astype(jnp.float32)  # NHWC
    B, H, W, cin = x.shape
    C = prepared["trunk_s"].shape[2]
    if C > cin:
        x = jnp.pad(x, ((0, 0), (0, 0), (0, 0), (0, C - cin)))
    n_policy = prepared["pfc_w"].shape[0] // (H * W)

    p_act, v_act = trunk_and_conv_heads(
        x, prepared["trunk_w"], prepared["trunk_s"], prepared["trunk_b"],
        prepared["head_w"], prepared["head_s"], prepared["head_b"], n_policy)

    # NHWC flatten; FC weight rows were pre-permuted to match NCHW .view() order
    p_flat = p_act.reshape(B, -1)
    v_flat = v_act.reshape(B, -1)
    return fc_heads(p_flat, v_flat, prepared, opponent_history)


# ----------------------------- pure-JAX reference ------------------------------

def ref_forward(params, state_nchw, opponent_history):
    hp = jax.lax.Precision.HIGHEST
    hdot = functools.partial(jnp.dot, precision=hp)
    x = jnp.transpose(state_nchw, (0, 2, 3, 1)).astype(jnp.float32)
    B = x.shape[0]

    def conv3x3(x, w, s, b):
        y = jax.lax.conv_general_dilated(
            x, w, window_strides=(1, 1), padding="SAME",
            dimension_numbers=("NHWC", "HWIO", "NHWC"), precision=hp)
        return _lrelu(y * s + b)

    x = conv3x3(x, *params["conv1"])
    for wsb in params["res"]:
        x = conv3x3(x, *wsb)

    pw, ps, pb = params["policy_conv"]
    p = _lrelu(jnp.einsum("bhwc,cd->bhwd", x, pw, precision=hp) * ps + pb)
    p_flat = jnp.transpose(p, (0, 3, 1, 2)).reshape(B, -1)   # NCHW .view order
    fw, fb = params["policy_fc"]
    policy = hdot(p_flat, fw) + fb

    vw, vs, vb = params["value_conv"]
    v = _lrelu(jnp.einsum("bhwc,cd->bhwd", x, vw, precision=hp) * vs + vb)
    v_flat = jnp.transpose(v, (0, 3, 1, 2)).reshape(B, -1)
    w1, b1 = params["value_fc1"]
    v = _lrelu(hdot(v_flat, w1) + b1)
    w2, b2 = params["value_fc2"]
    value = jnp.tanh(hdot(v, w2) + b2)

    ow1, ob1 = params["opp_fc1"]
    ow2, ob2 = params["opp_fc2"]
    h = jnp.maximum(hdot(opponent_history, ow1) + ob1, 0.0)
    opp = hdot(h, ow2) + ob2
    policy = policy * jax.nn.softmax(opp, axis=-1)
    return policy, value


# ----------------------------- main --------------------------------------------

if __name__ == "__main__":
    B = 2
    MAX_GAME = 8
    MAX_ACTION = 16
    NUM_HIDDEN = 32
    NUM_RESBLOCKS = 2

    key = jax.random.PRNGKey(0)
    pkey, xkey, hkey = jax.random.split(key, 3)

    params = init_params(pkey, NUM_HIDDEN, NUM_RESBLOCKS, MAX_GAME, MAX_ACTION)
    prepared = prepare_params(params, MAX_GAME, MAX_GAME)

    state = jax.random.normal(xkey, (B, 3, MAX_GAME, MAX_GAME), jnp.float32)
    game_phase = jnp.zeros((B,), jnp.int32)   # unused by forward (matches module)
    opponent_history = jax.random.normal(
        hkey, (B, 3 * MAX_GAME * MAX_GAME), jnp.float32)

    fwd = jax.jit(forward)
    policy, value = fwd(prepared, state, game_phase, opponent_history)
    jax.block_until_ready((policy, value))

    assert policy.shape == (B, MAX_ACTION), policy.shape
    assert value.shape == (B, 1), value.shape
    assert bool(jnp.all(jnp.isfinite(policy))) and bool(jnp.all(jnp.isfinite(value)))

    # correctness check against a pure-JAX reference of the same module
    ref_policy, ref_value = jax.jit(ref_forward)(params, state, opponent_history)
    assert bool(jnp.allclose(policy, ref_policy, rtol=5e-2, atol=5e-2))
    assert bool(jnp.allclose(value, ref_value, rtol=5e-2, atol=5e-2))

    print("KERNEL_OK")
</pallas_src>

<mosaic_0001>
module attributes {stable_mosaic.version = 11 : i64} {
  func.func @trunk_heads_kernel(%arg0: i32, %arg1: memref<2x8x8x32xf32, #tpu.memory_space<vmem>>, %arg2: memref<3x9x32x32xf32, #tpu.memory_space<vmem>>, %arg3: memref<3x1x32xf32, #tpu.memory_space<vmem>>, %arg4: memref<3x1x32xf32, #tpu.memory_space<vmem>>, %arg5: memref<32x35xf32, #tpu.memory_space<vmem>>, %arg6: memref<1x35xf32, #tpu.memory_space<vmem>>, %arg7: memref<1x35xf32, #tpu.memory_space<vmem>>, %arg8: memref<2x64x32xf32, #tpu.memory_space<vmem>>, %arg9: memref<2x64x3xf32, #tpu.memory_space<vmem>>, %arg10: memref<2x10x10x32xf32, #tpu.memory_space<vmem>>, %arg11: memref<2x10x10x32xf32, #tpu.memory_space<vmem>>) attributes {dimension_semantics = [#tpu.dimension_semantics<arbitrary>], iteration_bounds = array<i64: 1>, scalar_prefetch = 0 : i64, scratch_operands = 2 : i64, tpu.core_type = #tpu.core_type<tc>, window_params = [{pipeline_mode = #tpu.pipeline_mode<synchronous>, transform_indices = @transform_0, window_bounds = array<i64: 2, 8, 8, 32>}, {pipeline_mode = #tpu.pipeline_mode<synchronous>, transform_indices = @transform_1, window_bounds = array<i64: 3, 9, 32, 32>}, {pipeline_mode = #tpu.pipeline_mode<synchronous>, transform_indices = @transform_2, window_bounds = array<i64: 3, 1, 32>}, {pipeline_mode = #tpu.pipeline_mode<synchronous>, transform_indices = @transform_3, window_bounds = array<i64: 3, 1, 32>}, {pipeline_mode = #tpu.pipeline_mode<synchronous>, transform_indices = @transform_4, window_bounds = array<i64: 32, 35>}, {pipeline_mode = #tpu.pipeline_mode<synchronous>, transform_indices = @transform_5, window_bounds = array<i64: 1, 35>}, {pipeline_mode = #tpu.pipeline_mode<synchronous>, transform_indices = @transform_6, window_bounds = array<i64: 1, 35>}, {pipeline_mode = #tpu.pipeline_mode<synchronous>, transform_indices = @transform_7, window_bounds = array<i64: 2, 64, 32>}, {pipeline_mode = #tpu.pipeline_mode<synchronous>, transform_indices = @transform_8, window_bounds = array<i64: 2, 64, 3>}]} {
    %cst = arith.constant 0.000000e+00 : f32
    %0 = vector.broadcast %cst : f32 to vector<2x10x10x32xf32>
    %c0 = arith.constant 0 : index
    %c0_0 = arith.constant 0 : index
    %c0_1 = arith.constant 0 : index
    %c0_2 = arith.constant 0 : index
    %1 = vector.load %arg10[%c0, %c0_0, %c0_1, %c0_2] : memref<2x10x10x32xf32, #tpu.memory_space<vmem>>, vector<2x10x10x32xf32>
    tpu.vector_store %arg10[%c0, %c0_0, %c0_1, %c0_2], %0 {strides = array<i32>} : memref<2x10x10x32xf32, #tpu.memory_space<vmem>>, vector<2x10x10x32xf32>,
    %cst_3 = arith.constant 0.000000e+00 : f32
    %2 = vector.broadcast %cst_3 : f32 to vector<2x10x10x32xf32>
    %c0_4 = arith.constant 0 : index
    %c0_5 = arith.constant 0 : index
    %c0_6 = arith.constant 0 : index
    %c0_7 = arith.constant 0 : index
    %3 = vector.load %arg11[%c0_4, %c0_5, %c0_6, %c0_7] : memref<2x10x10x32xf32, #tpu.memory_space<vmem>>, vector<2x10x10x32xf32>
    tpu.vector_store %arg11[%c0_4, %c0_5, %c0_6, %c0_7], %2 {strides = array<i32>} : memref<2x10x10x32xf32, #tpu.memory_space<vmem>>, vector<2x10x10x32xf32>,
    %c0_8 = arith.constant 0 : index
    %c0_9 = arith.constant 0 : index
    %c0_10 = arith.constant 0 : index
    %c0_11 = arith.constant 0 : index
    %4 = vector.load %arg1[%c0_8, %c0_9, %c0_10, %c0_11] : memref<2x8x8x32xf32, #tpu.memory_space<vmem>>, vector<2x8x8x32xf32>
    %c0_12 = arith.constant 0 : index
    %c1 = arith.constant 1 : index
    %c1_13 = arith.constant 1 : index
    %c0_14 = arith.constant 0 : index
    %5 = vector.load %arg10[%c0_12, %c1, %c1_13, %c0_14] : memref<2x10x10x32xf32, #tpu.memory_space<vmem>>, vector<2x8x8x32xf32>
    tpu.vector_store %arg10[%c0_12, %c1, %c1_13, %c0_14], %4 {strides = array<i32>} : memref<2x10x10x32xf32, #tpu.memory_space<vmem>>, vector<2x8x8x32xf32>,
    %cst_15 = arith.constant 0.000000e+00 : f32
    %6 = vector.broadcast %cst_15 : f32 to vector<128x32xf32>
    %c0_16 = arith.constant 0 : index
    %c0_17 = arith.constant 0 : index
    %c0_18 = arith.constant 0 : index
    %c0_19 = arith.constant 0 : index
    %7 = vector.load %arg10[%c0_16, %c0_17, %c0_18, %c0_19] : memref<2x10x10x32xf32, #tpu.memory_space<vmem>>, vector<2x8x8x32xf32>
    %8 = vector.shape_cast %7 : vector<2x8x8x32xf32> to vector<128x32xf32>
    %c0_20 = arith.constant 0 : index
    %c0_21 = arith.constant 0 : index
    %c0_22 = arith.constant 0 : index
    %c0_23 = arith.constant 0 : index
    %9 = vector.load %arg2[%c0_20, %c0_21, %c0_22, %c0_23] : memref<3x9x32x32xf32, #tpu.memory_space<vmem>>, vector<1x1x32x32xf32>
    %10 = vector.shape_cast %9 : vector<1x1x32x32xf32> to vector<32x32xf32>
    %cst_24 = arith.constant dense<0.000000e+00> : vector<128x32xf32>
    %11 = tpu.matmul %8, %10, %cst_24 {dimension_numbers = #tpu.dot_dimension_numbers<[1], [0], [0], [1], [0, 0, 1, 1], [], []>} : vector<128x32xf32>, vector<32x32xf32>, vector<128x32xf32> -> vector<128x32xf32>
    %12 = arith.addf %6, %11 : vector<128x32xf32>
    %c0_25 = arith.constant 0 : index
    %c0_26 = arith.constant 0 : index
    %c1_27 = arith.constant 1 : index
    %c0_28 = arith.constant 0 : index
    %13 = vector.load %arg10[%c0_25, %c0_26, %c1_27, %c0_28] : memref<2x10x10x32xf32, #tpu.memory_space<vmem>>, vector<2x8x8x32xf32>
    %14 = vector.shape_cast %13 : vector<2x8x8x32xf32> to vector<128x32xf32>
    %c0_29 = arith.constant 0 : index
    %c1_30 = arith.constant 1 : index
    %c0_31 = arith.constant 0 : index
    %c0_32 = arith.constant 0 : index
    %15 = vector.load %arg2[%c0_29, %c1_30, %c0_31, %c0_32] : memref<3x9x32x32xf32, #tpu.memory_space<vmem>>, vector<1x1x32x32xf32>
    %16 = vector.shape_cast %15 : vector<1x1x32x32xf32> to vector<32x32xf32>
    %cst_33 = arith.constant dense<0.000000e+00> : vector<128x32xf32>
    %17 = tpu.matmul %14, %16, %cst_33 {dimension_numbers = #tpu.dot_dimension_numbers<[1], [0], [0], [1], [0, 0, 1, 1], [], []>} : vector<128x32xf32>, vector<32x32xf32>, vector<128x32xf32> -> vector<128x32xf32>
    %18 = arith.addf %12, %17 : vector<128x32xf32>
    %c0_34 = arith.constant 0 : index
    %c0_35 = arith.constant 0 : index
    %c2 = arith.constant 2 : index
    %c0_36 = arith.constant 0 : index
    %19 = vector.load %arg10[%c0_34, %c0_35, %c2, %c0_36] : memref<2x10x10x32xf32, #tpu.memory_space<vmem>>, vector<2x8x8x32xf32>
    %20 = vector.shape_cast %19 : vector<2x8x8x32xf32> to vector<128x32xf32>
    %c0_37 = arith.constant 0 : index
    %c2_38 = arith.constant 2 : index
    %c0_39 = arith.constant 0 : index
    %c0_40 = arith.constant 0 : index
    %21 = vector.load %arg2[%c0_37, %c2_38, %c0_39, %c0_40] : memref<3x9x32x32xf32, #tpu.memory_space<vmem>>, vector<1x1x32x32xf32>
    %22 = vector.shape_cast %21 : vector<1x1x32x32xf32> to vector<32x32xf32>
    %cst_41 = arith.constant dense<0.000000e+00> : vector<128x32xf32>
    %23 = tpu.matmul %20, %22, %cst_41 {dimension_numbers = #tpu.dot_dimension_numbers<[1], [0], [0], [1], [0, 0, 1, 1], [], []>} : vector<128x32xf32>, vector<32x32xf32>, vector<128x32xf32> -> vector<128x32xf32>
    %24 = arith.addf %18, %23 : vector<128x32xf32>
    %c0_42 = arith.constant 0 : index
    %c1_43 = arith.constant 1 : index
    %c0_44 = arith.constant 0 : index
    %c0_45 = arith.constant 0 : index
    %25 = vector.load %arg10[%c0_42, %c1_43, %c0_44, %c0_45] : memref<2x10x10x32xf32, #tpu.memory_space<vmem>>, vector<2x8x8x32xf32>
    %26 = vector.shape_cast %25 : vector<2x8x8x32xf32> to vector<128x32xf32>
    %c0_46 = arith.constant 0 : index
    %c3 = arith.constant 3 : index
    %c0_47 = arith.constant 0 : index
    %c0_48 = arith.constant 0 : index
    %27 = vector.load %arg2[%c0_46, %c3, %c0_47, %c0_48] : memref<3x9x32x32xf32, #tpu.memory_space<vmem>>, vector<1x1x32x32xf32>
    %28 = vector.shape_cast %27 : vector<1x1x32x32xf32> to vector<32x32xf32>
    %cst_49 = arith.constant dense<0.000000e+00> : vector<128x32xf32>
    %29 = tpu.matmul %26, %28, %cst_49 {dimension_numbers = #tpu.dot_dimension_numbers<[1], [0], [0], [1], [0, 0, 1, 1], [], []>} : vector<128x32xf32>, vector<32x32xf32>, vector<128x32xf32> -> vector<128x32xf32>
    %30 = arith.addf %24, %29 : vector<128x32xf32>
    %c0_50 = arith.constant 0 : index
    %c1_51 = arith.constant 1 : index
    %c1_52 = arith.constant 1 : index
    %c0_53 = arith.constant 0 : index
    %31 = vector.load %arg10[%c0_50, %c1_51, %c1_52, %c0_53] : memref<2x10x10x32xf32, #tpu.memory_space<vmem>>, vector<2x8x8x32xf32>
    %32 = vector.shape_cast %31 : vector<2x8x8x32xf32> to vector<128x32xf32>
    %c0_54 = arith.constant 0 : index
    %c4 = arith.constant 4 : index
    %c0_55 = arith.constant 0 : index
    %c0_56 = arith.constant 0 : index
    %33 = vector.load %arg2[%c0_54, %c4, %c0_55, %c0_56] : memref<3x9x32x32xf32, #tpu.memory_space<vmem>>, vector<1x1x32x32xf32>
    %34 = vector.shape_cast %33 : vector<1x1x32x32xf32> to vector<32x32xf32>
    %cst_57 = arith.constant dense<0.000000e+00> : vector<128x32xf32>
    %35 = tpu.matmul %32, %34, %cst_57 {dimension_numbers = #tpu.dot_dimension_numbers<[1], [0], [0], [1], [0, 0, 1, 1], [], []>} : vector<128x32xf32>, vector<32x32xf32>, vector<128x32xf32> -> vector<128x32xf32>
    %36 = arith.addf %30, %35 : vector<128x32xf32>
    %c0_58 = arith.constant 0 : index
    %c1_59 = arith.constant 1 : index
    %c2_60 = arith.constant 2 : index
    %c0_61 = arith.constant 0 : index
    %37 = vector.load %arg10[%c0_58, %c1_59, %c2_60, %c0_61] : memref<2x10x10x32xf32, #tpu.memory_space<vmem>>, vector<2x8x8x32xf32>
    %38 = vector.shape_cast %37 : vector<2x8x8x32xf32> to vector<128x32xf32>
    %c0_62 = arith.constant 0 : index
    %c5 = arith.constant 5 : index
    %c0_63 = arith.constant 0 : index
    %c0_64 = arith.constant 0 : index
    %39 = vector.load %arg2[%c0_62, %c5, %c0_63, %c0_64] : memref<3x9x32x32xf32, #tpu.memory_space<vmem>>, vector<1x1x32x32xf32>
    %40 = vector.shape_cast %39 : vector<1x1x32x32xf32> to vector<32x32xf32>
    %cst_65 = arith.constant dense<0.000000e+00> : vector<128x32xf32>
    %41 = tpu.matmul %38, %40, %cst_65 {dimension_numbers = #tpu.dot_dimension_numbers<[1], [0], [0], [1], [0, 0, 1, 1], [], []>} : vector<128x32xf32>, vector<32x32xf32>, vector<128x32xf32> -> vector<128x32xf32>
    %42 = arith.addf %36, %41 : vector<128x32xf32>
    %c0_66 = arith.constant 0 : index
    %c2_67 = arith.constant 2 : index
    %c0_68 = arith.constant 0 : index
    %c0_69 = arith.constant 0 : index
    %43 = vector.load %arg10[%c0_66, %c2_67, %c0_68, %c0_69] : memref<2x10x10x32xf32, #tpu.memory_space<vmem>>, vector<2x8x8x32xf32>
    %44 = vector.shape_cast %43 : vector<2x8x8x32xf32> to vector<128x32xf32>
    %c0_70 = arith.constant 0 : index
    %c6 = arith.constant 6 : index
    %c0_71 = arith.constant 0 : index
    %c0_72 = arith.constant 0 : index
    %45 = vector.load %arg2[%c0_70, %c6, %c0_71, %c0_72] : memref<3x9x32x32xf32, #tpu.memory_space<vmem>>, vector<1x1x32x32xf32>
    %46 = vector.shape_cast %45 : vector<1x1x32x32xf32> to vector<32x32xf32>
    %cst_73 = arith.constant dense<0.000000e+00> : vector<128x32xf32>
    %47 = tpu.matmul %44, %46, %cst_73 {dimension_numbers = #tpu.dot_dimension_numbers<[1], [0], [0], [1], [0, 0, 1, 1], [], []>} : vector<128x32xf32>, vector<32x32xf32>, vector<128x32xf32> -> vector<128x32xf32>
    %48 = arith.addf %42, %47 : vector<128x32xf32>
    %c0_74 = arith.constant 0 : index
    %c2_75 = arith.constant 2 : index
    %c1_76 = arith.constant 1 : index
    %c0_77 = arith.constant 0 : index
    %49 = vector.load %arg10[%c0_74, %c2_75, %c1_76, %c0_77] : memref<2x10x10x32xf32, #tpu.memory_space<vmem>>, vector<2x8x8x32xf32>
    %50 = vector.shape_cast %49 : vector<2x8x8x32xf32> to vector<128x32xf32>
    %c0_78 = arith.constant 0 : index
    %c7 = arith.constant 7 : index
    %c0_79 = arith.constant 0 : index
    %c0_80 = arith.constant 0 : index
    %51 = vector.load %arg2[%c0_78, %c7, %c0_79, %c0_80] : memref<3x9x32x32xf32, #tpu.memory_space<vmem>>, vector<1x1x32x32xf32>
    %52 = vector.shape_cast %51 : vector<1x1x32x32xf32> to vector<32x32xf32>
    %cst_81 = arith.constant dense<0.000000e+00> : vector<128x32xf32>
    %53 = tpu.matmul %50, %52, %cst_81 {dimension_numbers = #tpu.dot_dimension_numbers<[1], [0], [0], [1], [0, 0, 1, 1], [], []>} : vector<128x32xf32>, vector<32x32xf32>, vector<128x32xf32> -> vector<128x32xf32>
    %54 = arith.addf %48, %53 : vector<128x32xf32>
    %c0_82 = arith.constant 0 : index
    %c2_83 = arith.constant 2 : index
    %c2_84 = arith.constant 2 : index
    %c0_85 = arith.constant 0 : index
    %55 = vector.load %arg10[%c0_82, %c2_83, %c2_84, %c0_85] : memref<2x10x10x32xf32, #tpu.memory_space<vmem>>, vector<2x8x8x32xf32>
    %56 = vector.shape_cast %55 : vector<2x8x8x32xf32> to vector<128x32xf32>
    %c0_86 = arith.constant 0 : index
    %c8 = arith.constant 8 : index
    %c0_87 = arith.constant 0 : index
    %c0_88 = arith.constant 0 : index
    %57 = vector.load %arg2[%c0_86, %c8, %c0_87, %c0_88] : memref<3x9x32x32xf32, #tpu.memory_space<vmem>>, vector<1x1x32x32xf32>
    %58 = vector.shape_cast %57 : vector<1x1x32x32xf32> to vector<32x32xf32>
    %cst_89 = arith.constant dense<0.000000e+00> : vector<128x32xf32>
    %59 = tpu.matmul %56, %58, %cst_89 {dimension_numbers = #tpu.dot_dimension_numbers<[1], [0], [0], [1], [0, 0, 1, 1], [], []>} : vector<128x32xf32>, vector<32x32xf32>, vector<128x32xf32> -> vector<128x32xf32>
    %60 = arith.addf %54, %59 : vector<128x32xf32>
    %c0_90 = arith.constant 0 : index
    %c0_91 = arith.constant 0 : index
    %c0_92 = arith.constant 0 : index
    %61 = vector.load %arg3[%c0_90, %c0_91, %c0_92] : memref<3x1x32xf32, #tpu.memory_space<vmem>>, vector<1x1x32xf32>
    %62 = vector.shape_cast %61 : vector<1x1x32xf32> to vector<1x32xf32>
    %63 = vector.broadcast %62 : vector<1x32xf32> to vector<128x32xf32>
    %64 = arith.mulf %60, %63 : vector<128x32xf32>
    %c0_93 = arith.constant 0 : index
    %c0_94 = arith.constant 0 : index
    %c0_95 = arith.constant 0 : index
    %65 = vector.load %arg4[%c0_93, %c0_94, %c0_95] : memref<3x1x32xf32, #tpu.memory_space<vmem>>, vector<1x1x32xf32>
    %66 = vector.shape_cast %65 : vector<1x1x32xf32> to vector<1x32xf32>
    %67 = vector.broadcast %66 : vector<1x32xf32> to vector<128x32xf32>
    %68 = arith.addf %64, %67 : vector<128x32xf32>
    %cst_96 = arith.constant 0.000000e+00 : f32
    %69 = vector.broadcast %cst_96 : f32 to vector<128x32xf32>
    %70 = arith.cmpf ogt, %68, %69 : vector<128x32xf32>
    %cst_97 = arith.constant 0.00999999977 : f32
    %71 = vector.broadcast %cst_97 : f32 to vector<128x32xf32>
    %72 = arith.mulf %71, %68 : vector<128x32xf32>
    %73 = arith.select %70, %68, %72 : vector<128x32xi1>, vector<128x32xf32>
    %74 = vector.shape_cast %73 : vector<128x32xf32> to vector<2x8x8x32xf32>
    %c0_98 = arith.constant 0 : index
    %c1_99 = arith.constant 1 : index
    %c1_100 = arith.constant 1 : index
    %c0_101 = arith.constant 0 : index
    %75 = vector.load %arg11[%c0_98, %c1_99, %c1_100, %c0_101] : memref<2x10x10x32xf32, #tpu.memory_space<vmem>>, vector<2x8x8x32xf32>
    tpu.vector_store %arg11[%c0_98, %c1_99, %c1_100, %c0_101], %74 {strides = array<i32>} : memref<2x10x10x32xf32, #tpu.memory_space<vmem>>, vector<2x8x8x32xf32>,
    %cst_102 = arith.constant 0.000000e+00 : f32
    %76 = vector.broadcast %cst_102 : f32 to vector<128x32xf32>
    %c0_103 = arith.constant 0 : index
    %c0_104 = arith.constant 0 : index
    %c0_105 = arith.constant 0 : index
    %c0_106 = arith.constant 0 : index
    %77 = vector.load %arg11[%c0_103, %c0_104, %c0_105, %c0_106] : memref<2x10x10x32xf32, #tpu.memory_space<vmem>>, vector<2x8x8x32xf32>
    %78 = vector.shape_cast %77 : vector<2x8x8x32xf32> to vector<128x32xf32>
    %c1_107 = arith.constant 1 : index
    %c0_108 = arith.constant 0 : index
    %c0_109 = arith.constant 0 : index
    %c0_110 = arith.constant 0 : index
    %79 = vector.load %arg2[%c1_107, %c0_108, %c0_109, %c0_110] : memref<3x9x32x32xf32, #tpu.memory_space<vmem>>, vector<1x1x32x32xf32>
    %80 = vector.shape_cast %79 : vector<1x1x32x32xf32> to vector<32x32xf32>
    %cst_111 = arith.constant dense<0.000000e+00> : vector<128x32xf32>
    %81 = tpu.matmul %78, %80, %cst_111 {dimension_numbers = #tpu.dot_dimension_numbers<[1], [0], [0], [1], [0, 0, 1, 1], [], []>} : vector<128x32xf32>, vector<32x32xf32>, vector<128x32xf32> -> vector<128x32xf32>
    %82 = arith.addf %76, %81 : vector<128x32xf32>
    %c0_112 = arith.constant 0 : index
    %c0_113 = arith.constant 0 : index
    %c1_114 = arith.constant 1 : index
    %c0_115 = arith.constant 0 : index
    %83 = vector.load %arg11[%c0_112, %c0_113, %c1_114, %c0_115] : memref<2x10x10x32xf32, #tpu.memory_space<vmem>>, vector<2x8x8x32xf32>
    %84 = vector.shape_cast %83 : vector<2x8x8x32xf32> to vector<128x32xf32>
    %c1_116 = arith.constant 1 : index
    %c1_117 = arith.constant 1 : index
    %c0_118 = arith.constant 0 : index
    %c0_119 = arith.constant 0 : index
    %85 = vector.load %arg2[%c1_116, %c1_117, %c0_118, %c0_119] : memref<3x9x32x32xf32, #tpu.memory_space<vmem>>, vector<1x1x32x32xf32>
    %86 = vector.shape_cast %85 : vector<1x1x32x32xf32> to vector<32x32xf32>
    %cst_120 = arith.constant dense<0.000000e+00> : vector<128x32xf32>
    %87 = tpu.matmul %84, %86, %cst_120 {dimension_numbers = #tpu.dot_dimension_numbers<[1], [0], [0], [1], [0, 0, 1, 1], [], []>} : vector<128x32xf32>, vector<32x32xf32>, vector<128x32xf32> -> vector<128x32xf32>
    %88 = arith.addf %82, %87 : vector<128x32xf32>
    %c0_121 = arith.constant 0 : index
    %c0_122 = arith.constant 0 : index
    %c2_123 = arith.constant 2 : index
    %c0_124 = arith.constant 0 : index
    %89 = vector.load %arg11[%c0_121, %c0_122, %c2_123, %c0_124] : memref<2x10x10x32xf32, #tpu.memory_space<vmem>>, vector<2x8x8x32xf32>
    %90 = vector.shape_cast %89 : vector<2x8x8x32xf32> to vector<128x32xf32>
    %c1_125 = arith.constant 1 : index
    %c2_126 = arith.constant 2 : index
    %c0_127 = arith.constant 0 : index
    %c0_128 = arith.constant 0 : index
    %91 = vector.load %arg2[%c1_125, %c2_126, %c0_127, %c0_128] : memref<3x9x32x32xf32, #tpu.memory_space<vmem>>, vector<1x1x32x32xf32>
    %92 = vector.shape_cast %91 : vector<1x1x32x32xf32> to vector<32x32xf32>
    %cst_129 = arith.constant dense<0.000000e+00> : vector<128x32xf32>
    %93 = tpu.matmul %90, %92, %cst_129 {dimension_numbers = #tpu.dot_dimension_numbers<[1], [0], [0], [1], [0, 0, 1, 1], [], []>} : vector<128x32xf32>, vector<32x32xf32>, vector<128x32xf32> -> vector<128x32xf32>
    %94 = arith.addf %88, %93 : vector<128x32xf32>
    %c0_130 = arith.constant 0 : index
    %c1_131 = arith.constant 1 : index
    %c0_132 = arith.constant 0 : index
    %c0_133 = arith.constant 0 : index
    %95 = vector.load %arg11[%c0_130, %c1_131, %c0_132, %c0_133] : memref<2x10x10x32xf32, #tpu.memory_space<vmem>>, vector<2x8x8x32xf32>
    %96 = vector.shape_cast %95 : vector<2x8x8x32xf32> to vector<128x32xf32>
    %c1_134 = arith.constant 1 : index
    %c3_135 = arith.constant 3 : index
    %c0_136 = arith.constant 0 : index
    %c0_137 = arith.constant 0 : index
    %97 = vector.load %arg2[%c1_134, %c3_135, %c0_136, %c0_137] : memref<3x9x32x32xf32, #tpu.memory_space<vmem>>, vector<1x1x32x32xf32>
    %98 = vector.shape_cast %97 : vector<1x1x32x32xf32> to vector<32x32xf32>
    %cst_138 = arith.constant dense<0.000000e+00> : vector<128x32xf32>
    %99 = tpu.matmul %96, %98, %cst_138 {dimension_numbers = #tpu.dot_dimension_numbers<[1], [0], [0], [1], [0, 0, 1, 1], [], []>} : vector<128x32xf32>, vector<32x32xf32>, vector<128x32xf32> -> vector<128x32xf32>
    %100 = arith.addf %94, %99 : vector<128x32xf32>
    %c0_139 = arith.constant 0 : index
    %c1_140 = arith.constant 1 : index
    %c1_141 = arith.constant 1 : index
    %c0_142 = arith.constant 0 : index
    %101 = vector.load %arg11[%c0_139, %c1_140, %c1_141, %c0_142] : memref<2x10x10x32xf32, #tpu.memory_space<vmem>>, vector<2x8x8x32xf32>
    %102 = vector.shape_cast %101 : vector<2x8x8x32xf32> to vector<128x32xf32>
    %c1_143 = arith.constant 1 : index
    %c4_144 = arith.constant 4 : index
    %c0_145 = arith.constant 0 : index
    %c0_146 = arith.constant 0 : index
    %103 = vector.load %arg2[%c1_143, %c4_144, %c0_145, %c0_146] : memref<3x9x32x32xf32, #tpu.memory_space<vmem>>, vector<1x1x32x32xf32>
    %104 = vector.shape_cast %103 : vector<1x1x32x32xf32> to vector<32x32xf32>
    %cst_147 = arith.constant dense<0.000000e+00> : vector<128x32xf32>
    %105 = tpu.matmul %102, %104, %cst_147 {dimension_numbers = #tpu.dot_dimension_numbers<[1], [0], [0], [1], [0, 0, 1, 1], [], []>} : vector<128x32xf32>, vector<32x32xf32>, vector<128x32xf32> -> vector<128x32xf32>
    %106 = arith.addf %100, %105 : vector<128x32xf32>
    %c0_148 = arith.constant 0 : index
    %c1_149 = arith.constant 1 : index
    %c2_150 = arith.constant 2 : index
    %c0_151 = arith.constant 0 : index
    %107 = vector.load %arg11[%c0_148, %c1_149, %c2_150, %c0_151] : memref<2x10x10x32xf32, #tpu.memory_space<vmem>>, vector<2x8x8x32xf32>
    %108 = vector.shape_cast %107 : vector<2x8x8x32xf32> to vector<128x32xf32>
    %c1_152 = arith.constant 1 : index
    %c5_153 = arith.constant 5 : index
    %c0_154 = arith.constant 0 : index
    %c0_155 = arith.constant 0 : index
    %109 = vector.load %arg2[%c1_152, %c5_153, %c0_154, %c0_155] : memref<3x9x32x32xf32, #tpu.memory_space<vmem>>, vector<1x1x32x32xf32>
    %110 = vector.shape_cast %109 : vector<1x1x32x32xf32> to vector<32x32xf32>
    %cst_156 = arith.constant dense<0.000000e+00> : vector<128x32xf32>
    %111 = tpu.matmul %108, %110, %cst_156 {dimension_numbers = #tpu.dot_dimension_numbers<[1], [0], [0], [1], [0, 0, 1, 1], [], []>} : vector<128x32xf32>, vector<32x32xf32>, vector<128x32xf32> -> vector<128x32xf32>
    %112 = arith.addf %106, %111 : vector<128x32xf32>
    %c0_157 = arith.constant 0 : index
    %c2_158 = arith.constant 2 : index
    %c0_159 = arith.constant 0 : index
    %c0_160 = arith.constant 0 : index
    %113 = vector.load %arg11[%c0_157, %c2_158, %c0_159, %c0_160] : memref<2x10x10x32xf32, #tpu.memory_space<vmem>>, vector<2x8x8x32xf32>
    %114 = vector.shape_cast %113 : vector<2x8x8x32xf32> to vector<128x32xf32>
    %c1_161 = arith.constant 1 : index
    %c6_162 = arith.constant 6 : index
    %c0_163 = arith.constant 0 : index
    %c0_164 = arith.constant 0 : index
    %115 = vector.load %arg2[%c1_161, %c6_162, %c0_163, %c0_164] : memref<3x9x32x32xf32, #tpu.memory_space<vmem>>, vector<1x1x32x32xf32>
    %116 = vector.shape_cast %115 : vector<1x1x32x32xf32> to vector<32x32xf32>
    %cst_165 = arith.constant dense<0.000000e+00> : vector<128x32xf32>
    %117 = tpu.matmul %114, %116, %cst_165 {dimension_numbers = #tpu.dot_dimension_numbers<[1], [0], [0], [1], [0, 0, 1, 1], [], []>} : vector<128x32xf32>, vector<32x32xf32>, vector<128x32xf32> -> vector<128x32xf32>
    %118 = arith.addf %112, %117 : vector<128x32xf32>
    %c0_166 = arith.constant 0 : index
    %c2_167 = arith.constant 2 : index
    %c1_168 = arith.constant 1 : index
    %c0_169 = arith.constant 0 : index
    %119 = vector.load %arg11[%c0_166, %c2_167, %c1_168, %c0_169] : memref<2x10x10x32xf32, #tpu.memory_space<vmem>>, vector<2x8x8x32xf32>
    %120 = vector.shape_cast %119 : vector<2x8x8x32xf32> to vector<128x32xf32>
    %c1_170 = arith.constant 1 : index
    %c7_171 = arith.constant 7 : index
    %c0_172 = arith.constant 0 : index
    %c0_173 = arith.constant 0 : index
    %121 = vector.load %arg2[%c1_170, %c7_171, %c0_172, %c0_173] : memref<3x9x32x32xf32, #tpu.memory_space<vmem>>, vector<1x1x32x32xf32>
    %122 = vector.shape_cast %121 : vector<1x1x32x32xf32> to vector<32x32xf32>
    %cst_174 = arith.constant dense<0.000000e+00> : vector<128x32xf32>
    %123 = tpu.matmul %120, %122, %cst_174 {dimension_numbers = #tpu.dot_dimension_numbers<[1], [0], [0], [1], [0, 0, 1, 1], [], []>} : vector<128x32xf32>, vector<32x32xf32>, vector<128x32xf32> -> vector<128x32xf32>
    %124 = arith.addf %118, %123 : vector<128x32xf32>
    %c0_175 = arith.constant 0 : index
    %c2_176 = arith.constant 2 : index
    %c2_177 = arith.constant 2 : index
    %c0_178 = arith.constant 0 : index
    %125 = vector.load %arg11[%c0_175, %c2_176, %c2_177, %c0_178] : memref<2x10x10x32xf32, #tpu.memory_space<vmem>>, vector<2x8x8x32xf32>
    %126 = vector.shape_cast %125 : vector<2x8x8x32xf32> to vector<128x32xf32>
    %c1_179 = arith.constant 1 : index
    %c8_180 = arith.constant 8 : index
    %c0_181 = arith.constant 0 : index
    %c0_182 = arith.constant 0 : index
    %127 = vector.load %arg2[%c1_179, %c8_180, %c0_181, %c0_182] : memref<3x9x32x32xf32, #tpu.memory_space<vmem>>, vector<1x1x32x32xf32>
    %128 = vector.shape_cast %127 : vector<1x1x32x32xf32> to vector<32x32xf32>
    %cst_183 = arith.constant dense<0.000000e+00> : vector<128x32xf32>
    %129 = tpu.matmul %126, %128, %cst_183 {dimension_numbers = #tpu.dot_dimension_numbers<[1], [0], [0], [1], [0, 0, 1, 1], [], []>} : vector<128x32xf32>, vector<32x32xf32>, vector<128x32xf32> -> vector<128x32xf32>
    %130 = arith.addf %124, %129 : vector<128x32xf32>
    %c1_184 = arith.constant 1 : index
    %c0_185 = arith.constant 0 : index
    %c0_186 = arith.constant 0 : index
    %131 = vector.load %arg3[%c1_184, %c0_185, %c0_186] : memref<3x1x32xf32, #tpu.memory_space<vmem>>, vector<1x1x32xf32>
    %132 = vector.shape_cast %131 : vector<1x1x32xf32> to vector<1x32xf32>
    %133 = vector.broadcast %132 : vector<1x32xf32> to vector<128x32xf32>
    %134 = arith.mulf %130, %133 : vector<128x32xf32>
    %c1_187 = arith.constant 1 : index
    %c0_188 = arith.constant 0 : index
    %c0_189 = arith.constant 0 : index
    %135 = vector.load %arg4[%c1_187, %c0_188, %c0_189] : memref<3x1x32xf32, #tpu.memory_space<vmem>>, vector<1x1x32xf32>
    %136 = vector.shape_cast %135 : vector<1x1x32xf32> to vector<1x32xf32>
    %137 = vector.broadcast %136 : vector<1x32xf32> to vector<128x32xf32>
    %138 = arith.addf %134, %137 : vector<128x32xf32>
    %cst_190 = arith.constant 0.000000e+00 : f32
    %139 = vector.broadcast %cst_190 : f32 to vector<128x32xf32>
    %140 = arith.cmpf ogt, %138, %139 : vector<128x32xf32>
    %cst_191 = arith.constant 0.00999999977 : f32
    %141 = vector.broadcast %cst_191 : f32 to vector<128x32xf32>
    %142 = arith.mulf %141, %138 : vector<128x32xf32>
    %143 = arith.select %140, %138, %142 : vector<128x32xi1>, vector<128x32xf32>
    %144 = vector.shape_cast %143 : vector<128x32xf32> to vector<2x8x8x32xf32>
    %c0_192 = arith.constant 0 : index
    %c1_193 = arith.constant 1 : index
    %c1_194 = arith.constant 1 : index
    %c0_195 = arith.constant 0 : index
    %145 = vector.load %arg10[%c0_192, %c1_193, %c1_194, %c0_195] : memref<2x10x10x32xf32, #tpu.memory_space<vmem>>, vector<2x8x8x32xf32>
    tpu.vector_store %arg10[%c0_192, %c1_193, %c1_194, %c0_195], %144 {strides = array<i32>} : memref<2x10x10x32xf32, #tpu.memory_space<vmem>>, vector<2x8x8x32xf32>,
    %cst_196 = arith.constant 0.000000e+00 : f32
    %146 = vector.broadcast %cst_196 : f32 to vector<128x32xf32>
    %c0_197 = arith.constant 0 : index
    %c0_198 = arith.constant 0 : index
    %c0_199 = arith.constant 0 : index
    %c0_200 = arith.constant 0 : index
    %147 = vector.load %arg10[%c0_197, %c0_198, %c0_199, %c0_200] : memref<2x10x10x32xf32, #tpu.memory_space<vmem>>, vector<2x8x8x32xf32>
    %148 = vector.shape_cast %147 : vector<2x8x8x32xf32> to vector<128x32xf32>
    %c2_201 = arith.constant 2 : index
    %c0_202 = arith.constant 0 : index
    %c0_203 = arith.constant 0 : index
    %c0_204 = arith.constant 0 : index
    %149 = vector.load %arg2[%c2_201, %c0_202, %c0_203, %c0_204] : memref<3x9x32x32xf32, #tpu.memory_space<vmem>>, vector<1x1x32x32xf32>
    %150 = vector.shape_cast %149 : vector<1x1x32x32xf32> to vector<32x32xf32>
    %cst_205 = arith.constant dense<0.000000e+00> : vector<128x32xf32>
    %151 = tpu.matmul %148, %150, %cst_205 {dimension_numbers = #tpu.dot_dimension_numbers<[1], [0], [0], [1], [0, 0, 1, 1], [], []>} : vector<128x32xf32>, vector<32x32xf32>, vector<128x32xf32> -> vector<128x32xf32>
    %152 = arith.addf %146, %151 : vector<128x32xf32>
    %c0_206 = arith.constant 0 : index
    %c0_207 = arith.constant 0 : index
    %c1_208 = arith.constant 1 : index
    %c0_209 = arith.constant 0 : index
    %153 = vector.load %arg10[%c0_206, %c0_207, %c1_208, %c0_209] : memref<2x10x10x32xf32, #tpu.memory_space<vmem>>, vector<2x8x8x32xf32>
    %154 = vector.shape_cast %153 : vector<2x8x8x32xf32> to vector<128x32xf32>
    %c2_210 = arith.constant 2 : index
    %c1_211 = arith.constant 1 : index
    %c0_212 = arith.constant 0 : index
    %c0_213 = arith.constant 0 : index
    %155 = vector.load %arg2[%c2_210, %c1_211, %c0_212, %c0_213] : memref<3x9x32x32xf32, #tpu.memory_space<vmem>>, vector<1x1x32x32xf32>
    %156 = vector.shape_cast %155 : vector<1x1x32x32xf32> to vector<32x32xf32>
    %cst_214 = arith.constant dense<0.000000e+00> : vector<128x32xf32>
    %157 = tpu.matmul %154, %156, %cst_214 {dimension_numbers = #tpu.dot_dimension_numbers<[1], [0], [0], [1], [0, 0, 1, 1], [], []>} : vector<128x32xf32>, vector<32x32xf32>, vector<128x32xf32> -> vector<128x32xf32>
    %158 = arith.addf %152, %157 : vector<128x32xf32>
    %c0_215 = arith.constant 0 : index
    %c0_216 = arith.constant 0 : index
    %c2_217 = arith.constant 2 : index
    %c0_218 = arith.constant 0 : index
    %159 = vector.load %arg10[%c0_215, %c0_216, %c2_217, %c0_218] : memref<2x10x10x32xf32, #tpu.memory_space<vmem>>, vector<2x8x8x32xf32>
    %160 = vector.shape_cast %159 : vector<2x8x8x32xf32> to vector<128x32xf32>
    %c2_219 = arith.constant 2 : index
    %c2_220 = arith.constant 2 : index
    %c0_221 = arith.constant 0 : index
    %c0_222 = arith.constant 0 : index
    %161 = vector.load %arg2[%c2_219, %c2_220, %c0_221, %c0_222] : memref<3x9x32x32xf32, #tpu.memory_space<vmem>>, vector<1x1x32x32xf32>
    %162 = vector.shape_cast %161 : vector<1x1x32x32xf32> to vector<32x32xf32>
    %cst_223 = arith.constant dense<0.000000e+00> : vector<128x32xf32>
    %163 = tpu.matmul %160, %162, %cst_223 {dimension_numbers = #tpu.dot_dimension_numbers<[1], [0], [0], [1], [0, 0, 1, 1], [], []>} : vector<128x32xf32>, vector<32x32xf32>, vector<128x32xf32> -> vector<128x32xf32>
    %164 = arith.addf %158, %163 : vector<128x32xf32>
    %c0_224 = arith.constant 0 : index
    %c1_225 = arith.constant 1 : index
    %c0_226 = arith.constant 0 : index
    %c0_227 = arith.constant 0 : index
    %165 = vector.load %arg10[%c0_224, %c1_225, %c0_226, %c0_227] : memref<2x10x10x32xf32, #tpu.memory_space<vmem>>, vector<2x8x8x32xf32>
    %166 = vector.shape_cast %165 : vector<2x8x8x32xf32> to vector<128x32xf32>
    %c2_228 = arith.constant 2 : index
    %c3_229 = arith.constant 3 : index
    %c0_230 = arith.constant 0 : index
    %c0_231 = arith.constant 0 : index
    %167 = vector.load %arg2[%c2_228, %c3_229, %c0_230, %c0_231] : memref<3x9x32x32xf32, #tpu.memory_space<vmem>>, vector<1x1x32x32xf32>
    %168 = vector.shape_cast %167 : vector<1x1x32x32xf32> to vector<32x32xf32>
    %cst_232 = arith.constant dense<0.000000e+00> : vector<128x32xf32>
    %169 = tpu.matmul %166, %168, %cst_232 {dimension_numbers = #tpu.dot_dimension_numbers<[1], [0], [0], [1], [0, 0, 1, 1], [], []>} : vector<128x32xf32>, vector<32x32xf32>, vector<128x32xf32> -> vector<128x32xf32>
    %170 = arith.addf %164, %169 : vector<128x32xf32>
    %c0_233 = arith.constant 0 : index
    %c1_234 = arith.constant 1 : index
    %c1_235 = arith.constant 1 : index
    %c0_236 = arith.constant 0 : index
    %171 = vector.load %arg10[%c0_233, %c1_234, %c1_235, %c0_236] : memref<2x10x10x32xf32, #tpu.memory_space<vmem>>, vector<2x8x8x32xf32>
    %172 = vector.shape_cast %171 : vector<2x8x8x32xf32> to vector<128x32xf32>
    %c2_237 = arith.constant 2 : index
    %c4_238 = arith.constant 4 : index
    %c0_239 = arith.constant 0 : index
    %c0_240 = arith.constant 0 : index
    %173 = vector.load %arg2[%c2_237, %c4_238, %c0_239, %c0_240] : memref<3x9x32x32xf32, #tpu.memory_space<vmem>>, vector<1x1x32x32xf32>
    %174 = vector.shape_cast %173 : vector<1x1x32x32xf32> to vector<32x32xf32>
    %cst_241 = arith.constant dense<0.000000e+00> : vector<128x32xf32>
    %175 = tpu.matmul %172, %174, %cst_241 {dimension_numbers = #tpu.dot_dimension_numbers<[1], [0], [0], [1], [0, 0, 1, 1], [], []>} : vector<128x32xf32>, vector<32x32xf32>, vector<128x32xf32> -> vector<128x32xf32>
    %176 = arith.addf %170, %175 : vector<128x32xf32>
    %c0_242 = arith.constant 0 : index
    %c1_243 = arith.constant 1 : index
    %c2_244 = arith.constant 2 : index
    %c0_245 = arith.constant 0 : index
    %177 = vector.load %arg10[%c0_242, %c1_243, %c2_244, %c0_245] : memref<2x10x10x32xf32, #tpu.memory_space<vmem>>, vector<2x8x8x32xf32>
    %178 = vector.shape_cast %177 : vector<2x8x8x32xf32> to vector<128x32xf32>
    %c2_246 = arith.constant 2 : index
    %c5_247 = arith.constant 5 : index
    %c0_248 = arith.constant 0 : index
    %c0_249 = arith.constant 0 : index
    %179 = vector.load %arg2[%c2_246, %c5_247, %c0_248, %c0_249] : memref<3x9x32x32xf32, #tpu.memory_space<vmem>>, vector<1x1x32x32xf32>
    %180 = vector.shape_cast %179 : vector<1x1x32x32xf32> to vector<32x32xf32>
    %cst_250 = arith.constant dense<0.000000e+00> : vector<128x32xf32>
    %181 = tpu.matmul %178, %180, %cst_250 {dimension_numbers = #tpu.dot_dimension_numbers<[1], [0], [0], [1], [0, 0, 1, 1], [], []>} : vector<128x32xf32>, vector<32x32xf32>, vector<128x32xf32> -> vector<128x32xf32>
    %182 = arith.addf %176, %181 : vector<128x32xf32>
    %c0_251 = arith.constant 0 : index
    %c2_252 = arith.constant 2 : index
    %c0_253 = arith.constant 0 : index
    %c0_254 = arith.constant 0 : index
    %183 = vector.load %arg10[%c0_251, %c2_252, %c0_253, %c0_254] : memref<2x10x10x32xf32, #tpu.memory_space<vmem>>, vector<2x8x8x32xf32>
    %184 = vector.shape_cast %183 : vector<2x8x8x32xf32> to vector<128x32xf32>
    %c2_255 = arith.constant 2 : index
    %c6_256 = arith.constant 6 : index
    %c0_257 = arith.constant 0 : index
    %c0_258 = arith.constant 0 : index
    %185 = vector.load %arg2[%c2_255, %c6_256, %c0_257, %c0_258] : memref<3x9x32x32xf32, #tpu.memory_space<vmem>>, vector<1x1x32x32xf32>
    %186 = vector.shape_cast %185 : vector<1x1x32x32xf32> to vector<32x32xf32>
    %cst_259 = arith.constant dense<0.000000e+00> : vector<128x32xf32>
    %187 = tpu.matmul %184, %186, %cst_259 {dimension_numbers = #tpu.dot_dimension_numbers<[1], [0], [0], [1], [0, 0, 1, 1], [], []>} : vector<128x32xf32>, vector<32x32xf32>, vector<128x32xf32> -> vector<128x32xf32>
    %188 = arith.addf %182, %187 : vector<128x32xf32>
    %c0_260 = arith.constant 0 : index
    %c2_261 = arith.constant 2 : index
    %c1_262 = arith.constant 1 : index
    %c0_263 = arith.constant 0 : index
    %189 = vector.load %arg10[%c0_260, %c2_261, %c1_262, %c0_263] : memref<2x10x10x32xf32, #tpu.memory_space<vmem>>, vector<2x8x8x32xf32>
    %190 = vector.shape_cast %189 : vector<2x8x8x32xf32> to vector<128x32xf32>
    %c2_264 = arith.constant 2 : index
    %c7_265 = arith.constant 7 : index
    %c0_266 = arith.constant 0 : index
    %c0_267 = arith.constant 0 : index
    %191 = vector.load %arg2[%c2_264, %c7_265, %c0_266, %c0_267] : memref<3x9x32x32xf32, #tpu.memory_space<vmem>>, vector<1x1x32x32xf32>
    %192 = vector.shape_cast %191 : vector<1x1x32x32xf32> to vector<32x32xf32>
    %cst_268 = arith.constant dense<0.000000e+00> : vector<128x32xf32>
    %193 = tpu.matmul %190, %192, %cst_268 {dimension_numbers = #tpu.dot_dimension_numbers<[1], [0], [0], [1], [0, 0, 1, 1], [], []>} : vector<128x32xf32>, vector<32x32xf32>, vector<128x32xf32> -> vector<128x32xf32>
    %194 = arith.addf %188, %193 : vector<128x32xf32>
    %c0_269 = arith.constant 0 : index
    %c2_270 = arith.constant 2 : index
    %c2_271 = arith.constant 2 : index
    %c0_272 = arith.constant 0 : index
    %195 = vector.load %arg10[%c0_269, %c2_270, %c2_271, %c0_272] : memref<2x10x10x32xf32, #tpu.memory_space<vmem>>, vector<2x8x8x32xf32>
    %196 = vector.shape_cast %195 : vector<2x8x8x32xf32> to vector<128x32xf32>
    %c2_273 = arith.constant 2 : index
    %c8_274 = arith.constant 8 : index
    %c0_275 = arith.constant 0 : index
    %c0_276 = arith.constant 0 : index
    %197 = vector.load %arg2[%c2_273, %c8_274, %c0_275, %c0_276] : memref<3x9x32x32xf32, #tpu.memory_space<vmem>>, vector<1x1x32x32xf32>
    %198 = vector.shape_cast %197 : vector<1x1x32x32xf32> to vector<32x32xf32>
    %cst_277 = arith.constant dense<0.000000e+00> : vector<128x32xf32>
    %199 = tpu.matmul %196, %198, %cst_277 {dimension_numbers = #tpu.dot_dimension_numbers<[1], [0], [0], [1], [0, 0, 1, 1], [], []>} : vector<128x32xf32>, vector<32x32xf32>, vector<128x32xf32> -> vector<128x32xf32>
    %200 = arith.addf %194, %199 : vector<128x32xf32>
    %c2_278 = arith.constant 2 : index
    %c0_279 = arith.constant 0 : index
    %c0_280 = arith.constant 0 : index
    %201 = vector.load %arg3[%c2_278, %c0_279, %c0_280] : memref<3x1x32xf32, #tpu.memory_space<vmem>>, vector<1x1x32xf32>
    %202 = vector.shape_cast %201 : vector<1x1x32xf32> to vector<1x32xf32>
    %203 = vector.broadcast %202 : vector<1x32xf32> to vector<128x32xf32>
    %204 = arith.mulf %200, %203 : vector<128x32xf32>
    %c2_281 = arith.constant 2 : index
    %c0_282 = arith.constant 0 : index
    %c0_283 = arith.constant 0 : index
    %205 = vector.load %arg4[%c2_281, %c0_282, %c0_283] : memref<3x1x32xf32, #tpu.memory_space<vmem>>, vector<1x1x32xf32>
    %206 = vector.shape_cast %205 : vector<1x1x32xf32> to vector<1x32xf32>
    %207 = vector.broadcast %206 : vector<1x32xf32> to vector<128x32xf32>
    %208 = arith.addf %204, %207 : vector<128x32xf32>
    %cst_284 = arith.constant 0.000000e+00 : f32
    %209 = vector.broadcast %cst_284 : f32 to vector<128x32xf32>
    %210 = arith.cmpf ogt, %208, %209 : vector<128x32xf32>
    %cst_285 = arith.constant 0.00999999977 : f32
    %211 = vector.broadcast %cst_285 : f32 to vector<128x32xf32>
    %212 = arith.mulf %211, %208 : vector<128x32xf32>
    %213 = arith.select %210, %208, %212 : vector<128x32xi1>, vector<128x32xf32>
    %214 = vector.shape_cast %213 : vector<128x32xf32> to vector<2x8x8x32xf32>
    %c0_286 = arith.constant 0 : index
    %c1_287 = arith.constant 1 : index
    %c1_288 = arith.constant 1 : index
    %c0_289 = arith.constant 0 : index
    %215 = vector.load %arg11[%c0_286, %c1_287, %c1_288, %c0_289] : memref<2x10x10x32xf32, #tpu.memory_space<vmem>>, vector<2x8x8x32xf32>
    tpu.vector_store %arg11[%c0_286, %c1_287, %c1_288, %c0_289], %214 {strides = array<i32>} : memref<2x10x10x32xf32, #tpu.memory_space<vmem>>, vector<2x8x8x32xf32>,
    %c0_290 = arith.constant 0 : index
    %c1_291 = arith.constant 1 : index
    %c1_292 = arith.constant 1 : index
    %c0_293 = arith.constant 0 : index
    %216 = vector.load %arg11[%c0_290, %c1_291, %c1_292, %c0_293] : memref<2x10x10x32xf32, #tpu.memory_space<vmem>>, vector<2x8x8x32xf32>
    %217 = vector.shape_cast %216 : vector<2x8x8x32xf32> to vector<128x32xf32>
    %c0_294 = arith.constant 0 : index
    %c0_295 = arith.constant 0 : index
    %218 = vector.load %arg5[%c0_294, %c0_295] : memref<32x35xf32, #tpu.memory_space<vmem>>, vector<32x35xf32>
    %cst_296 = arith.constant dense<0.000000e+00> : vector<128x35xf32>
    %219 = tpu.matmul %217, %218, %cst_296 {dimension_numbers = #tpu.dot_dimension_numbers<[1], [0], [0], [1], [0, 0, 1, 1], [], []>} : vector<128x32xf32>, vector<32x35xf32>, vector<128x35xf32> -> vector<128x35xf32>
    %c0_297 = arith.constant 0 : index
    %c0_298 = arith.constant 0 : index
    %220 = vector.load %arg6[%c0_297, %c0_298] : memref<1x35xf32, #tpu.memory_space<vmem>>, vector<1x35xf32>
    %221 = vector.broadcast %220 : vector<1x35xf32> to vector<128x35xf32>
    %222 = arith.mulf %219, %221 : vector<128x35xf32>
    %c0_299 = arith.constant 0 : index
    %c0_300 = arith.constant 0 : index
    %223 = vector.load %arg7[%c0_299, %c0_300] : memref<1x35xf32, #tpu.memory_space<vmem>>, vector<1x35xf32>
    %224 = vector.broadcast %223 : vector<1x35xf32> to vector<128x35xf32>
    %225 = arith.addf %222, %224 : vector<128x35xf32>
    %cst_301 = arith.constant 0.000000e+00 : f32
    %226 = vector.broadcast %cst_301 : f32 to vector<128x35xf32>
    %227 = arith.cmpf ogt, %225, %226 : vector<128x35xf32>
    %cst_302 = arith.constant 0.00999999977 : f32
    %228 = vector.broadcast %cst_302 : f32 to vector<128x35xf32>
    %229 = arith.mulf %228, %225 : vector<128x35xf32>
    %230 = arith.select %227, %225, %229 : vector<128x35xi1>, vector<128x35xf32>
    %231 = vector.extract_strided_slice %230 {offsets = [0, 0], sizes = [128, 32], strides = [1, 1]} : vector<128x35xf32> to vector<128x32xf32>
    %232 = vector.shape_cast %231 : vector<128x32xf32> to vector<2x64x32xf32>
    %c0_303 = arith.constant 0 : index
    %c0_304 = arith.constant 0 : index
    %c0_305 = arith.constant 0 : index
    %233 = vector.load %arg8[%c0_303, %c0_304, %c0_305] : memref<2x64x32xf32, #tpu.memory_space<vmem>>, vector<2x64x32xf32>
    tpu.vector_store %arg8[%c0_303, %c0_304, %c0_305], %232 {strides = array<i32>} : memref<2x64x32xf32, #tpu.memory_space<vmem>>, vector<2x64x32xf32>,
    %234 = vector.extract_strided_slice %230 {offsets = [0, 32], sizes = [128, 3], strides = [1, 1]} : vector<128x35xf32> to vector<128x3xf32>
    %235 = vector.shape_cast %234 : vector<128x3xf32> to vector<2x64x3xf32>
    %c0_306 = arith.constant 0 : index
    %c0_307 = arith.constant 0 : index
    %c0_308 = arith.constant 0 : index
    %236 = vector.load %arg9[%c0_306, %c0_307, %c0_308] : memref<2x64x3xf32, #tpu.memory_space<vmem>>, vector<2x64x3xf32>
    tpu.vector_store %arg9[%c0_306, %c0_307, %c0_308], %235 {strides = array<i32>} : memref<2x64x3xf32, #tpu.memory_space<vmem>>, vector<2x64x3xf32>,
    return
  }
  func.func @transform_0(%arg0: i32) -> (i32, i32, i32, i32) {
    %c0_i32 = arith.constant 0 : i32
    %c0_i32_0 = arith.constant 0 : i32
    %c0_i32_1 = arith.constant 0 : i32
    %c0_i32_2 = arith.constant 0 : i32
    %c0_i32_3 = arith.constant 0 : i32
    return %c0_i32, %c0_i32_0, %c0_i32_1, %c0_i32_2 : i32, i32, i32, i32
  }
  func.func @transform_1(%arg0: i32) -> (i32, i32, i32, i32) {
    %c0_i32 = arith.constant 0 : i32
    %c0_i32_0 = arith.constant 0 : i32
    %c0_i32_1 = arith.constant 0 : i32
    %c0_i32_2 = arith.constant 0 : i32
    %c0_i32_3 = arith.constant 0 : i32
    return %c0_i32, %c0_i32_0, %c0_i32_1, %c0_i32_2 : i32, i32, i32, i32
  }
  func.func @transform_2(%arg0: i32) -> (i32, i32, i32) {
    %c0_i32 = arith.constant 0 : i32
    %c0_i32_0 = arith.constant 0 : i32
    %c0_i32_1 = arith.constant 0 : i32
    %c0_i32_2 = arith.constant 0 : i32
    return %c0_i32, %c0_i32_0, %c0_i32_1 : i32, i32, i32
  }
  func.func @transform_3(%arg0: i32) -> (i32, i32, i32) {
    %c0_i32 = arith.constant 0 : i32
    %c0_i32_0 = arith.constant 0 : i32
    %c0_i32_1 = arith.constant 0 : i32
    %c0_i32_2 = arith.constant 0 : i32
    return %c0_i32, %c0_i32_0, %c0_i32_1 : i32, i32, i32
  }
  func.func @transform_4(%arg0: i32) -> (i32, i32) {
    %c0_i32 = arith.constant 0 : i32
    %c0_i32_0 = arith.constant 0 : i32
    %c0_i32_1 = arith.constant 0 : i32
    return %c0_i32, %c0_i32_0 : i32, i32
  }
  func.func @transform_5(%arg0: i32) -> (i32, i32) {
    %c0_i32 = arith.constant 0 : i32
    %c0_i32_0 = arith.constant 0 : i32
    %c0_i32_1 = arith.constant 0 : i32
    return %c0_i32, %c0_i32_0 : i32, i32
  }
  func.func @transform_6(%arg0: i32) -> (i32, i32) {
    %c0_i32 = arith.constant 0 : i32
    %c0_i32_0 = arith.constant 0 : i32
    %c0_i32_1 = arith.constant 0 : i32
    return %c0_i32, %c0_i32_0 : i32, i32
  }
  func.func @transform_7(%arg0: i32) -> (i32, i32, i32) {
    %c0_i32 = arith.constant 0 : i32
    %c0_i32_0 = arith.constant 0 : i32
    %c0_i32_1 = arith.constant 0 : i32
    %c0_i32_2 = arith.constant 0 : i32
    return %c0_i32, %c0_i32_0, %c0_i32_1 : i32, i32, i32
  }
  func.func @transform_8(%arg0: i32) -> (i32, i32, i32) {
    %c0_i32 = arith.constant 0 : i32
    %c0_i32_0 = arith.constant 0 : i32
    %c0_i32_1 = arith.constant 0 : i32
    %c0_i32_2 = arith.constant 0 : i32
    return %c0_i32, %c0_i32_0, %c0_i32_1 : i32, i32, i32
  }
}

module attributes {stable_mosaic.version = 11 : i64} {
  func.func @fc_heads_opp_kernel(%arg0: i32, %arg1: memref<2x2048xf32, #tpu.memory_space<vmem>>, %arg2: memref<2x192xf32, #tpu.memory_space<vmem>>, %arg3: memref<2x192xf32, #tpu.memory_space<vmem>>, %arg4: memref<2048x16xf32, #tpu.memory_space<vmem>>, %arg5: memref<1x16xf32, #tpu.memory_space<vmem>>, %arg6: memref<192x32xf32, #tpu.memory_space<vmem>>, %arg7: memref<1x32xf32, #tpu.memory_space<vmem>>, %arg8: memref<32x1xf32, #tpu.memory_space<vmem>>, %arg9: memref<1x1xf32, #tpu.memory_space<vmem>>, %arg10: memref<192x128xf32, #tpu.memory_space<vmem>>, %arg11: memref<1x128xf32, #tpu.memory_space<vmem>>, %arg12: memref<128x16xf32, #tpu.memory_space<vmem>>, %arg13: memref<1x16xf32, #tpu.memory_space<vmem>>, %arg14: memref<2x16xf32, #tpu.memory_space<vmem>>, %arg15: memref<2x1xf32, #tpu.memory_space<vmem>>) attributes {dimension_semantics = [#tpu.dimension_semantics<arbitrary>], iteration_bounds = array<i64: 1>, scalar_prefetch = 0 : i64, scratch_operands = 0 : i64, tpu.core_type = #tpu.core_type<tc>, window_params = [{pipeline_mode = #tpu.pipeline_mode<synchronous>, transform_indices = @transform_0, window_bounds = array<i64: 2, 2048>}, {pipeline_mode = #tpu.pipeline_mode<synchronous>, transform_indices = @transform_1, window_bounds = array<i64: 2, 192>}, {pipeline_mode = #tpu.pipeline_mode<synchronous>, transform_indices = @transform_2, window_bounds = array<i64: 2, 192>}, {pipeline_mode = #tpu.pipeline_mode<synchronous>, transform_indices = @transform_3, window_bounds = array<i64: 2048, 16>}, {pipeline_mode = #tpu.pipeline_mode<synchronous>, transform_indices = @transform_4, window_bounds = array<i64: 1, 16>}, {pipeline_mode = #tpu.pipeline_mode<synchronous>, transform_indices = @transform_5, window_bounds = array<i64: 192, 32>}, {pipeline_mode = #tpu.pipeline_mode<synchronous>, transform_indices = @transform_6, window_bounds = array<i64: 1, 32>}, {pipeline_mode = #tpu.pipeline_mode<synchronous>, transform_indices = @transform_7, window_bounds = array<i64: 32, 1>}, {pipeline_mode = #tpu.pipeline_mode<synchronous>, transform_indices = @transform_8, window_bounds = array<i64: 1, 1>}, {pipeline_mode = #tpu.pipeline_mode<synchronous>, transform_indices = @transform_9, window_bounds = array<i64: 192, 128>}, {pipeline_mode = #tpu.pipeline_mode<synchronous>, transform_indices = @transform_10, window_bounds = array<i64: 1, 128>}, {pipeline_mode = #tpu.pipeline_mode<synchronous>, transform_indices = @transform_11, window_bounds = array<i64: 128, 16>}, {pipeline_mode = #tpu.pipeline_mode<synchronous>, transform_indices = @transform_12, window_bounds = array<i64: 1, 16>}, {pipeline_mode = #tpu.pipeline_mode<synchronous>, transform_indices = @transform_13, window_bounds = array<i64: 2, 16>}, {pipeline_mode = #tpu.pipeline_mode<synchronous>, transform_indices = @transform_14, window_bounds = array<i64: 2, 1>}]} {
    %c0 = arith.constant 0 : index
    %c0_0 = arith.constant 0 : index
    %0 = vector.load %arg1[%c0, %c0_0] : memref<2x2048xf32, #tpu.memory_space<vmem>>, vector<2x2048xf32>
    %c0_1 = arith.constant 0 : index
    %c0_2 = arith.constant 0 : index
    %1 = vector.load %arg4[%c0_1, %c0_2] : memref<2048x16xf32, #tpu.memory_space<vmem>>, vector<2048x16xf32>
    %cst = arith.constant dense<0.000000e+00> : vector<2x16xf32>
    %2 = tpu.matmul %0, %1, %cst {dimension_numbers = #tpu.dot_dimension_numbers<[1], [0], [0], [1], [0, 0, 1, 1], [], []>} : vector<2x2048xf32>, vector<2048x16xf32>, vector<2x16xf32> -> vector<2x16xf32>
    %c0_3 = arith.constant 0 : index
    %c0_4 = arith.constant 0 : index
    %3 = vector.load %arg5[%c0_3, %c0_4] : memref<1x16xf32, #tpu.memory_space<vmem>>, vector<1x16xf32>
    %4 = vector.broadcast %3 : vector<1x16xf32> to vector<2x16xf32>
    %5 = arith.addf %2, %4 : vector<2x16xf32>
    %c0_5 = arith.constant 0 : index
    %c0_6 = arith.constant 0 : index
    %6 = vector.load %arg2[%c0_5, %c0_6] : memref<2x192xf32, #tpu.memory_space<vmem>>, vector<2x192xf32>
    %c0_7 = arith.constant 0 : index
    %c0_8 = arith.constant 0 : index
    %7 = vector.load %arg6[%c0_7, %c0_8] : memref<192x32xf32, #tpu.memory_space<vmem>>, vector<192x32xf32>
    %cst_9 = arith.constant dense<0.000000e+00> : vector<2x32xf32>
    %8 = tpu.matmul %6, %7, %cst_9 {dimension_numbers = #tpu.dot_dimension_numbers<[1], [0], [0], [1], [0, 0, 1, 1], [], []>} : vector<2x192xf32>, vector<192x32xf32>, vector<2x32xf32> -> vector<2x32xf32>
    %c0_10 = arith.constant 0 : index
    %c0_11 = arith.constant 0 : index
    %9 = vector.load %arg7[%c0_10, %c0_11] : memref<1x32xf32, #tpu.memory_space<vmem>>, vector<1x32xf32>
    %10 = vector.broadcast %9 : vector<1x32xf32> to vector<2x32xf32>
    %11 = arith.addf %8, %10 : vector<2x32xf32>
    %cst_12 = arith.constant 0.000000e+00 : f32
    %12 = vector.broadcast %cst_12 : f32 to vector<2x32xf32>
    %13 = arith.cmpf ogt, %11, %12 : vector<2x32xf32>
    %cst_13 = arith.constant 0.00999999977 : f32
    %14 = vector.broadcast %cst_13 : f32 to vector<2x32xf32>
    %15 = arith.mulf %14, %11 : vector<2x32xf32>
    %16 = arith.select %13, %11, %15 : vector<2x32xi1>, vector<2x32xf32>
    %c0_14 = arith.constant 0 : index
    %c0_15 = arith.constant 0 : index
    %17 = vector.load %arg8[%c0_14, %c0_15] : memref<32x1xf32, #tpu.memory_space<vmem>>, vector<32x1xf32>
    %cst_16 = arith.constant dense<0.000000e+00> : vector<2x1xf32>
    %18 = tpu.matmul %16, %17, %cst_16 {dimension_numbers = #tpu.dot_dimension_numbers<[1], [0], [0], [1], [0, 0, 1, 1], [], []>} : vector<2x32xf32>, vector<32x1xf32>, vector<2x1xf32> -> vector<2x1xf32>
    %c0_17 = arith.constant 0 : index
    %c0_18 = arith.constant 0 : index
    %19 = vector.load %arg9[%c0_17, %c0_18] : memref<1x1xf32, #tpu.memory_space<vmem>>, vector<1x1xf32>
    %20 = vector.broadcast %19 : vector<1x1xf32> to vector<2x1xf32>
    %21 = arith.addf %18, %20 : vector<2x1xf32>
    %22 = math.tanh %21 : vector<2x1xf32>
    %c0_19 = arith.constant 0 : index
    %c0_20 = arith.constant 0 : index
    %23 = vector.load %arg15[%c0_19, %c0_20] : memref<2x1xf32, #tpu.memory_space<vmem>>, vector<2x1xf32>
    tpu.vector_store %arg15[%c0_19, %c0_20], %22 {strides = array<i32>} : memref<2x1xf32, #tpu.memory_space<vmem>>, vector<2x1xf32>,
    %c0_21 = arith.constant 0 : index
    %c0_22 = arith.constant 0 : index
    %24 = vector.load %arg3[%c0_21, %c0_22] : memref<2x192xf32, #tpu.memory_space<vmem>>, vector<2x192xf32>
    %c0_23 = arith.constant 0 : index
    %c0_24 = arith.constant 0 : index
    %25 = vector.load %arg10[%c0_23, %c0_24] : memref<192x128xf32, #tpu.memory_space<vmem>>, vector<192x128xf32>
    %cst_25 = arith.constant dense<0.000000e+00> : vector<2x128xf32>
    %26 = tpu.matmul %24, %25, %cst_25 {dimension_numbers = #tpu.dot_dimension_numbers<[1], [0], [0], [1], [0, 0, 1, 1], [], []>} : vector<2x192xf32>, vector<192x128xf32>, vector<2x128xf32> -> vector<2x128xf32>
    %c0_26 = arith.constant 0 : index
    %c0_27 = arith.constant 0 : index
    %27 = vector.load %arg11[%c0_26, %c0_27] : memref<1x128xf32, #tpu.memory_space<vmem>>, vector<1x128xf32>
    %28 = vector.broadcast %27 : vector<1x128xf32> to vector<2x128xf32>
    %29 = arith.addf %26, %28 : vector<2x128xf32>
    %cst_28 = arith.constant 0.000000e+00 : f32
    %30 = vector.broadcast %cst_28 : f32 to vector<2x128xf32>
    %31 = arith.maximumf %29, %30 : vector<2x128xf32>
    %c0_29 = arith.constant 0 : index
    %c0_30 = arith.constant 0 : index
    %32 = vector.load %arg12[%c0_29, %c0_30] : memref<128x16xf32, #tpu.memory_space<vmem>>, vector<128x16xf32>
    %cst_31 = arith.constant dense<0.000000e+00> : vector<2x16xf32>
    %33 = tpu.matmul %31, %32, %cst_31 {dimension_numbers = #tpu.dot_dimension_numbers<[1], [0], [0], [1], [0, 0, 1, 1], [], []>} : vector<2x128xf32>, vector<128x16xf32>, vector<2x16xf32> -> vector<2x16xf32>
    %c0_32 = arith.constant 0 : index
    %c0_33 = arith.constant 0 : index
    %34 = vector.load %arg13[%c0_32, %c0_33] : memref<1x16xf32, #tpu.memory_space<vmem>>, vector<1x16xf32>
    %35 = vector.broadcast %34 : vector<1x16xf32> to vector<2x16xf32>
    %36 = arith.addf %33, %35 : vector<2x16xf32>
    %cst_34 = arith.constant dense<0xFF800000> : vector<2xf32>
    %37 = vector.multi_reduction <maximumf>, %36, %cst_34 [1] : vector<2x16xf32> to vector<2xf32>
    %38 = vector.shape_cast %37 : vector<2xf32> to vector<2x1xf32>
    %39 = vector.broadcast %38 : vector<2x1xf32> to vector<2x16xf32>
    %40 = arith.subf %36, %39 : vector<2x16xf32>
    %41 = math.exp %40 : vector<2x16xf32>
    %cst_35 = arith.constant dense<0.000000e+00> : vector<2xf32>
    %42 = vector.multi_reduction <add>, %41, %cst_35 [1] : vector<2x16xf32> to vector<2xf32>
    %43 = vector.shape_cast %42 : vector<2xf32> to vector<2x1xf32>
    %44 = vector.broadcast %43 : vector<2x1xf32> to vector<2x16xf32>
    %45 = arith.divf %41, %44 : vector<2x16xf32>
    %46 = arith.mulf %5, %45 : vector<2x16xf32>
    %c0_36 = arith.constant 0 : index
    %c0_37 = arith.constant 0 : index
    %47 = vector.load %arg14[%c0_36, %c0_37] : memref<2x16xf32, #tpu.memory_space<vmem>>, vector<2x16xf32>
    tpu.vector_store %arg14[%c0_36, %c0_37], %46 {strides = array<i32>} : memref<2x16xf32, #tpu.memory_space<vmem>>, vector<2x16xf32>,
    return
  }
  func.func @transform_0(%arg0: i32) -> (i32, i32) {
    %c0_i32 = arith.constant 0 : i32
    %c0_i32_0 = arith.constant 0 : i32
    %c0_i32_1 = arith.constant 0 : i32
    return %c0_i32, %c0_i32_0 : i32, i32
  }
  func.func @transform_1(%arg0: i32) -> (i32, i32) {
    %c0_i32 = arith.constant 0 : i32
    %c0_i32_0 = arith.constant 0 : i32
    %c0_i32_1 = arith.constant 0 : i32
    return %c0_i32, %c0_i32_0 : i32, i32
  }
  func.func @transform_2(%arg0: i32) -> (i32, i32) {
    %c0_i32 = arith.constant 0 : i32
    %c0_i32_0 = arith.constant 0 : i32
    %c0_i32_1 = arith.constant 0 : i32
    return %c0_i32, %c0_i32_0 : i32, i32
  }
  func.func @transform_3(%arg0: i32) -> (i32, i32) {
    %c0_i32 = arith.constant 0 : i32
    %c0_i32_0 = arith.constant 0 : i32
    %c0_i32_1 = arith.constant 0 : i32
    return %c0_i32, %c0_i32_0 : i32, i32
  }
  func.func @transform_4(%arg0: i32) -> (i32, i32) {
    %c0_i32 = arith.constant 0 : i32
    %c0_i32_0 = arith.constant 0 : i32
    %c0_i32_1 = arith.constant 0 : i32
    return %c0_i32, %c0_i32_0 : i32, i32
  }
  func.func @transform_5(%arg0: i32) -> (i32, i32) {
    %c0_i32 = arith.constant 0 : i32
    %c0_i32_0 = arith.constant 0 : i32
    %c0_i32_1 = arith.constant 0 : i32
    return %c0_i32, %c0_i32_0 : i32, i32
  }
  func.func @transform_6(%arg0: i32) -> (i32, i32) {
    %c0_i32 = arith.constant 0 : i32
    %c0_i32_0 = arith.constant 0 : i32
    %c0_i32_1 = arith.constant 0 : i32
    return %c0_i32, %c0_i32_0 : i32, i32
  }
  func.func @transform_7(%arg0: i32) -> (i32, i32) {
    %c0_i32 = arith.constant 0 : i32
    %c0_i32_0 = arith.constant 0 : i32
    %c0_i32_1 = arith.constant 0 : i32
    return %c0_i32, %c0_i32_0 : i32, i32
  }
  func.func @transform_8(%arg0: i32) -> (i32, i32) {
    %c0_i32 = arith.constant 0 : i32
    %c0_i32_0 = arith.constant 0 : i32
    %c0_i32_1 = arith.constant 0 : i32
    return %c0_i32, %c0_i32_0 : i32, i32
  }
  func.func @transform_9(%arg0: i32) -> (i32, i32) {
    %c0_i32 = arith.constant 0 : i32
    %c0_i32_0 = arith.constant 0 : i32
    %c0_i32_1 = arith.constant 0 : i32
    return %c0_i32, %c0_i32_0 : i32, i32
  }
  func.func @transform_10(%arg0: i32) -> (i32, i32) {
    %c0_i32 = arith.constant 0 : i32
    %c0_i32_0 = arith.constant 0 : i32
    %c0_i32_1 = arith.constant 0 : i32
    return %c0_i32, %c0_i32_0 : i32, i32
  }
  func.func @transform_11(%arg0: i32) -> (i32, i32) {
    %c0_i32 = arith.constant 0 : i32
    %c0_i32_0 = arith.constant 0 : i32
    %c0_i32_1 = arith.constant 0 : i32
    return %c0_i32, %c0_i32_0 : i32, i32
  }
  func.func @transform_12(%arg0: i32) -> (i32, i32) {
    %c0_i32 = arith.constant 0 : i32
    %c0_i32_0 = arith.constant 0 : i32
    %c0_i32_1 = arith.constant 0 : i32
    return %c0_i32, %c0_i32_0 : i32, i32
  }
  func.func @transform_13(%arg0: i32) -> (i32, i32) {
    %c0_i32 = arith.constant 0 : i32
    %c0_i32_0 = arith.constant 0 : i32
    %c0_i32_1 = arith.constant 0 : i32
    return %c0_i32, %c0_i32_0 : i32, i32
  }
  func.func @transform_14(%arg0: i32) -> (i32, i32) {
    %c0_i32 = arith.constant 0 : i32
    %c0_i32_0 = arith.constant 0 : i32
    %c0_i32_1 = arith.constant 0 : i32
    return %c0_i32, %c0_i32_0 : i32, i32
  }
}

</mosaic_0001>

<bundles_post_ra>
// kernel: forward.3
= control target key start
LH: loop header
LB: loop body
LE: loop exit
PB: predicated region body
PF: predicated region fallthrough
CT: control target
= control target key end

     0   :  { %s3357_s0 = inlined_call_operand.vmem [shape: f32[2,2048], index: 0, kind: input, shape index: {}]   ;;  %s3358_s1 = inlined_call_operand.vmem [shape: f32[2,192], index: 1, kind: input, shape index: {}]   ;;  %s3359_s2 = inlined_call_operand.vmem [shape: f32[2,192], index: 2, kind: input, shape index: {}]   ;;  %s3360_s3 = inlined_call_operand.vmem [shape: f32[2048,16], index: 3, kind: input, shape index: {}]   ;;  %s3361_s4 = inlined_call_operand.vmem [shape: f32[1,16], index: 4, kind: input, shape index: {}]   ;;  %s3362_s5 = inlined_call_operand.vmem [shape: f32[192,32], index: 5, kind: input, shape index: {}]   ;;  %s3363_s6 = inlined_call_operand.vmem [shape: f32[1,32], index: 6, kind: input, shape index: {}]   ;;  %s3364_s7 = inlined_call_operand.vmem [shape: f32[32,1], index: 7, kind: input, shape index: {}]   ;;  %s3365_s8 = inlined_call_operand.<no memory space> [shape: f32[1,1], index: 8, kind: input, shape index: {}]   ;;  %s3366_s9 = inlined_call_operand.vmem [shape: f32[192,128], index: 9, kind: input, shape index: {}]   ;;  %s3367_s10 = inlined_call_operand.vmem [shape: f32[1,128], index: 10, kind: input, shape index: {}]   ;;  %s3368_s11 = inlined_call_operand.vmem [shape: f32[128,16], index: 11, kind: input, shape index: {}]   ;;  %s3369_s12 = inlined_call_operand.vmem [shape: f32[1,16], index: 12, kind: input, shape index: {}]   ;;  %s3370_s13 = inlined_call_operand.hbm [shape: f32[2,16], index: 13, kind: output, shape index: {0}]   ;;  %s3371_s14 = inlined_call_operand.vmem [shape: f32[2,1], index: 14, kind: output, shape index: {1}]  }
   0x1   :  { %v20_v0 = vstv %s3365_s8 }
   0x2   :  { %21 = vst [vmem:[#allocation2] sm:$0x1] %v20_v0 }
   0x3   :  { %v69_v1 = vld [vmem:[%s3360_s3 + $0x80] sm:$0xff]  ;;  %v70_v2 = vld [vmem:[%s3360_s3 + $0x88] sm:$0xff]  ;;  %v71_v12 = vld [vmem:[%s3360_s3 + $0x90] sm:$0xff]  ;;  %v2165_v44 = vmov 1983009808   ;;  %v324_v46 = vlaneseq }
   0x4   :  { %v53_v3 = vld [vmem:[%s3360_s3] sm:$0xff]  ;;  %v1768_v4 = vpack.c.bf16 %v70_v2, %v69_v1  ;;  %v54_v5 = vld [vmem:[%s3360_s3 + $0x8] sm:$0xff]  ;;  %v72_v14 = vld [vmem:[%s3360_s3 + $0x98] sm:$0xff]  ;;  %v322_v45 = vunpack.c.l.s4 %v2165_v44 }
   0x5   :  { %v101_v6 = vld [vmem:[%s3360_s3 + $0x180] sm:$0xff]  ;;  %v102_v7 = vld [vmem:[%s3360_s3 + $0x188] sm:$0xff]  ;;  %v1770_v8 = vpack.c.bf16 %v54_v5, %v53_v3  ;;  %v55_v15 = vld [vmem:[%s3360_s3 + $0x10] sm:$0xff]  ;;  %v1772_v17 = vpack.c.bf16 %v72_v14, %v71_v12  ;;  %v325_v61 = vshrl.u32 %v324_v46, 7 }
   0x6   :  { %v1800_v9 = vpack.c.bf16 %v102_v7, %v101_v6  ;;  %v85_v10 = vld [vmem:[%s3360_s3 + $0x100] sm:$0xff]  ;;  %v86_v11 = vld [vmem:[%s3360_s3 + $0x108] sm:$0xff]  ;;  %1769 = vmatprep.subr.bf16.mxu0 %v1768_v4  ;;  %v56_v16 = vld [vmem:[%s3360_s3 + $0x18] sm:$0xff]  ;;  %v323_v60 = vunpack.c.0.s8 %v322_v45 }
   0x7   :  { %v1802_v13 = vpack.c.bf16 %v86_v11, %v85_v10  ;;  %1771 = vmatpush3.bf16.msra.mxu0 %v1770_v8  ;;  %v1774_v18 = vpack.c.bf16 %v56_v16, %v55_v15  ;;  %v103_v19 = vld [vmem:[%s3360_s3 + $0x190] sm:$0xff]  ;;  %v104_v20 = vld [vmem:[%s3360_s3 + $0x198] sm:$0xff]  ;;  %v73_v24 = vld [vmem:[%s3360_s3 + $0xa0] sm:$0xff] }
   0x8   :  { %1801 = vmatprep.subr.bf16.mxu1 %v1800_v9  ;;  %v87_v21 = vld [vmem:[%s3360_s3 + $0x110] sm:$0xff]  ;;  %v1804_v22 = vpack.c.bf16 %v104_v20, %v103_v19  ;;  %v88_v23 = vld [vmem:[%s3360_s3 + $0x118] sm:$0xff]  ;;  %v74_v25 = vld [vmem:[%s3360_s3 + $0xa8] sm:$0xff]  ;;  %1773 = vmatprep.subr.bf16.mxu0 %v1772_v17  ;;  %v2392_v11 = vsub.s32 %v323_v60, %v325_v61 }
   0x9   :  { %1803 = vmatpush3.bf16.msra.mxu1 %v1802_v13  ;;  %v1806_v26 = vpack.c.bf16 %v88_v23, %v87_v21  ;;  %v1776_v27 = vpack.c.bf16 %v74_v25, %v73_v24  ;;  %v57_v28 = vld [vmem:[%s3360_s3 + $0x20] sm:$0xff]  ;;  %v58_v29 = vld [vmem:[%s3360_s3 + $0x28] sm:$0xff]  ;;  %v75_v36 = vld [vmem:[%s3360_s3 + $0xb0] sm:$0xff] }
   0xa   :  { %v105_v30 = vld [vmem:[%s3360_s3 + $0x1a0] sm:$0xff]  ;;  %1805 = vmatprep.subr.bf16.mxu1 %v1804_v22  ;;  %v106_v31 = vld [vmem:[%s3360_s3 + $0x1a8] sm:$0xff]  ;;  %v1778_v34 = vpack.c.bf16 %v58_v29, %v57_v28  ;;  %v76_v37 = vld [vmem:[%s3360_s3 + $0xb8] sm:$0xff] }
   0xb   :  { %v89_v32 = vld [vmem:[%s3360_s3 + $0x120] sm:$0xff]  ;;  %v90_v33 = vld [vmem:[%s3360_s3 + $0x128] sm:$0xff]  ;;  %1775 = vmatpush3.bf16.msra.mxu0 %v1774_v18  ;;  %v1808_v35 = vpack.c.bf16 %v106_v31, %v105_v30  ;;  %v59_v38 = vld [vmem:[%s3360_s3 + $0x30] sm:$0xff]  ;;  %v1780_v40 = vpack.c.bf16 %v76_v37, %v75_v36 }
   0xc   :  { %1777 = vmatprep.subr.bf16.mxu0 %v1776_v27  ;;  %v1810_v39 = vpack.c.bf16 %v90_v33, %v89_v32  ;;  %v60_v41 = vld [vmem:[%s3360_s3 + $0x38] sm:$0xff]  ;;  %v107_v42 = vld [vmem:[%s3360_s3 + $0x1b0] sm:$0xff]  ;;  %v77_v50 = vld [vmem:[%s3360_s3 + $0xc0] sm:$0xff] }
   0xd   :  { %1807 = vmatpush3.bf16.msra.mxu1 %v1806_v26  ;;  %v108_v43 = vld [vmem:[%s3360_s3 + $0x1b8] sm:$0xff]  ;;  %v91_v48 = vld [vmem:[%s3360_s3 + $0x130] sm:$0xff]  ;;  %v78_v51 = vld [vmem:[%s3360_s3 + $0xc8] sm:$0xff]  ;;  %v1782_v52 = vpack.c.bf16 %v60_v41, %v59_v38 }
   0xe   :  { %1809 = vmatprep.subr.bf16.mxu1 %v1808_v35  ;;  %v1812_v47 = vpack.c.bf16 %v108_v43, %v107_v42  ;;  %v92_v49 = vld [vmem:[%s3360_s3 + $0x138] sm:$0xff]  ;;  %v109_v53 = vld [vmem:[%s3360_s3 + $0x1c0] sm:$0xff]  ;;  %v110_v54 = vld [vmem:[%s3360_s3 + $0x1c8] sm:$0xff]  ;;  %v1784_v56 = vpack.c.bf16 %v78_v51, %v77_v50 }
   0xf   :  { %1779 = vmatpush3.bf16.msra.mxu0 %v1778_v34  ;;  %v1814_v55 = vpack.c.bf16 %v92_v49, %v91_v48  ;;  %v61_v57 = vld [vmem:[%s3360_s3 + $0x40] sm:$0xff]  ;;  %v62_v58 = vld [vmem:[%s3360_s3 + $0x48] sm:$0xff]  ;;  %v1816_v62 = vpack.c.bf16 %v110_v54, %v109_v53  ;;  %v79_v0 = vld [vmem:[%s3360_s3 + $0xd0] sm:$0xff] }
  0x10   :  { %1781 = vmatprep.subr.bf16.mxu0 %v1780_v40  ;;  %v93_v59 = vld [vmem:[%s3360_s3 + $0x140] sm:$0xff]  ;;  %v94_v63 = vld [vmem:[%s3360_s3 + $0x148] sm:$0xff]  ;;  %v80_v1 = vld [vmem:[%s3360_s3 + $0xd8] sm:$0xff]  ;;  %v1786_v4 = vpack.c.bf16 %v62_v58, %v61_v57 }
  0x11   :  { %1811 = vmatpush3.bf16.msra.mxu1 %v1810_v39  ;;  %v111_v2 = vld [vmem:[%s3360_s3 + $0x1d0] sm:$0xff]  ;;  %v112_v3 = vld [vmem:[%s3360_s3 + $0x1d8] sm:$0xff]  ;;  %v1818_v6 = vpack.c.bf16 %v94_v63, %v93_v59  ;;  %v1788_v7 = vpack.c.bf16 %v80_v1, %v79_v0  ;;  %v81_v13 = vld [vmem:[%s3360_s3 + $0xe0] sm:$0xff] }
  0x12   :  { %1813 = vmatprep.subr.bf16.mxu1 %v1812_v47  ;;  %v63_v5 = vld [vmem:[%s3360_s3 + $0x50] sm:$0xff]  ;;  %v64_v8 = vld [vmem:[%s3360_s3 + $0x58] sm:$0xff]  ;;  %v1820_v12 = vpack.c.bf16 %v112_v3, %v111_v2  ;;  %v82_v14 = vld [vmem:[%s3360_s3 + $0xe8] sm:$0xff] }
  0x13   :  { %1783 = vmatpush3.bf16.msra.mxu0 %v1782_v52  ;;  %v95_v9 = vld [vmem:[%s3360_s3 + $0x150] sm:$0xff]  ;;  %v96_v10 = vld [vmem:[%s3360_s3 + $0x158] sm:$0xff]  ;;  %v113_v15 = vld [vmem:[%s3360_s3 + $0x1e0] sm:$0xff]  ;;  %v1790_v17 = vpack.c.bf16 %v64_v8, %v63_v5  ;;  %v1792_v20 = vpack.c.bf16 %v82_v14, %v81_v13 }
  0x14   :  { %1785 = vmatprep.subr.bf16.mxu0 %v1784_v56  ;;  %v114_v16 = vld [vmem:[%s3360_s3 + $0x1e8] sm:$0xff]  ;;  %v1822_v18 = vpack.c.bf16 %v96_v10, %v95_v9  ;;  %v49_v19 = vld [vmem:[%s3357_s0] sm:$0xff]  ;;  %v83_v28 = vld [vmem:[%s3360_s3 + $0xf0] sm:$0xff] }
  0x15   :  { %1815 = vmatpush3.bf16.msra.mxu1 %v1814_v55  ;;  %v65_v21 = vld [vmem:[%s3360_s3 + $0x60] sm:$0xff]  ;;  %v66_v22 = vld [vmem:[%s3360_s3 + $0x68] sm:$0xff]  ;;  %v327_v24 = vrot.slane %v49_v19, %v2392_v11  ;;  %v320_v25 = vcombine.high %v49_v19, %v49_v19  ;;  %v1824_v26 = vpack.c.bf16 %v114_v16, %v113_v15  ;;  %v84_v29 = vld [vmem:[%s3360_s3 + $0xf8] sm:$0xff] }
  0x16   :  { %1817 = vmatprep.subr.bf16.mxu1 %v1816_v62  ;;  %v97_v23 = vld [vmem:[%s3360_s3 + $0x160] sm:$0xff]  ;;  %v98_v27 = vld [vmem:[%s3360_s3 + $0x168] sm:$0xff]  ;;  %v115_v30 = vld [vmem:[%s3360_s3 + $0x1f0] sm:$0xff]  ;;  %v1794_v34 = vpack.c.bf16 %v66_v22, %v65_v21  ;;  %v1796_v36 = vpack.c.bf16 %v84_v29, %v83_v28 }
  0x17   :  { %1787 = vmatpush3.bf16.msra.mxu0 %v1786_v4  ;;  %v116_v31 = vld [vmem:[%s3360_s3 + $0x1f8] sm:$0xff]  ;;  %v335_v32 = vcombine.high %v327_v24, %v327_v24  ;;  %v334_v33 = vrot.slane %v320_v25, %v2392_v11  ;;  %v1826_v35 = vpack.c.bf16 %v98_v27, %v97_v23  ;;  %v67_v37 = vld [vmem:[%s3360_s3 + $0x70] sm:$0xff]  ;;  %v133_v43 = vld [vmem:[%s3360_s3 + $0x280] sm:$0xff] }
  0x18   :  { %1789 = vmatprep.subr.bf16.mxu0 %v1788_v7  ;;  %v68_v38 = vld [vmem:[%s3360_s3 + $0x78] sm:$0xff]  ;;  %v99_v39 = vld [vmem:[%s3360_s3 + $0x170] sm:$0xff]  ;;  %v1828_v41 = vpack.c.bf16 %v116_v31, %v115_v30  ;;  %v134_v44 = vld [vmem:[%s3360_s3 + $0x288] sm:$0xff] }
  0x19   :  { %1819 = vmatpush3.bf16.msra.mxu1 %v1818_v6  ;;  %v336_v40 = vcombine.high %v334_v33, %v334_v33  ;;  %468 = vmatprep.mubr.f32.mxu0 %v335_v32  ;;  %v100_v42 = vld [vmem:[%s3360_s3 + $0x178] sm:$0xff]  ;;  %v165_v45 = vld [vmem:[%s3360_s3 + $0x380] sm:$0xff]  ;;  %v166_v46 = vld [vmem:[%s3360_s3 + $0x388] sm:$0xff]  ;;  %v1798_v47 = vpack.c.bf16 %v68_v38, %v67_v37  ;;  %v1832_v49 = vpack.c.bf16 %v134_v44, %v133_v43 }
  0x1a   :  { %1821 = vmatprep.subr.bf16.mxu1 %v1820_v12  ;;  %v1830_v48 = vpack.c.bf16 %v100_v42, %v99_v39  ;;  %v117_v50 = vld [vmem:[%s3360_s3 + $0x200] sm:$0xff]  ;;  %v118_v51 = vld [vmem:[%s3360_s3 + $0x208] sm:$0xff]  ;;  %v1864_v53 = vpack.c.bf16 %v166_v46, %v165_v45  ;;  %v135_v55 = vld [vmem:[%s3360_s3 + $0x290] sm:$0xff] }
  0x1b   :  { %1791 = vmatpush3.bf16.msra.mxu0 %v1790_v17  ;;  %538 = vmatprep.mubr.f32.mxu1 %v336_v40  ;;  %v149_v52 = vld [vmem:[%s3360_s3 + $0x300] sm:$0xff]  ;;  %v150_v54 = vld [vmem:[%s3360_s3 + $0x308] sm:$0xff]  ;;  %v136_v56 = vld [vmem:[%s3360_s3 + $0x298] sm:$0xff]  ;;  %v1834_v59 = vpack.c.bf16 %v118_v51, %v117_v50 }
  0x1c   :  { %1793 = vmatprep.subr.bf16.mxu0 %v1792_v20  ;;  %v167_v57 = vld [vmem:[%s3360_s3 + $0x390] sm:$0xff]  ;;  %v168_v58 = vld [vmem:[%s3360_s3 + $0x398] sm:$0xff]  ;;  %v1866_v60 = vpack.c.bf16 %v150_v54, %v149_v52  ;;  %v1836_v61 = vpack.c.bf16 %v136_v56, %v135_v55  ;;  %v137_v3 = vld [vmem:[%s3360_s3 + $0x2a0] sm:$0xff] }
  0x1d   :  { %1823 = vmatpush3.bf16.msra.mxu1 %v1822_v18  ;;  %v119_v62 = vld [vmem:[%s3360_s3 + $0x210] sm:$0xff]  ;;  %v120_v63 = vld [vmem:[%s3360_s3 + $0x218] sm:$0xff]  ;;  %v1868_v1 = vpack.c.bf16 %v168_v58, %v167_v57  ;;  %v138_v4 = vld [vmem:[%s3360_s3 + $0x2a8] sm:$0xff] }
  0x1e   :  { %1825 = vmatprep.subr.bf16.mxu1 %v1824_v26  ;;  %v151_v0 = vld [vmem:[%s3360_s3 + $0x310] sm:$0xff]  ;;  %v152_v2 = vld [vmem:[%s3360_s3 + $0x318] sm:$0xff]  ;;  %v169_v5 = vld [vmem:[%s3360_s3 + $0x3a0] sm:$0xff]  ;;  %v1838_v7 = vpack.c.bf16 %v120_v63, %v119_v62  ;;  %v1840_v9 = vpack.c.bf16 %v138_v4, %v137_v3 }
  0x1f   :  { %1795 = vmatpush3.bf16.msra.mxu0 %v1794_v34  ;;  %v170_v6 = vld [vmem:[%s3360_s3 + $0x3a8] sm:$0xff]  ;;  %v1870_v8 = vpack.c.bf16 %v152_v2, %v151_v0  ;;  %v121_v10 = vld [vmem:[%s3360_s3 + $0x220] sm:$0xff]  ;;  %v139_v16 = vld [vmem:[%s3360_s3 + $0x2b0] sm:$0xff] }
  0x20   :  { %1797 = vmatprep.subr.bf16.mxu0 %v1796_v36  ;;  %v122_v12 = vld [vmem:[%s3360_s3 + $0x228] sm:$0xff]  ;;  %v153_v13 = vld [vmem:[%s3360_s3 + $0x320] sm:$0xff]  ;;  %v1872_v14 = vpack.c.bf16 %v170_v6, %v169_v5  ;;  %v140_v17 = vld [vmem:[%s3360_s3 + $0x2b8] sm:$0xff] }
  0x21   :  { %1827 = vmatpush3.bf16.msra.mxu1 %v1826_v35  ;;  %v154_v15 = vld [vmem:[%s3360_s3 + $0x328] sm:$0xff]  ;;  %v171_v18 = vld [vmem:[%s3360_s3 + $0x3b0] sm:$0xff]  ;;  %v172_v19 = vld [vmem:[%s3360_s3 + $0x3b8] sm:$0xff]  ;;  %v1842_v20 = vpack.c.bf16 %v122_v12, %v121_v10  ;;  %v1844_v23 = vpack.c.bf16 %v140_v17, %v139_v16 }
  0x22   :  { %1829 = vmatprep.subr.bf16.mxu1 %v1828_v41  ;;  %v123_v21 = vld [vmem:[%s3360_s3 + $0x230] sm:$0xff]  ;;  %v1874_v22 = vpack.c.bf16 %v154_v15, %v153_v13  ;;  %v156_v26 = vld [vmem:[%s3360_s3 + $0x338] sm:$0xff]  ;;  %v1876_v27 = vpack.c.bf16 %v172_v19, %v171_v18  ;;  %v141_v28 = vld [vmem:[%s3360_s3 + $0x2c0] sm:$0xff] }
  0x23   :  { %1799 = vmatpush3.bf16.msra.mxu0 %v1798_v47  ;;  %v155_v25 = vld [vmem:[%s3360_s3 + $0x330] sm:$0xff]  ;;  %v142_v29 = vld [vmem:[%s3360_s3 + $0x2c8] sm:$0xff]  ;;  %v173_v31 = vld [vmem:[%s3360_s3 + $0x3c0] sm:$0xff] }
  0x24   :  { %1833 = vmatprep.subr.bf16.mxu0 %v1832_v49  ;;  %v50_v30 = vld [vmem:[%s3357_s0 + $0x8] sm:$0xff]  ;;  %v1878_v36 = vpack.c.bf16 %v156_v26, %v155_v25  ;;  %v1848_v37 = vpack.c.bf16 %v142_v29, %v141_v28  ;;  %v125_v38 = vld [vmem:[%s3360_s3 + $0x240] sm:$0xff]  ;;  %v143_v45 = vld [vmem:[%s3360_s3 + $0x2d0] sm:$0xff] }
  0x25   :  { %1831 = vmatpush3.bf16.msra.mxu1 %v1830_v48  ;;  %v174_v32 = vld [vmem:[%s3360_s3 + $0x3c8] sm:$0xff]  ;;  %v337_v34 = vcombine.high %v50_v30, %v50_v30  ;;  %v157_v40 = vld [vmem:[%s3360_s3 + $0x340] sm:$0xff]  ;;  %v144_v46 = vld [vmem:[%s3360_s3 + $0x2d8] sm:$0xff] }
  0x26   :  { %1865 = vmatprep.subr.bf16.mxu1 %v1864_v53  ;;  %469 = vmatmul.mubr.f32.vlgmr.msra.gmra.mrb[0].mxu0 %v327_v24  ;;  %v124_v24 = vld [vmem:[%s3360_s3 + $0x238] sm:$0xff]  ;;  %v126_v39 = vld [vmem:[%s3360_s3 + $0x248] sm:$0xff]  ;;  %v1880_v43 = vpack.c.bf16 %v174_v32, %v173_v31  ;;  %v175_v47 = vld [vmem:[%s3360_s3 + $0x3d0] sm:$0xff]  ;;  %v1852_v52 = vpack.c.bf16 %v144_v46, %v143_v45 }
  0x27   :  { %1835 = vmatpush3.bf16.msra.mxu0 %v1834_v59  ;;  %v1846_v35 = vpack.c.bf16 %v124_v24, %v123_v21  ;;  %v2573_v42 = vrot.slane %v337_v34, %v2392_v11  ;;  %v158_v44 = vld [vmem:[%s3360_s3 + $0x348] sm:$0xff]  ;;  %v176_v48 = vld [vmem:[%s3360_s3 + $0x3d8] sm:$0xff]  ;;  %v1850_v50 = vpack.c.bf16 %v126_v39, %v125_v38  ;;  %v127_v53 = vld [vmem:[%s3360_s3 + $0x250] sm:$0xff] }
  0x28   :  { %539 = vmatmul.mubr.f32.vlgmr.msra.gmra.mrb[0].mxu1 %v334_v33  ;;  %1837 = vmatprep.subr.bf16.mxu0 %v1836_v61  ;;  %v2559_v33 = vrot.slane %v50_v30, %v2392_v11  ;;  %v1882_v51 = vpack.c.bf16 %v158_v44, %v157_v40  ;;  %v128_v54 = vld [vmem:[%s3360_s3 + $0x258] sm:$0xff]  ;;  %v159_v55 = vld [vmem:[%s3360_s3 + $0x350] sm:$0xff]  ;;  %v1884_v56 = vpack.c.bf16 %v176_v48, %v175_v47  ;;  %v145_v58 = vld [vmem:[%s3360_s3 + $0x2e0] sm:$0xff] }
  0x29   :  { %1867 = vmatpush3.bf16.msra.mxu1 %v1866_v60  ;;  %v353_v49 = vcombine.high %v2573_v42, %v2573_v42  ;;  %v160_v57 = vld [vmem:[%s3360_s3 + $0x358] sm:$0xff]  ;;  %v146_v59 = vld [vmem:[%s3360_s3 + $0x2e8] sm:$0xff]  ;;  %v177_v60 = vld [vmem:[%s3360_s3 + $0x3e0] sm:$0xff]  ;;  %v1854_v62 = vpack.c.bf16 %v128_v54, %v127_v53 }
  0x2a   :  { %1869 = vmatprep.subr.bf16.mxu1 %v1868_v1  ;;  %v352_v41 = vcombine.high %v2559_v33, %v2559_v33  ;;  %v178_v61 = vld [vmem:[%s3360_s3 + $0x3e8] sm:$0xff]  ;;  %v1886_v63 = vpack.c.bf16 %v160_v57, %v159_v55  ;;  %v1856_v0 = vpack.c.bf16 %v146_v59, %v145_v58  ;;  %v129_v1 = vld [vmem:[%s3360_s3 + $0x260] sm:$0xff]  ;;  %v147_v6 = vld [vmem:[%s3360_s3 + $0x2f0] sm:$0xff] }
  0x2b   :  { %1839 = vmatpush3.bf16.msra.mxu0 %v1838_v7  ;;  %678 = vmatprep.mubr.f32.mxu1 %v353_v49  ;;  %v130_v2 = vld [vmem:[%s3360_s3 + $0x268] sm:$0xff]  ;;  %v161_v3 = vld [vmem:[%s3360_s3 + $0x360] sm:$0xff]  ;;  %v1888_v4 = vpack.c.bf16 %v178_v61, %v177_v60  ;;  %v148_v7 = vld [vmem:[%s3360_s3 + $0x2f8] sm:$0xff] }
  0x2c   :  { %1841 = vmatprep.subr.bf16.mxu0 %v1840_v9  ;;  %608 = vmatprep.mubr.f32.mxu0 %v352_v41  ;;  %v162_v5 = vld [vmem:[%s3360_s3 + $0x368] sm:$0xff]  ;;  %v180_v9 = vld [vmem:[%s3360_s3 + $0x3f8] sm:$0xff]  ;;  %v1858_v10 = vpack.c.bf16 %v130_v2, %v129_v1  ;;  %v1860_v13 = vpack.c.bf16 %v148_v7, %v147_v6  ;;  %v163_v16 = vld [vmem:[%s3360_s3 + $0x370] sm:$0xff] }
  0x2d   :  { %1871 = vmatpush3.bf16.msra.mxu1 %v1870_v8  ;;  %v179_v8 = vld [vmem:[%s3360_s3 + $0x3f0] sm:$0xff]  ;;  %v1890_v12 = vpack.c.bf16 %v162_v5, %v161_v3  ;;  %v132_v15 = vld [vmem:[%s3360_s3 + $0x278] sm:$0xff]  ;;  %v197_v19 = vld [vmem:[%s3360_s3 + $0x480] sm:$0xff] }
  0x2e   :  { %1873 = vmatprep.subr.bf16.mxu1 %v1872_v14  ;;  %v131_v14 = vld [vmem:[%s3360_s3 + $0x270] sm:$0xff]  ;;  %v1892_v17 = vpack.c.bf16 %v180_v9, %v179_v8  ;;  %v164_v18 = vld [vmem:[%s3360_s3 + $0x378] sm:$0xff]  ;;  %v229_v21 = vld [vmem:[%s3360_s3 + $0x580] sm:$0xff] }
  0x2f   :  { %1843 = vmatpush3.bf16.msra.mxu0 %v1842_v20  ;;  %v198_v20 = vld [vmem:[%s3360_s3 + $0x488] sm:$0xff]  ;;  %v181_v24 = vld [vmem:[%s3360_s3 + $0x400] sm:$0xff]  ;;  %v1894_v25 = vpack.c.bf16 %v164_v18, %v163_v16  ;;  %v199_v31 = vld [vmem:[%s3360_s3 + $0x490] sm:$0xff] }
  0x30   :  { %1845 = vmatprep.subr.bf16.mxu0 %v1844_v23  ;;  %v1862_v23 = vpack.c.bf16 %v132_v15, %v131_v14  ;;  %v1896_v26 = vpack.c.bf16 %v198_v20, %v197_v19  ;;  %v213_v28 = vld [vmem:[%s3360_s3 + $0x500] sm:$0xff]  ;;  %v214_v29 = vld [vmem:[%s3360_s3 + $0x508] sm:$0xff]  ;;  %v200_v32 = vld [vmem:[%s3360_s3 + $0x498] sm:$0xff] }
  0x31   :  { %1875 = vmatpush3.bf16.msra.mxu1 %v1874_v22  ;;  %v230_v22 = vld [vmem:[%s3360_s3 + $0x588] sm:$0xff]  ;;  %v231_v34 = vld [vmem:[%s3360_s3 + $0x590] sm:$0xff]  ;;  %v1900_v39 = vpack.c.bf16 %v200_v32, %v199_v31  ;;  %v184_v41 = vld [vmem:[%s3360_s3 + $0x418] sm:$0xff] }
  0x32   :  { %1877 = vmatprep.subr.bf16.mxu1 %v1876_v27  ;;  %v182_v27 = vld [vmem:[%s3360_s3 + $0x408] sm:$0xff]  ;;  %v1928_v30 = vpack.c.bf16 %v230_v22, %v229_v21  ;;  %v51_v38 = vld [vmem:[%s3357_s0 + $0x10] sm:$0xff]  ;;  %v216_v47 = vld [vmem:[%s3360_s3 + $0x518] sm:$0xff] }
  0x33   :  { %1847 = vmatpush3.bf16.msra.mxu0 %v1846_v35  ;;  %v232_v35 = vld [vmem:[%s3360_s3 + $0x598] sm:$0xff]  ;;  %v183_v40 = vld [vmem:[%s3360_s3 + $0x410] sm:$0xff]  ;;  %v2701_v44 = vrot.slane %v51_v38, %v2392_v11  ;;  %v354_v45 = vcombine.high %v51_v38, %v51_v38  ;;  %v201_v48 = vld [vmem:[%s3360_s3 + $0x4a0] sm:$0xff] }
  0x34   :  { %1849 = vmatprep.subr.bf16.mxu0 %v1848_v37  ;;  %v1930_v37 = vpack.c.bf16 %v214_v29, %v213_v28  ;;  %v1932_v46 = vpack.c.bf16 %v232_v35, %v231_v34  ;;  %v202_v49 = vld [vmem:[%s3360_s3 + $0x4a8] sm:$0xff]  ;;  %v1902_v54 = vpack.c.bf16 %v184_v41, %v183_v40  ;;  %v217_v58 = vld [vmem:[%s3360_s3 + $0x520] sm:$0xff]  ;;  %v203_v61 = vld [vmem:[%s3360_s3 + $0x4b0] sm:$0xff] }
  0x35   :  { %1879 = vmatpush3.bf16.msra.mxu1 %v1878_v36  ;;  %v1898_v36 = vpack.c.bf16 %v182_v27, %v181_v24  ;;  %v2722_v53 = vrot.slane %v354_v45, %v2392_v11  ;;  %v1904_v55 = vpack.c.bf16 %v202_v49, %v201_v48  ;;  %v186_v57 = vld [vmem:[%s3360_s3 + $0x428] sm:$0xff]  ;;  %v188_v5 = vld [vmem:[%s3360_s3 + $0x438] sm:$0xff]  ;;  %v219_v6 = vld [vmem:[%s3360_s3 + $0x530] sm:$0xff] }
  0x36   :  { %1881 = vmatprep.subr.bf16.mxu1 %v1880_v43  ;;  %v215_v43 = vld [vmem:[%s3360_s3 + $0x510] sm:$0xff]  ;;  %v218_v60 = vld [vmem:[%s3360_s3 + $0x528] sm:$0xff]  ;;  %v220_v8 = vld [vmem:[%s3360_s3 + $0x538] sm:$0xff] }
  0x37   :  { %1851 = vmatpush3.bf16.msra.mxu0 %v1850_v50  ;;  %v233_v50 = vld [vmem:[%s3360_s3 + $0x5a0] sm:$0xff]  ;;  %v1938_v2 = vpack.c.bf16 %v218_v60, %v217_v58  ;;  %v1942_v15 = vpack.c.bf16 %v220_v8, %v219_v6  ;;  %v190_v18 = vld [vmem:[%s3360_s3 + $0x448] sm:$0xff]  ;;  %v207_v22 = vld [vmem:[%s3360_s3 + $0x4d0] sm:$0xff] }
  0x38   :  { %1853 = vmatprep.subr.bf16.mxu0 %v1852_v52  ;;  %v369_v52 = vcombine.high %v2701_v44, %v2701_v44  ;;  %v205_v9 = vld [vmem:[%s3360_s3 + $0x4c0] sm:$0xff]  ;;  %v222_v21 = vld [vmem:[%s3360_s3 + $0x548] sm:$0xff]  ;;  %v239_v24 = vld [vmem:[%s3360_s3 + $0x5d0] sm:$0xff] }
  0x39   :  { %1883 = vmatpush3.bf16.msra.mxu1 %v1882_v51  ;;  %v234_v51 = vld [vmem:[%s3360_s3 + $0x5a8] sm:$0xff]  ;;  %v221_v19 = vld [vmem:[%s3360_s3 + $0x540] sm:$0xff]  ;;  %v191_v29 = vld [vmem:[%s3360_s3 + $0x450] sm:$0xff] }
  0x3a   :  { %1885 = vmatprep.subr.bf16.mxu1 %v1884_v56  ;;  %v185_v56 = vld [vmem:[%s3360_s3 + $0x420] sm:$0xff]  ;;  %v1936_v59 = vpack.c.bf16 %v234_v51, %v233_v50  ;;  %v1946_v27 = vpack.c.bf16 %v222_v21, %v221_v19  ;;  %v223_v31 = vld [vmem:[%s3360_s3 + $0x550] sm:$0xff]  ;;  %v224_v34 = vld [vmem:[%s3360_s3 + $0x558] sm:$0xff] }
  0x3b   :  { %1855 = vmatpush3.bf16.msra.mxu0 %v1854_v62  ;;  %v204_v62 = vld [vmem:[%s3360_s3 + $0x4b8] sm:$0xff]  ;;  %v1906_v1 = vpack.c.bf16 %v186_v57, %v185_v56  ;;  %v209_v35 = vld [vmem:[%s3360_s3 + $0x4e0] sm:$0xff]  ;;  %v242_v38 = vld [vmem:[%s3360_s3 + $0x5e8] sm:$0xff]  ;;  %v1950_v40 = vpack.c.bf16 %v224_v34, %v223_v31 }
  0x3c   :  { %1857 = vmatprep.subr.bf16.mxu0 %v1856_v0  ;;  %v236_v0 = vld [vmem:[%s3360_s3 + $0x5b8] sm:$0xff]  ;;  %v1908_v3 = vpack.c.bf16 %v204_v62, %v203_v61  ;;  %v194_v45 = vld [vmem:[%s3360_s3 + $0x468] sm:$0xff]  ;;  %v211_v49 = vld [vmem:[%s3360_s3 + $0x4f0] sm:$0xff] }
  0x3d   :  { %1887 = vmatpush3.bf16.msra.mxu1 %v1886_v63  ;;  %v235_v63 = vld [vmem:[%s3360_s3 + $0x5b0] sm:$0xff]  ;;  %v226_v48 = vld [vmem:[%s3360_s3 + $0x568] sm:$0xff]  ;;  %v212_v50 = vld [vmem:[%s3360_s3 + $0x4f8] sm:$0xff] }
  0x3e   :  { %1889 = vmatprep.subr.bf16.mxu1 %v1888_v4  ;;  %v187_v4 = vld [vmem:[%s3360_s3 + $0x430] sm:$0xff]  ;;  %v1940_v7 = vpack.c.bf16 %v236_v0, %v235_v63  ;;  %v1924_v56 = vpack.c.bf16 %v212_v50, %v211_v49  ;;  %v196_v58 = vld [vmem:[%s3360_s3 + $0x478] sm:$0xff]  ;;  %v261_v61 = vld [vmem:[%s3360_s3 + $0x680] sm:$0xff] }
  0x3f   :  { %1859 = vmatpush3.bf16.msra.mxu0 %v1858_v10  ;;  %v206_v10 = vld [vmem:[%s3360_s3 + $0x4c8] sm:$0xff]  ;;  %v1910_v14 = vpack.c.bf16 %v188_v5, %v187_v4  ;;  %v243_v51 = vld [vmem:[%s3360_s3 + $0x5f0] sm:$0xff]  ;;  %v228_v60 = vld [vmem:[%s3360_s3 + $0x578] sm:$0xff] }
  0x40   :  { %1861 = vmatprep.subr.bf16.mxu0 %v1860_v13  ;;  %v238_v13 = vld [vmem:[%s3360_s3 + $0x5c8] sm:$0xff]  ;;  %v1912_v16 = vpack.c.bf16 %v206_v10, %v205_v9  ;;  %v195_v57 = vld [vmem:[%s3360_s3 + $0x470] sm:$0xff]  ;;  %v293_v63 = vld [vmem:[%s3360_s3 + $0x780] sm:$0xff] }
  0x41   :  { %1891 = vmatpush3.bf16.msra.mxu1 %v1890_v12  ;;  %v237_v12 = vld [vmem:[%s3360_s3 + $0x5c0] sm:$0xff]  ;;  %v262_v62 = vld [vmem:[%s3360_s3 + $0x688] sm:$0xff]  ;;  %v263_v10 = vld [vmem:[%s3360_s3 + $0x690] sm:$0xff] }
  0x42   :  { %1893 = vmatprep.subr.bf16.mxu1 %v1892_v17  ;;  %v189_v17 = vld [vmem:[%s3360_s3 + $0x440] sm:$0xff]  ;;  %v1944_v20 = vpack.c.bf16 %v238_v13, %v237_v12  ;;  %v294_v0 = vld [vmem:[%s3360_s3 + $0x788] sm:$0xff]  ;;  %v1960_v4 = vpack.c.bf16 %v262_v62, %v261_v61  ;;  %v264_v12 = vld [vmem:[%s3360_s3 + $0x698] sm:$0xff] }
  0x43   :  { %1863 = vmatpush3.bf16.msra.mxu0 %v1862_v23  ;;  %v208_v23 = vld [vmem:[%s3360_s3 + $0x4d8] sm:$0xff]  ;;  %v245_v5 = vld [vmem:[%s3360_s3 + $0x600] sm:$0xff]  ;;  %v246_v6 = vld [vmem:[%s3360_s3 + $0x608] sm:$0xff]  ;;  %v1992_v8 = vpack.c.bf16 %v294_v0, %v293_v63 }
  0x44   :  { %1897 = vmatprep.subr.bf16.mxu0 %v1896_v26  ;;  %v1914_v26 = vpack.c.bf16 %v190_v18, %v189_v17  ;;  %v1916_v28 = vpack.c.bf16 %v208_v23, %v207_v22  ;;  %v278_v9 = vld [vmem:[%s3360_s3 + $0x708] sm:$0xff] }
  0x45   :  { %1895 = vmatpush3.bf16.msra.mxu1 %v1894_v25  ;;  %v240_v25 = vld [vmem:[%s3360_s3 + $0x5d8] sm:$0xff] }
  0x46   :  { %1929 = vmatprep.subr.bf16.mxu1 %v1928_v30  ;;  %609 = vmatmul.mubr.f32.vlgmr.msra.gmra.mrb[2].mxu0 %v2559_v33  ;;  %v1934_v33 = vpack.c.bf16 %v216_v47, %v215_v43  ;;  %v192_v30 = vld [vmem:[%s3360_s3 + $0x458] sm:$0xff]  ;;  %v1948_v32 = vpack.c.bf16 %v240_v25, %v239_v24  ;;  %v193_v43 = vld [vmem:[%s3360_s3 + $0x460] sm:$0xff] }
  0x47   :  { %1899 = vmatpush3.bf16.msra.mxu0 %v1898_v36  ;;  %748 = vmatprep.mubr.f32.mxu0 %v369_v52  ;;  %v210_v36 = vld [vmem:[%s3360_s3 + $0x4e8] sm:$0xff]  ;;  %v244_v52 = vld [vmem:[%s3360_s3 + $0x5f8] sm:$0xff] }
  0x48   :  { %679 = vmatmul.mubr.f32.vlgmr.msra.gmra.mrb[2].mxu1 %v2573_v42  ;;  %1901 = vmatprep.subr.bf16.mxu0 %v1900_v39  ;;  %v370_v42 = vcombine.high %v2722_v53, %v2722_v53  ;;  %v1918_v39 = vpack.c.bf16 %v192_v30, %v191_v29  ;;  %v1920_v41 = vpack.c.bf16 %v210_v36, %v209_v35 }
  0x49   :  { %1931 = vmatpush3.bf16.msra.mxu1 %v1930_v37  ;;  %v241_v37 = vld [vmem:[%s3360_s3 + $0x5e0] sm:$0xff] }
  0x4a   :  { %1933 = vmatprep.subr.bf16.mxu1 %v1932_v46  ;;  %818 = vmatprep.mubr.f32.mxu1 %v370_v42  ;;  %v225_v46 = vld [vmem:[%s3360_s3 + $0x560] sm:$0xff]  ;;  %v1952_v47 = vpack.c.bf16 %v242_v38, %v241_v37  ;;  %v227_v42 = vld [vmem:[%s3360_s3 + $0x570] sm:$0xff] }
  0x4b   :  { %1903 = vmatpush3.bf16.msra.mxu0 %v1902_v54  ;;  %v1922_v54 = vpack.c.bf16 %v194_v45, %v193_v43 }
  0x4c   :  { %1905 = vmatprep.subr.bf16.mxu0 %v1904_v55  ;;  %v1954_v55 = vpack.c.bf16 %v226_v48, %v225_v46 }
  0x4d   :  { %1935 = vmatpush3.bf16.msra.mxu1 %v1934_v33  ;;  %v52_v33 = vld [vmem:[%s3357_s0 + $0x18] sm:$0xff] }
  0x4e   :  { %1937 = vmatprep.subr.bf16.mxu1 %v1936_v59  ;;  %v1956_v59 = vpack.c.bf16 %v244_v52, %v243_v51  ;;  %v2893_v13 = vrot.slane %v52_v33, %v2392_v11 }
  0x4f   :  { %1907 = vmatpush3.bf16.msra.mxu0 %v1906_v1  ;;  %v371_v1 = vcombine.high %v52_v33, %v52_v33 }
  0x50   :  { %1909 = vmatprep.subr.bf16.mxu0 %v1908_v3  ;;  %v1958_v3 = vpack.c.bf16 %v228_v60, %v227_v42 }
  0x51   :  { %1939 = vmatpush3.bf16.msra.mxu1 %v1938_v2  ;;  %v1926_v2 = vpack.c.bf16 %v196_v58, %v195_v57 }
  0x52   :  { %1941 = vmatprep.subr.bf16.mxu1 %v1940_v7  ;;  %v277_v7 = vld [vmem:[%s3360_s3 + $0x700] sm:$0xff] }
  0x53   :  { %1911 = vmatpush3.bf16.msra.mxu0 %v1910_v14  ;;  %v295_v14 = vld [vmem:[%s3360_s3 + $0x790] sm:$0xff] }
  0x54   :  { %1913 = vmatprep.subr.bf16.mxu0 %v1912_v16  ;;  %v2902_v16 = vrot.slane %v371_v1, %v2392_v11 }
  0x55   :  { %1943 = vmatpush3.bf16.msra.mxu1 %v1942_v15  ;;  %v296_v15 = vld [vmem:[%s3360_s3 + $0x798] sm:$0xff] }
  0x56   :  { %1945 = vmatprep.subr.bf16.mxu1 %v1944_v20 }
  0x57   :  { %1915 = vmatpush3.bf16.msra.mxu0 %v1914_v26 }
  0x58   :  { %1917 = vmatprep.subr.bf16.mxu0 %v1916_v28 }
  0x59   :  { %1947 = vmatpush3.bf16.msra.mxu1 %v1946_v27 }
  0x5a   :  { %1949 = vmatprep.subr.bf16.mxu1 %v1948_v32 }
  0x5b   :  { %1919 = vmatpush3.bf16.msra.mxu0 %v1918_v39 }
  0x5c   :  { %1921 = vmatprep.subr.bf16.mxu0 %v1920_v41 }
  0x5d   :  { %1951 = vmatpush3.bf16.msra.mxu1 %v1950_v40 }
  0x5e   :  { %1953 = vmatprep.subr.bf16.mxu1 %v1952_v47 }
  0x5f   :  { %1923 = vmatpush3.bf16.msra.mxu0 %v1922_v54 }
  0x60   :  { %1925 = vmatprep.subr.bf16.mxu0 %v1924_v56 }
  0x61   :  { %1955 = vmatpush3.bf16.msra.mxu1 %v1954_v55 }
  0x62   :  { %1957 = vmatprep.subr.bf16.mxu1 %v1956_v59 }
  0x63   :  { %22 = vsyncpa [#allocation4], 0  ;;  %1927 = vmatpush3.bf16.msra.mxu0 %v1926_v2  ;;  %v1962_v17 = vpack.c.bf16 %v246_v6, %v245_v5  ;;  %v1994_v18 = vpack.c.bf16 %v278_v9, %v277_v7  ;;  %v1964_v19 = vpack.c.bf16 %v264_v12, %v263_v10  ;;  %v247_v20 = vld [vmem:[%s3360_s3 + $0x610] sm:$0xff]  ;;  %v248_v21 = vld [vmem:[%s3360_s3 + $0x618] sm:$0xff]  ;;  %v1996_v22 = vpack.c.bf16 %v296_v15, %v295_v14 }
  0x64   :  { %1961 = vmatprep.subr.bf16.mxu0 %v1960_v4  ;;  %v279_v11 = vld [vmem:[%s3360_s3 + $0x710] sm:$0xff]  ;;  %v280_v23 = vld [vmem:[%s3360_s3 + $0x718] sm:$0xff]  ;;  %v265_v24 = vld [vmem:[%s3360_s3 + $0x6a0] sm:$0xff]  ;;  %v386_v26 = vcombine.high %v2893_v13, %v2893_v13  ;;  %v387_v29 = vcombine.high %v2902_v16, %v2902_v16  ;;  %v1966_v30 = vpack.c.bf16 %v248_v21, %v247_v20  ;;  %vm1006_vm0 = vcmask 523264  }
  0x65   :  { %1959 = vmatpush3.bf16.msra.mxu1 %v1958_v3  ;;  %v266_v25 = vld [vmem:[%s3360_s3 + $0x6a8] sm:$0xff]  ;;  %v297_v27 = vld [vmem:[%s3360_s3 + $0x7a0] sm:$0xff]  ;;  %v1998_v31 = vpack.c.bf16 %v280_v23, %v279_v11  ;;  %v267_v37 = vld [vmem:[%s3360_s3 + $0x6b0] sm:$0xff]  ;;  %vm2167_vm1 = vmmov 0   ;;  %vm1093_vm3 = vcmask 261120   ;;  %vm1168_vm4 = vcmask 1024  }
  0x66   :  { %1993 = vmatprep.subr.bf16.mxu1 %v1992_v8  ;;  %749 = vmatmul.mubr.f32.vlgmr.msra.gmra.mrb[4].mxu0 %v2701_v44  ;;  %v298_v28 = vld [vmem:[%s3360_s3 + $0x7a8] sm:$0xff]  ;;  %v1968_v32 = vpack.c.bf16 %v266_v25, %v265_v24  ;;  %v249_v44 = vld [vmem:[%s3360_s3 + $0x620] sm:$0xff]  ;;  %v268_v38 = vld [vmem:[%s3360_s3 + $0x6b8] sm:$0xff]  ;;  %vm1378_vm5 = vcmask 123904  }
  0x67   :  { %1963 = vmatpush3.bf16.msra.mxu0 %v1962_v17  ;;  %v250_v34 = vld [vmem:[%s3360_s3 + $0x628] sm:$0xff]  ;;  %v281_v35 = vld [vmem:[%s3360_s3 + $0x720] sm:$0xff]  ;;  %v2000_v36 = vpack.c.bf16 %v298_v28, %v297_v27  ;;  %888 = vmatprep.mubr.f32.mxu0 %v386_v26  ;;  %v299_v39 = vld [vmem:[%s3360_s3 + $0x7b0] sm:$0xff]  ;;  %v1972_v45 = vpack.c.bf16 %v268_v38, %v267_v37 }
  0x68   :  { %819 = vmatmul.mubr.f32.vlgmr.msra.gmra.mrb[4].mxu1 %v2722_v53  ;;  %1965 = vmatprep.subr.bf16.mxu0 %v1964_v19  ;;  %v282_v53 = vld [vmem:[%s3360_s3 + $0x728] sm:$0xff]  ;;  %v300_v40 = vld [vmem:[%s3360_s3 + $0x7b8] sm:$0xff]  ;;  %v1970_v41 = vpack.c.bf16 %v250_v34, %v249_v44  ;;  %v251_v46 = vld [vmem:[%s3360_s3 + $0x630] sm:$0xff] }
  0x69   :  { %1995 = vmatpush3.bf16.msra.mxu1 %v1994_v18  ;;  %958 = vmatprep.mubr.f32.mxu1 %v387_v29  ;;  %v2002_v43 = vpack.c.bf16 %v282_v53, %v281_v35  ;;  %v252_v47 = vld [vmem:[%s3360_s3 + $0x638] sm:$0xff]  ;;  %v283_v48 = vld [vmem:[%s3360_s3 + $0x730] sm:$0xff]  ;;  %v2004_v49 = vpack.c.bf16 %v300_v40, %v299_v39  ;;  %v269_v51 = vld [vmem:[%s3360_s3 + $0x6c0] sm:$0xff] }
  0x6a   :  { %1997 = vmatprep.subr.bf16.mxu1 %v1996_v22  ;;  %v284_v50 = vld [vmem:[%s3360_s3 + $0x738] sm:$0xff]  ;;  %v270_v52 = vld [vmem:[%s3360_s3 + $0x6c8] sm:$0xff]  ;;  %v301_v54 = vld [vmem:[%s3360_s3 + $0x7c0] sm:$0xff]  ;;  %v1974_v55 = vpack.c.bf16 %v252_v47, %v251_v46 }
  0x6b   :  { %1967 = vmatpush3.bf16.msra.mxu0 %v1966_v30  ;;  %v302_v33 = vld [vmem:[%s3360_s3 + $0x7c8] sm:$0xff]  ;;  %v2006_v56 = vpack.c.bf16 %v284_v50, %v283_v48  ;;  %v1976_v57 = vpack.c.bf16 %v270_v52, %v269_v51  ;;  %v253_v58 = vld [vmem:[%s3360_s3 + $0x640] sm:$0xff]  ;;  %v271_v62 = vld [vmem:[%s3360_s3 + $0x6d0] sm:$0xff] }
  0x6c   :  { %1969 = vmatprep.subr.bf16.mxu0 %v1968_v32  ;;  %v254_v42 = vld [vmem:[%s3360_s3 + $0x648] sm:$0xff]  ;;  %v285_v59 = vld [vmem:[%s3360_s3 + $0x740] sm:$0xff]  ;;  %v2008_v60 = vpack.c.bf16 %v302_v33, %v301_v54  ;;  %v272_v63 = vld [vmem:[%s3360_s3 + $0x6d8] sm:$0xff] }
  0x6d   :  { %1999 = vmatpush3.bf16.msra.mxu1 %v1998_v31  ;;  %v286_v61 = vld [vmem:[%s3360_s3 + $0x748] sm:$0xff]  ;;  %v303_v0 = vld [vmem:[%s3360_s3 + $0x7d0] sm:$0xff]  ;;  %v304_v1 = vld [vmem:[%s3360_s3 + $0x7d8] sm:$0xff]  ;;  %v1978_v2 = vpack.c.bf16 %v254_v42, %v253_v58  ;;  %v1980_v4 = vpack.c.bf16 %v272_v63, %v271_v62 }
  0x6e   :  { %2001 = vmatprep.subr.bf16.mxu1 %v2000_v36  ;;  %v2010_v3 = vpack.c.bf16 %v286_v61, %v285_v59  ;;  %v255_v5 = vld [vmem:[%s3360_s3 + $0x650] sm:$0xff]  ;;  %v256_v6 = vld [vmem:[%s3360_s3 + $0x658] sm:$0xff]  ;;  %v2012_v8 = vpack.c.bf16 %v304_v1, %v303_v0  ;;  %v273_v10 = vld [vmem:[%s3360_s3 + $0x6e0] sm:$0xff] }
  0x6f   :  { %1971 = vmatpush3.bf16.msra.mxu0 %v1970_v41  ;;  %v287_v7 = vld [vmem:[%s3360_s3 + $0x750] sm:$0xff]  ;;  %v288_v9 = vld [vmem:[%s3360_s3 + $0x758] sm:$0xff]  ;;  %v274_v12 = vld [vmem:[%s3360_s3 + $0x6e8] sm:$0xff]  ;;  %v1982_v17 = vpack.c.bf16 %v256_v6, %v255_v5  ;;  %v2166_v41 = vmov 0.0|0.0  }
  0x70   :  { %1973 = vmatprep.subr.bf16.mxu0 %v1972_v45  ;;  %v305_v14 = vld [vmem:[%s3360_s3 + $0x7e0] sm:$0xff]  ;;  %v306_v15 = vld [vmem:[%s3360_s3 + $0x7e8] sm:$0xff]  ;;  %v2014_v18 = vpack.c.bf16 %v288_v9, %v287_v7  ;;  %v1984_v19 = vpack.c.bf16 %v274_v12, %v273_v10  ;;  %v275_v24 = vld [vmem:[%s3360_s3 + $0x6f0] sm:$0xff] }
  0x71   :  { %2003 = vmatpush3.bf16.msra.mxu1 %v2002_v43  ;;  %v257_v20 = vld [vmem:[%s3360_s3 + $0x660] sm:$0xff]  ;;  %v258_v21 = vld [vmem:[%s3360_s3 + $0x668] sm:$0xff]  ;;  %v2016_v22 = vpack.c.bf16 %v306_v15, %v305_v14  ;;  %v276_v25 = vld [vmem:[%s3360_s3 + $0x6f8] sm:$0xff] }
  0x72   :  { %2005 = vmatprep.subr.bf16.mxu1 %v2004_v49  ;;  %v289_v11 = vld [vmem:[%s3360_s3 + $0x760] sm:$0xff]  ;;  %v290_v23 = vld [vmem:[%s3360_s3 + $0x768] sm:$0xff]  ;;  %v307_v26 = vld [vmem:[%s3360_s3 + $0x7f0] sm:$0xff]  ;;  %v1986_v28 = vpack.c.bf16 %v258_v21, %v257_v20  ;;  %v1988_v30 = vpack.c.bf16 %v276_v25, %v275_v24 }
  0x73   :  { %1975 = vmatpush3.bf16.msra.mxu0 %v1974_v55  ;;  %v308_v27 = vld [vmem:[%s3360_s3 + $0x7f8] sm:$0xff]  ;;  %v2018_v29 = vpack.c.bf16 %v290_v23, %v289_v11  ;;  %v259_v31 = vld [vmem:[%s3360_s3 + $0x670] sm:$0xff]  ;;  %v965_v37 = vld [vmem:[%s3362_s5] sm:$0xff] }
  0x74   :  { %1977 = vmatprep.subr.bf16.mxu0 %v1976_v57  ;;  %v260_v32 = vld [vmem:[%s3360_s3 + $0x678] sm:$0xff]  ;;  %v2020_v44 = vpack.c.bf16 %v308_v27, %v307_v26  ;;  %v291_v34 = vld [vmem:[%s3360_s3 + $0x770] sm:$0xff]  ;;  %v966_v38 = vld [vmem:[%s3362_s5 + $0x8] sm:$0xff] }
  0x75   :  { %2007 = vmatpush3.bf16.msra.mxu1 %v2006_v56  ;;  %v292_v35 = vld [vmem:[%s3360_s3 + $0x778] sm:$0xff]  ;;  %v1990_v36 = vpack.c.bf16 %v260_v32, %v259_v31  ;;  %v3075_v39 = vld.sshfl [vmem:[%s3358_s1] sm:$0x33 pattern:$0x76325410]  ;;  %v2025_v40 = vpack.c.bf16 %v966_v38, %v965_v37  ;;  %v967_v43 = vld [vmem:[%s3362_s5 + $0x10] sm:$0xff] }
  0x76   :  { %2009 = vmatprep.subr.bf16.mxu1 %v2008_v60  ;;  %v2022_v53 = vpack.c.bf16 %v292_v35, %v291_v34  ;;  %v968_v45 = vld [vmem:[%s3362_s5 + $0x18] sm:$0xff]  ;;  %v1004_v46 = vcombine.high %v3075_v39, %v3075_v39  ;;  %v969_v48 = vld [vmem:[%s3362_s5 + $0x20] sm:$0xff]  ;;  %v970_v49 = vld [vmem:[%s3362_s5 + $0x28] sm:$0xff] }
  0x77   :  { %1979 = vmatpush3.bf16.msra.mxu0 %v1978_v2  ;;  %v2028_v47 = vpack.c.bf16 %v968_v45, %v967_v43  ;;  %v2031_v50 = vpack.c.bf16 %v970_v49, %v969_v48  ;;  %v973_v52 = vld [vmem:[%s3362_s5 + $0x40] sm:$0xff]  ;;  %v974_v54 = vld [vmem:[%s3362_s5 + $0x48] sm:$0xff]  ;;  %v975_v55 = vld [vmem:[%s3362_s5 + $0x50] sm:$0xff] }
  0x78   :  { %1981 = vmatprep.subr.bf16.mxu0 %v1980_v4  ;;  %v2037_v33 = vpack.c.bf16 %v974_v54, %v973_v52  ;;  %v976_v56 = vld [vmem:[%s3362_s5 + $0x58] sm:$0xff]  ;;  %v977_v58 = vld [vmem:[%s3362_s5 + $0x60] sm:$0xff]  ;;  %v978_v42 = vld [vmem:[%s3362_s5 + $0x68] sm:$0xff] }
  0x79   :  { %2011 = vmatpush3.bf16.msra.mxu1 %v2010_v3  ;;  %v2040_v57 = vpack.c.bf16 %v976_v56, %v975_v55  ;;  %v2043_v59 = vpack.c.bf16 %v978_v42, %v977_v58  ;;  %v979_v60 = vld [vmem:[%s3362_s5 + $0x70] sm:$0xff]  ;;  %v980_v61 = vld [vmem:[%s3362_s5 + $0x78] sm:$0xff]  ;;  %v981_v63 = vld [vmem:[%s3362_s5 + $0x80] sm:$0xff] }
  0x7a   :  { %2013 = vmatprep.subr.bf16.mxu1 %v2012_v8  ;;  %v2046_v62 = vpack.c.bf16 %v980_v61, %v979_v60  ;;  %v982_v0 = vld [vmem:[%s3362_s5 + $0x88] sm:$0xff]  ;;  %v983_v2 = vld [vmem:[%s3362_s5 + $0x90] sm:$0xff]  ;;  %v984_v3 = vld [vmem:[%s3362_s5 + $0x98] sm:$0xff] }
  0x7b   :  { %1983 = vmatpush3.bf16.msra.mxu0 %v1982_v17  ;;  %v2049_v1 = vpack.c.bf16 %v982_v0, %v981_v63  ;;  %v2052_v4 = vpack.c.bf16 %v984_v3, %v983_v2  ;;  %v985_v5 = vld [vmem:[%s3362_s5 + $0xa0] sm:$0xff]  ;;  %v986_v6 = vld [vmem:[%s3362_s5 + $0xa8] sm:$0xff]  ;;  %v987_v8 = vld [vmem:[%s3362_s5 + $0xb0] sm:$0xff] }
  0x7c   :  { %1985 = vmatprep.subr.bf16.mxu0 %v1984_v19  ;;  %v2055_v7 = vpack.c.bf16 %v986_v6, %v985_v5  ;;  %v988_v9 = vld [vmem:[%s3362_s5 + $0xb8] sm:$0xff]  ;;  %v1082_v12 = vld [vmem:[%s3364_s7] sm:$0xff]  ;;  %v1083_v14 = vld [vmem:[%s3364_s7 + $0x8] sm:$0xff] }
  0x7d   :  { %2015 = vmatpush3.bf16.msra.mxu1 %v2014_v18  ;;  %v2058_v10 = vpack.c.bf16 %v988_v9, %v987_v8  ;;  %v2061_v15 = vpack.c.bf16 %v1083_v14, %v1082_v12  ;;  %v1410_v18 = vld [vmem:[%s3361_s4] ss:$0 sm:$0xff]  ;;  %v1084_v25 = vld [vmem:[%s3364_s7 + $0x10] sm:$0xff]  ;;  %v1085_v26 = vld [vmem:[%s3364_s7 + $0x18] sm:$0xff] }
  0x7e   :  { %2017 = vmatprep.subr.bf16.mxu1 %v2016_v22  ;;  %v2064_v27 = vpack.c.bf16 %v1085_v26, %v1084_v25  ;;  %v1411_v54 = vld [vmem:[%s3363_s6] ss:$0 sm:$0xff]  ;;  %v1172_v55 = vld [vmem:[%s3366_s9 + $0x8] sm:$0xff]  ;;  %v1174_v63 = vld [vmem:[%s3366_s9 + $0x18] sm:$0xff] }
  0x7f   :  { %1987 = vmatpush3.bf16.msra.mxu0 %v1986_v28  ;;  %v2168_v28 = vmov 0.0   ;;  %v1175_v2 = vld [vmem:[%s3366_s9 + $0x20] sm:$0xff]  ;;  %v1176_v3 = vld [vmem:[%s3366_s9 + $0x28] sm:$0xff]  ;;  %v1177_v5 = vld [vmem:[%s3366_s9 + $0x30] sm:$0xff] }
  0x80   :  { %1989 = vmatprep.subr.bf16.mxu0 %v1988_v30  ;;  %v1178_v6 = vld [vmem:[%s3366_s9 + $0x38] sm:$0xff]  ;;  %v1179_v8 = vld [vmem:[%s3366_s9 + $0x40] sm:$0xff]  ;;  %v1180_v9 = vld [vmem:[%s3366_s9 + $0x48] sm:$0xff] }
  0x81   :  { %2019 = vmatpush3.bf16.msra.mxu1 %v2018_v29  ;;  %v1181_v12 = vld [vmem:[%s3366_s9 + $0x50] sm:$0xff]  ;;  %v1182_v14 = vld [vmem:[%s3366_s9 + $0x58] sm:$0xff] }
  0x82   :  { %2021 = vmatprep.subr.bf16.mxu1 %v2020_v44  ;;  %v1189_v25 = vld [vmem:[%s3366_s9 + $0x90] sm:$0xff]  ;;  %v1190_v26 = vld [vmem:[%s3366_s9 + $0x98] sm:$0xff] }
  0x83   :  { %1991 = vmatpush3.bf16.msra.mxu0 %v1990_v36 }
  0x84   :  { %2024 = vmatprep.subr.bf16.mxu0 %v2166_v41 }
  0x85   :  { %2023 = vmatpush3.bf16.msra.mxu1 %v2022_v53 }
  0x86   :  { %2060 = vmatprep.subr.bf16.mxu1 %v2166_v41  ;;  %889 = vmatmul.mubr.f32.vlgmr.msra.gmra.mrb[6].mxu0 %v2893_v13  ;;  %v971_v13 = vld [vmem:[%s3362_s5 + $0x30] sm:$0xff] }
  0x87   :  { %2026 = vmatpush1.bf16.msra.mxu0 %v2025_v40  ;;  %1413 = vmatprep.mubr.msk.f32.mxu0 %vm1006_vm0, %v1004_v46 }
  0x88   :  { %959 = vmatmul.mubr.f32.vlgmr.msra.gmra.mrb[6].mxu1 %v2902_v16  ;;  %2027 = vmatprep.subr.bf16.mxu0 %v2166_v41  ;;  %v972_v16 = vld [vmem:[%s3362_s5 + $0x38] sm:$0xff] }
  0x89   :  { %v2034_v51 = vpack.c.bf16 %v972_v16, %v971_v13  ;;  %2062 = vmatpush3.bf16.msra.mxu1 %v2061_v15  ;;  %1730 = vmatprep.mubr.msk.f32.mxu1 %vm2167_vm1, %v2168_v28  ;;  %v2082_v15 = vpack.c.bf16 %v1182_v14, %v1181_v12 }
  0x8a   :  { %2063 = vmatprep.subr.bf16.mxu1 %v2166_v41 }
  0x8b   :  { %2029 = vmatpush1.bf16.msra.mxu0 %v2028_v47 }
  0x8c   :  { %2030 = vmatprep.subr.bf16.mxu0 %v2166_v41 }
  0x8d   :  { %2065 = vmatpush3.bf16.msra.mxu1 %v2064_v27  ;;  %v2094_v27 = vpack.c.bf16 %v1190_v26, %v1189_v25 }
  0x8e   :  { %2066 = vmatprep.subr.bf16.mxu1 %v2166_v41 }
  0x8f   :  { %2032 = vmatpush1.bf16.msra.mxu0 %v2031_v50 }
  0x90   :  { %2033 = vmatprep.subr.bf16.mxu0 %v2166_v41 }
  0x93   :  { %2035 = vmatpush1.bf16.msra.mxu0 %v2034_v51 }
  0x94   :  { %2036 = vmatprep.subr.bf16.mxu0 %v2166_v41 }
  0x97   :  { %2038 = vmatpush1.bf16.msra.mxu0 %v2037_v33  ;;  %v1171_v33 = vld [vmem:[%s3366_s9] sm:$0xff] }
  0x98   :  { %2039 = vmatprep.subr.bf16.mxu0 %v2166_v41 }
  0x9b   :  { %2041 = vmatpush1.bf16.msra.mxu0 %v2040_v57  ;;  %v3194_v57 = vld.sshfl [vmem:[%s3359_s2] sm:$0x33 pattern:$0x76325410] }
  0x9c   :  { %2042 = vmatprep.subr.bf16.mxu0 %v2166_v41  ;;  %v1210_v61 = vcombine.high %v3194_v57, %v3194_v57 }
  0x9f   :  { %2044 = vmatpush1.bf16.msra.mxu0 %v2043_v59  ;;  %v2067_v59 = vpack.c.bf16 %v1172_v55, %v1171_v33  ;;  %v1298_v33 = vld [vmem:[%s3368_s11 + $0x68] sm:$0xff] }
  0xa0   :  { %2045 = vmatprep.subr.bf16.mxu0 %v2166_v41 }
  0xa3   :  { %2047 = vmatpush1.bf16.msra.mxu0 %v2046_v62  ;;  %v1173_v62 = vld [vmem:[%s3366_s9 + $0x10] sm:$0xff] }
  0xa4   :  { %2048 = vmatprep.subr.bf16.mxu0 %v2166_v41 }
  0xa7   :  { %2050 = vmatpush1.bf16.msra.mxu0 %v2049_v1  ;;  %v2070_v1 = vpack.c.bf16 %v1174_v63, %v1173_v62 }
  0xa8   :  { %2051 = vmatprep.subr.bf16.mxu0 %v2166_v41 }
  0xab   :  { %2053 = vmatpush1.bf16.msra.mxu0 %v2052_v4  ;;  %v2073_v4 = vpack.c.bf16 %v1176_v3, %v1175_v2  ;;  %v1419_v3 = vld [vmem:[%s3369_s12] ss:$0 sm:$0xff] }
  0xac   :  { %2054 = vmatprep.subr.bf16.mxu0 %v2166_v41 }
  0xaf   :  { %2056 = vmatpush1.bf16.msra.mxu0 %v2055_v7  ;;  %v2076_v7 = vpack.c.bf16 %v1178_v6, %v1177_v5 }
  0xb0   :  { %2057 = vmatprep.subr.bf16.mxu0 %v2166_v41 }
  0xb3   :  { %2059 = vmatpush1.bf16.msra.mxu0 %v2058_v10  ;;  %v2079_v10 = vpack.c.bf16 %v1180_v9, %v1179_v8 }
  0xb4   :  { %2102 = vmatprep.subr.bf16.mxu0 %v2166_v41 }
  0xb6   :  { %1074 = vmatmul.mubr.f32.vlgmr.msra.gmra.mrb[8].mxu0 %v3075_v39 }
  0xb7   :  { %1765 = vmatprep.mubr.msk.f32.mxu0 %vm2167_vm1, %v2168_v28  ;;  %v1191_v28 = vld [vmem:[%s3366_s9 + $0xa0] sm:$0xff] }
  0xf9   :  { %v1452_v17 = vpop.f32.mrb[0].mxu0 }
  0xfa   :  { %v1453_v19 = vpop.f32.mrb[1].mxu0 }
  0xfb   :  { %v1487_v20 = vpop.f32.mrb[0].mxu1  ;;  %v1454_v21 = vadd.f32 %v1453_v19, %v1452_v17  ;;  %v1183_v17 = vld [vmem:[%s3366_s9 + $0x60] sm:$0xff] }
  0xfc   :  { %v1488_v11 = vpop.f32.mrb[1].mxu1 }
  0xfd   :  { %v1489_v22 = vadd.f32 %v1488_v11, %v1487_v20  ;;  %v471_v23 = vadd.f32 %v1454_v21, %v1410_v18  ;;  %v1184_v18 = vld [vmem:[%s3366_s9 + $0x68] sm:$0xff]  ;;  %v1185_v20 = vld [vmem:[%s3366_s9 + $0x70] sm:$0xff]  ;;  %v1186_v21 = vld [vmem:[%s3366_s9 + $0x78] sm:$0xff] }
  0xfe   :  { %v2085_v19 = vpack.c.bf16 %v1184_v18, %v1183_v17  ;;  %v2088_v11 = vpack.c.bf16 %v1186_v21, %v1185_v20 }
  0xff   :  { %v541_v24 = vadd.f32 %v1489_v22, %v471_v23  ;;  %v1187_v22 = vld [vmem:[%s3366_s9 + $0x80] sm:$0xff]  ;;  %v1188_v23 = vld [vmem:[%s3366_s9 + $0x88] sm:$0xff] }
 0x119   :  { %v1522_v29 = vpop.f32.mrb[2].mxu0 }
 0x11a   :  { %v1523_v30 = vpop.f32.mrb[3].mxu0 }
 0x11b   :  { %v1557_v31 = vpop.f32.mrb[2].mxu1  ;;  %v1524_v32 = vadd.f32 %v1523_v30, %v1522_v29  ;;  %v1192_v29 = vld [vmem:[%s3366_s9 + $0xa8] sm:$0xff] }
 0x11c   :  { %v1558_v44 = vpop.f32.mrb[3].mxu1  ;;  %v2097_v30 = vpack.c.bf16 %v1192_v29, %v1191_v28 }
 0x11d   :  { %v1559_v34 = vadd.f32 %v1558_v44, %v1557_v31  ;;  %v611_v35 = vadd.f32 %v1524_v32, %v541_v24  ;;  %v2091_v24 = vpack.c.bf16 %v1188_v23, %v1187_v22  ;;  %v1193_v31 = vld [vmem:[%s3366_s9 + $0xb0] sm:$0xff]  ;;  %v1194_v32 = vld [vmem:[%s3366_s9 + $0xb8] sm:$0xff] }
 0x11e   :  { %v2100_v44 = vpack.c.bf16 %v1194_v32, %v1193_v31 }
 0x11f   :  { %v681_v36 = vadd.f32 %v1559_v34, %v611_v35  ;;  %v1285_v34 = vld [vmem:[%s3368_s11] sm:$0xff]  ;;  %v1286_v35 = vld [vmem:[%s3368_s11 + $0x8] sm:$0xff] }
 0x139   :  { %v1592_v53 = vpop.f32.mrb[4].mxu0 }
 0x13a   :  { %v1593_v37 = vpop.f32.mrb[5].mxu0 }
 0x13b   :  { %v1627_v38 = vpop.f32.mrb[4].mxu1  ;;  %v1594_v39 = vadd.f32 %v1593_v37, %v1592_v53  ;;  %v2103_v53 = vpack.c.bf16 %v1286_v35, %v1285_v34  ;;  %v1288_v37 = vld [vmem:[%s3368_s11 + $0x18] sm:$0xff] }
 0x13c   :  { %v1628_v40 = vpop.f32.mrb[5].mxu1 }
 0x13d   :  { %v1629_v43 = vadd.f32 %v1628_v40, %v1627_v38  ;;  %v751_v45 = vadd.f32 %v1594_v39, %v681_v36  ;;  %v1287_v36 = vld [vmem:[%s3368_s11 + $0x10] sm:$0xff]  ;;  %2104 = vmatpush3.bf16.msra.mxu0 %v2103_v53  ;;  %v1289_v39 = vld [vmem:[%s3368_s11 + $0x20] sm:$0xff]  ;;  %v1290_v40 = vld [vmem:[%s3368_s11 + $0x28] sm:$0xff] }
 0x13e   :  { %v2106_v38 = vpack.c.bf16 %v1288_v37, %v1287_v36  ;;  %2105 = vmatprep.subr.bf16.mxu0 %v2166_v41 }
 0x13f   :  { %v821_v46 = vadd.f32 %v1629_v43, %v751_v45  ;;  %v2109_v43 = vpack.c.bf16 %v1290_v40, %v1289_v39  ;;  %v1291_v45 = vld [vmem:[%s3368_s11 + $0x30] sm:$0xff] }
 0x141   :  { %2107 = vmatpush3.bf16.msra.mxu0 %v2106_v38 }
 0x142   :  { %2108 = vmatprep.subr.bf16.mxu0 %v2166_v41 }
 0x145   :  { %2110 = vmatpush3.bf16.msra.mxu0 %v2109_v43 }
 0x146   :  { %2111 = vmatprep.subr.bf16.mxu0 %v2166_v41 }
 0x159   :  { %v1662_v47 = vpop.f32.mrb[6].mxu0 }
 0x15a   :  { %v1663_v48 = vpop.f32.mrb[7].mxu0 }
 0x15b   :  { %v1697_v49 = vpop.f32.mrb[6].mxu1  ;;  %v1664_v50 = vadd.f32 %v1663_v48, %v1662_v47  ;;  %v1293_v48 = vld [vmem:[%s3368_s11 + $0x40] sm:$0xff] }
 0x15c   :  { %v1698_v13 = vpop.f32.mrb[7].mxu1 }
 0x15d   :  { %v1699_v16 = vadd.f32 %v1698_v13, %v1697_v49  ;;  %v891_v51 = vadd.f32 %v1664_v50, %v821_v46  ;;  %v1292_v46 = vld [vmem:[%s3368_s11 + $0x38] sm:$0xff]  ;;  %v1294_v49 = vld [vmem:[%s3368_s11 + $0x48] sm:$0xff]  ;;  %v1295_v13 = vld [vmem:[%s3368_s11 + $0x50] sm:$0xff] }
 0x15e   :  { %v2112_v47 = vpack.c.bf16 %v1292_v46, %v1291_v45  ;;  %v2115_v50 = vpack.c.bf16 %v1294_v49, %v1293_v48 }
 0x15f   :  { %v3180_v52 = vadd.f32 %v1699_v16, %v891_v51  ;;  %v1296_v16 = vld [vmem:[%s3368_s11 + $0x58] sm:$0xff] }
 0x160   :  { %2113 = vmatpush3.bf16.msra.mxu0 %v2112_v47  ;;  %v2118_v51 = vpack.c.bf16 %v1296_v16, %v1295_v13 }
 0x161   :  { %2114 = vmatprep.subr.bf16.mxu0 %v2166_v41 }
 0x164   :  { %2116 = vmatpush3.bf16.msra.mxu0 %v2115_v50 }
 0x165   :  { %2117 = vmatprep.subr.bf16.mxu0 %v2166_v41 }
 0x168   :  { %2119 = vmatpush3.bf16.msra.mxu0 %v2118_v51 }
 0x169   :  { %2120 = vmatprep.subr.bf16.mxu0 %v2166_v41 }
 0x189   :  { %v1075_v56 = vpop.f32.mrb[8].mxu0 }
 0x18a   :  { %v1076_v58 = vadd.f32 %v1411_v54, %v1075_v56  ;;  %v1077_v42 = vpop.f32.mrb[9].mxu0  ;;  %v1297_v54 = vld [vmem:[%s3368_s11 + $0x60] sm:$0xff]  ;;  %v1299_v56 = vld [vmem:[%s3368_s11 + $0x70] sm:$0xff] }
 0x18b   :  { %v2121_v55 = vpack.c.bf16 %v1298_v33, %v1297_v54  ;;  %v1414_v42 = vld [vmem:[#allocation2] ss:$0 sm:$0xff] }
 0x18c   :  { %vm1079_vm2 = vcmp.gt.f32.partialorder %v1076_v58, 0.0  ;;  %v1080_v60 = vmul.f32 0.01, %v1076_v58 }
 0x18d   :  { %2122 = vmatpush3.bf16.msra.mxu0 %v2121_v55 }
 0x18e   :  { %v1081_v0 = vsel %vm1079_vm2, %v1076_v58, %v1080_v60  ;;  %2123 = vmatprep.subr.bf16.mxu0 %v2166_v41 }
 0x18f   :  { %1731 = vmatmul.mubr.msk.f32.vlgmr.msra.gmra.mrb[8].mxu1 %vm1093_vm3, %v1081_v0 }
 0x190   :  { %2068 = vmatpush1.bf16.msra.mxu1 %v2067_v59  ;;  %1418 = vmatprep.mubr.msk.f32.mxu1 %vm1006_vm0, %v1210_v61 }
 0x191   :  { %2069 = vmatprep.subr.bf16.mxu1 %v2166_v41 }
 0x194   :  { %2071 = vmatpush1.bf16.msra.mxu1 %v2070_v1 }
 0x195   :  { %2072 = vmatprep.subr.bf16.mxu1 %v2166_v41 }
 0x198   :  { %2074 = vmatpush1.bf16.msra.mxu1 %v2073_v4 }
 0x199   :  { %2075 = vmatprep.subr.bf16.mxu1 %v2166_v41 }
 0x19c   :  { %2077 = vmatpush1.bf16.msra.mxu1 %v2076_v7 }
 0x19d   :  { %2078 = vmatprep.subr.bf16.mxu1 %v2166_v41 }
 0x1a0   :  { %2080 = vmatpush1.bf16.msra.mxu1 %v2079_v10 }
 0x1a1   :  { %2081 = vmatprep.subr.bf16.mxu1 %v2166_v41 }
 0x1a4   :  { %2083 = vmatpush1.bf16.msra.mxu1 %v2082_v15 }
 0x1a5   :  { %2084 = vmatprep.subr.bf16.mxu1 %v2166_v41 }
 0x1a8   :  { %2086 = vmatpush1.bf16.msra.mxu1 %v2085_v19 }
 0x1a9   :  { %2087 = vmatprep.subr.bf16.mxu1 %v2166_v41 }
 0x1ac   :  { %2089 = vmatpush1.bf16.msra.mxu1 %v2088_v11 }
 0x1ad   :  { %2090 = vmatprep.subr.bf16.mxu1 %v2166_v41 }
 0x1b0   :  { %2092 = vmatpush1.bf16.msra.mxu1 %v2091_v24 }
 0x1b1   :  { %2093 = vmatprep.subr.bf16.mxu1 %v2166_v41 }
 0x1b4   :  { %2095 = vmatpush1.bf16.msra.mxu1 %v2094_v27 }
 0x1b5   :  { %2096 = vmatprep.subr.bf16.mxu1 %v2166_v41 }
 0x1b8   :  { %2098 = vmatpush1.bf16.msra.mxu1 %v2097_v30 }
 0x1b9   :  { %2099 = vmatprep.subr.bf16.mxu1 %v2166_v41  ;;  %v1416_v41 = vld [vmem:[%s3367_s10] ss:$0 sm:$0xff]  ;;  %s2169_s10 = smov [#allocation3]  }
 0x1ba   :  { %s1398_s12 = sshll.u32 %s2169_s10, 4  ;;  %s1399_s12 = int_to_ptr.vmem [resolvable:$true] %s1398_s12 }
 0x1bb   :  { %p2146_p1 = scmp.lt.s32.totalorder %s1399_s12, %s1399_s12 }
 0x1bc   :  { %2101 = vmatpush1.bf16.msra.mxu1 %v2100_v44 }
 0x1bf   :  { %1279 = vmatmul.mubr.f32.vlgmr.msra.gmra.mrb[10].mxu1 %v3194_v57  ;;  %v1300_v57 = vld [vmem:[%s3368_s11 + $0x78] sm:$0xff] }
 0x1c0   :  { %v2124_v58 = vpack.c.bf16 %v1300_v57, %v1299_v56 }
 0x1c2   :  { %2125 = vmatpush3.bf16.msra.mxu0 %v2124_v58 }
 0x262   :  { %v1163_v59 = vpop.f32.mrb[8].mxu1 }
 0x263   :  { %v1164_v60 = vadd.f32 %v1414_v42, %v1163_v59  ;;  %v1732_v61 = vpop.f32.mrb[9].mxu1 }
 0x265   :  { %2135 = vtanh.f32 %v1164_v60 }
 0x26f   :  { %v2136_v62 = vpop.eup %2135 }
 0x270   :  { %1169 = vst.msk [vmem:[%s3371_s14] sm:$0x3] %vm1168_vm4, %v2136_v62  ;;  %s2141_s14 = scalar_lea.vmem %s1399_s12, 32 }
 0x271   :  { %p2142_p0 = scmp.ne.s32.totalorder %s1399_s12, %s2141_s14  ;;  %p2147_p2 = scmp.lt.s32.totalorder %s2141_s14, %s2141_s14 }
 0x273   :  { %p2148_p3 = por %p2147_p2, %p2146_p1 }
 0x275   :  { %p2149_p4 = pnand %p2148_p3, %p2142_p0 }
 0x292   :  { %v1280_v63 = vpop.f32.mrb[10].mxu1 }
 0x293   :  { %v1281_v0 = vadd.f32 %v1416_v41, %v1280_v63  ;;  %v1282_v1 = vpop.f32.mrb[11].mxu1 }
 0x295   :  { %v1284_v2 = vmax.f32 %v1281_v0, 0.0 }
 0x297   :  { %1766 = vmatmul.mubr.f32.vlgmr.msra.gmra.mrb[10].mxu0 %v1284_v2 }
 0x36a   :  { %v1374_v4 = vpop.f32.mrb[10].mxu0 }
 0x36b   :  { %v1375_v5 = vadd.f32 %v1419_v3, %v1374_v4  ;;  %v1767_v6 = vpop.f32.mrb[11].mxu0 }
 0x36d   :  { %v1379_v7 = vsel %vm1378_vm5, %v1375_v5, -inf }
 0x36e   :  { %1380 = vmax.xlane.f32.xlu0 %v1379_v7 }
 0x3fb   :  { %v1381_v8 = vpop.xlane.xlu0 %1380 }
 0x3fc   :  { %v1382_v9 = vsub.f32 %v1375_v5, %v1381_v8 }
 0x3fe   :  { %v1383_v10 = vmul.f32 1.442695, %v1382_v9 }
 0x400   :  { %2137 = vpow2.f32 %v1383_v10 }
 0x40a   :  { %v2138_v12 = vpop.eup %2137 }
 0x40b   :  { %v1385_v14 = vsel %vm1378_vm5, %v2138_v12, 0.0 }
 0x40c   :  { %1386 = vadd.xlane.f32.xlu0 %v1385_v14 }
 0x499   :  { %v1387_v15 = vpop.xlane.xlu0 %1386 }
 0x49a   :  { %2139 = vrcp.f32 %v1387_v15 }
 0x4a4   :  { %v2140_v17 = vpop.eup %2139 }
 0x4a5   :  { %v1389_v18 = vmul.f32 %v2140_v17, %v2138_v12 }
 0x4a7   :  { %v1390_v19 = vmul.f32 %v1389_v18, %v3180_v52 }
 0x4a9   :  { %1391 = vst.msk [vmem:[#allocation3] sm:$0x3] %vm1378_vm5, %v1390_v19 }
 0x4aa   :  { %2152 = shalt.err (!%p2149_p4)
}
 0x4ab   :  { %s2153_s24 = scalar_lea.hbm %s3370_s13, 32 }
 0x4ac   :  { %p2154_p5 = scmp.ne.s32.totalorder %s3370_s13, %s2153_s24  ;;  %p2157_p6 = scmp.lt.u32.totalorder %s2153_s24, %s3370_s13 }
 0x4ae   :  { %p2159_p7 = pnand %p2157_p6, %p2154_p5 }
 0x4b0   :  { %2162 = shalt.err (!%p2159_p7)
}
 0x4b1   :  { %1401 = dma.vmem_to_hbm [thread:$0]  %s1399_s12, 32, %s3370_s13, [#allocation4]  }
 0x4b2   :  { %2163 = dma.done.wait [#allocation4], 32  }
 0x4b3   :  { %2164 = vsyncadd [#allocation4], 4294967264 }
 0x4b4   :  { %1409 = vsyncpa [#allocation4], 1 }

// kernel: forward.2
= control target key start
LH: loop header
LB: loop body
LE: loop exit
PB: predicated region body
PF: predicated region fallthrough
CT: control target
= control target key end

     0   :  { %14 = vsyncpa [#allocation5], 0  ;;  %s9573_s27 = smov [#allocation4]   ;;  %s11399_s0 = inlined_call_operand.vmem [shape: f32[2,8,8,32], index: 0, kind: input, shape index: {}]   ;;  %s11400_s1 = inlined_call_operand.hbm [shape: f32[3,9,32,32], index: 1, kind: input, shape index: {}]   ;;  %s11401_s2 = inlined_call_operand.vmem [shape: f32[3,1,32], index: 2, kind: input, shape index: {}]   ;;  %s11402_s3 = inlined_call_operand.vmem [shape: f32[3,1,32], index: 3, kind: input, shape index: {}]   ;;  %s11403_s4 = inlined_call_operand.vmem [shape: f32[32,35], index: 4, kind: input, shape index: {}]   ;;  %s11404_s5 = inlined_call_operand.vmem [shape: f32[1,35], index: 5, kind: input, shape index: {}]   ;;  %s11405_s6 = inlined_call_operand.vmem [shape: f32[1,35], index: 6, kind: input, shape index: {}]   ;;  %s11406_s7 = inlined_call_operand.vmem [shape: f32[2,64,32], index: 7, kind: output, shape index: {0}]   ;;  %s11407_s8 = inlined_call_operand.vmem [shape: f32[2,64,3], index: 8, kind: output, shape index: {1}]  }
   0x1   :  { %s22_s28 = sshll.u32 %s9573_s27, 4  ;;  %s9549_s9 = scalar_lea.hbm %s11400_s1, 13824  ;;  %s23_s28 = int_to_ptr.vmem [resolvable:$true] %s22_s28 }
   0x2   :  { %p9550_p0 = scmp.ne.s32.totalorder %s11400_s1, %s9549_s9  ;;  %p9553_p1 = scmp.lt.u32.totalorder %s9549_s9, %s11400_s1 }
   0x4   :  { %p9555_p2 = pnand %p9553_p1, %p9550_p0 }
   0x6   :  { %9558 = shalt.err (!%p9555_p2)
}
   0x7   :  { %s9559_s14 = scalar_lea.vmem %s23_s28, 13824  ;;  %p9564_p4 = scmp.lt.s32.totalorder %s23_s28, %s23_s28 }
   0x8   :  { %p9560_p3 = scmp.ne.s32.totalorder %s23_s28, %s9559_s14  ;;  %p9565_p5 = scmp.lt.s32.totalorder %s9559_s14, %s9559_s14 }
   0xa   :  { %p9566_p6 = por %p9565_p5, %p9564_p4 }
   0xc   :  { %p9567_p7 = pnand %p9566_p6, %p9560_p3 }
   0xe   :  { %9570 = shalt.err (!%p9567_p7)
}
   0xf   :  { %s9574_s15 = smov 128   ;;  %s9575_s16 = smov 8  }
  0x10   :  { %28 = dma.hbm_to_vmem [thread:$0]  %s11400_s1, 13824, %s23_s28, [#allocation5], %s9574_s15, %s9574_s15, %s9575_s16  }
  0x11   :  { %9571 = dma.done.wait [#allocation5], 13824  }
  0x12   :  { %9572 = vsyncadd [#allocation5], 4294953472  ;;  %vm42_vm0 = vcmask 261120   ;;  %vm44_vm1 = vcmask 254976   ;;  %v9576_v0 = vmov 0.0   ;;  %v194_v1 = vld [vmem:[#allocation4 + $0x20] sm:$0xff] }
  0x13   :  { %43 = vst.msk [vmem:[#allocation2] sm:$0xff] %vm42_vm0, %v9576_v0  ;;  %46 = vst.msk [vmem:[#allocation2 + $0x10] sm:$0xff] %vm42_vm0, %v9576_v0  ;;  %v195_v2 = vld [vmem:[#allocation4 + $0x28] sm:$0xff]  ;;  %v1061_v3 = vld [vmem:[#allocation4 + $0x80] sm:$0xff] }
  0x14   :  { %45 = vst.msk [vmem:[#allocation2 + $0x8] sm:$0x3] %vm44_vm1, %v9576_v0  ;;  %47 = vst.msk [vmem:[#allocation2 + $0x18] sm:$0x3] %vm44_vm1, %v9576_v0  ;;  %v8936_v4 = vpack.c.bf16 %v195_v2, %v194_v1  ;;  %v1062_v5 = vld [vmem:[#allocation4 + $0x88] sm:$0xff]  ;;  %v196_v6 = vld [vmem:[#allocation4 + $0x30] sm:$0xff] }
  0x15   :  { %48 = vst.msk [vmem:[#allocation2 + $0x20] sm:$0xff] %vm42_vm0, %v9576_v0  ;;  %50 = vst.msk [vmem:[#allocation2 + $0x30] sm:$0xff] %vm42_vm0, %v9576_v0  ;;  %v197_v7 = vld [vmem:[#allocation4 + $0x38] sm:$0xff]  ;;  %v8968_v8 = vpack.c.bf16 %v1062_v5, %v1061_v3  ;;  %v1063_v10 = vld [vmem:[#allocation4 + $0x90] sm:$0xff] }
  0x16   :  { %49 = vst.msk [vmem:[#allocation2 + $0x28] sm:$0x3] %vm44_vm1, %v9576_v0  ;;  %51 = vst.msk [vmem:[#allocation2 + $0x38] sm:$0x3] %vm44_vm1, %v9576_v0  ;;  %v8940_v9 = vpack.c.bf16 %v197_v7, %v196_v6  ;;  %v1064_v11 = vld [vmem:[#allocation4 + $0x98] sm:$0xff]  ;;  %8937 = vmatprep.subr.bf16.mxu1 %v8936_v4  ;;  %v124_v14 = vld [vmem:[%s11399_s0] sm:$0xff] }
  0x17   :  { %52 = vst.msk [vmem:[#allocation2 + $0x40] sm:$0xff] %vm42_vm0, %v9576_v0  ;;  %54 = vst.msk [vmem:[#allocation2 + $0x50] sm:$0xff] %vm42_vm0, %v9576_v0  ;;  %v8972_v13 = vpack.c.bf16 %v1064_v11, %v1063_v10  ;;  %v125_v15 = vld [vmem:[%s11399_s0 + $0x8] sm:$0xff]  ;;  %v1291_v16 = vld [vmem:[#allocation4 + $0xa0] sm:$0xff]  ;;  %8969 = vmatprep.subr.bf16.mxu0 %v8968_v8  ;;  %8939 = vmatpush3.bf16.msra.mxu1 %v8936_v4 }
  0x18   :  { %53 = vst.msk [vmem:[#allocation2 + $0x48] sm:$0x3] %vm44_vm1, %v9576_v0  ;;  %55 = vst.msk [vmem:[#allocation2 + $0x58] sm:$0x3] %vm44_vm1, %v9576_v0  ;;  %v1292_v17 = vld [vmem:[#allocation4 + $0xa8] sm:$0xff]  ;;  %v126_v18 = vld [vmem:[%s11399_s0 + $0x10] sm:$0xff]  ;;  %8971 = vmatpush3.bf16.msra.mxu0 %v8968_v8  ;;  %8941 = vmatprep.subr.bf16.mxu1 %v8940_v9 }
  0x19   :  { %56 = vst.msk [vmem:[#allocation2 + $0x60] sm:$0xff] %vm42_vm0, %v9576_v0  ;;  %58 = vst.msk [vmem:[#allocation2 + $0x70] sm:$0xff] %vm42_vm0, %v9576_v0  ;;  %v127_v19 = vld [vmem:[%s11399_s0 + $0x18] sm:$0xff]  ;;  %v128_v20 = vld [vmem:[%s11399_s0 + $0x20] sm:$0xff]  ;;  %8973 = vmatprep.subr.bf16.mxu0 %v8972_v13  ;;  %v8976_v23 = vpack.c.bf16 %v1292_v17, %v1291_v16 }
  0x1a   :  { %57 = vst.msk [vmem:[#allocation2 + $0x68] sm:$0x3] %vm44_vm1, %v9576_v0  ;;  %59 = vst.msk [vmem:[#allocation2 + $0x78] sm:$0x3] %vm44_vm1, %v9576_v0  ;;  %v129_v21 = vld [vmem:[%s11399_s0 + $0x28] sm:$0xff]  ;;  %v130_v22 = vld [vmem:[%s11399_s0 + $0x30] sm:$0xff] }
  0x1b   :  { %60 = vst.msk [vmem:[#allocation2 + $0x80] sm:$0xff] %vm42_vm0, %v9576_v0  ;;  %62 = vst.msk [vmem:[#allocation2 + $0x90] sm:$0xff] %vm42_vm0, %v9576_v0  ;;  %v177_v12 = vld [vmem:[#allocation2 + $0x1] sm:$0xff]  ;;  %v131_v24 = vld [vmem:[%s11399_s0 + $0x38] sm:$0xff]  ;;  %8943 = vmatpush3.bf16.msra.mxu1 %v8940_v9 }
  0x1c   :  { %61 = vst.msk [vmem:[#allocation2 + $0x88] sm:$0x3] %vm44_vm1, %v9576_v0  ;;  %63 = vst.msk [vmem:[#allocation2 + $0x98] sm:$0x3] %vm44_vm1, %v9576_v0  ;;  %8048 = vmatprep.mubr.msk.f32.mxu1 %vm42_vm0, %v177_v12  ;;  %v132_v25 = vld [vmem:[%s11399_s0 + $0x40] sm:$0xff]  ;;  %v133_v26 = vld [vmem:[%s11399_s0 + $0x48] sm:$0xff]  ;;  %8975 = vmatpush3.bf16.msra.mxu0 %v8972_v13 }
  0x1d   :  { %64 = vst.msk [vmem:[#allocation2 + $0xa0] sm:$0xff] %vm42_vm0, %v9576_v0  ;;  %66 = vst.msk [vmem:[#allocation2 + $0xb0] sm:$0xff] %vm42_vm0, %v9576_v0  ;;  %v1293_v27 = vld [vmem:[#allocation4 + $0xb0] sm:$0xff]  ;;  %v1294_v28 = vld [vmem:[#allocation4 + $0xb8] sm:$0xff]  ;;  %8977 = vmatprep.subr.bf16.mxu0 %v8976_v23 }
  0x1e   :  { %65 = vst.msk [vmem:[#allocation2 + $0xa8] sm:$0x3] %vm44_vm1, %v9576_v0  ;;  %67 = vst.msk [vmem:[#allocation2 + $0xb8] sm:$0x3] %vm44_vm1, %v9576_v0  ;;  %v134_v29 = vld [vmem:[%s11399_s0 + $0x50] sm:$0xff]  ;;  %v135_v30 = vld [vmem:[%s11399_s0 + $0x58] sm:$0xff]  ;;  %v8980_v38 = vpack.c.bf16 %v1294_v28, %v1293_v27 }
  0x1f   :  { %68 = vst.msk [vmem:[#allocation2 + $0xc0] sm:$0xff] %vm42_vm0, %v9576_v0  ;;  %70 = vst.msk [vmem:[#allocation2 + $0xd0] sm:$0xff] %vm42_vm0, %v9576_v0  ;;  %v136_v31 = vld [vmem:[%s11399_s0 + $0x60] sm:$0xff]  ;;  %v174_v33 = vld [vmem:[#allocation4 + $0x8] sm:$0xff] }
  0x20   :  { %69 = vst.msk [vmem:[#allocation2 + $0xc8] sm:$0x3] %vm44_vm1, %v9576_v0  ;;  %71 = vst.msk [vmem:[#allocation2 + $0xd8] sm:$0x3] %vm44_vm1, %v9576_v0  ;;  %v173_v32 = vld [vmem:[#allocation4] sm:$0xff]  ;;  %v137_v34 = vld [vmem:[%s11399_s0 + $0x68] sm:$0xff] }
  0x21   :  { %72 = vst.msk [vmem:[#allocation2 + $0xe0] sm:$0xff] %vm42_vm0, %v9576_v0  ;;  %74 = vst.msk [vmem:[#allocation2 + $0xf0] sm:$0xff] %vm42_vm0, %v9576_v0  ;;  %v138_v35 = vld [vmem:[%s11399_s0 + $0x70] sm:$0xff]  ;;  %v8944_v39 = vpack.c.bf16 %v174_v33, %v173_v32  ;;  %v139_v40 = vld [vmem:[%s11399_s0 + $0x78] sm:$0xff] }
  0x22   :  { %73 = vst.msk [vmem:[#allocation2 + $0xe8] sm:$0x3] %vm44_vm1, %v9576_v0  ;;  %75 = vst.msk [vmem:[#allocation2 + $0xf8] sm:$0x3] %vm44_vm1, %v9576_v0  ;;  %v175_v42 = vld [vmem:[#allocation4 + $0x10] sm:$0xff]  ;;  %v176_v43 = vld [vmem:[#allocation4 + $0x18] sm:$0xff] }
  0x23   :  { %76 = vst.msk [vmem:[#allocation2 + $0x100] sm:$0xff] %vm42_vm0, %v9576_v0  ;;  %78 = vst.msk [vmem:[#allocation2 + $0x110] sm:$0xff] %vm42_vm0, %v9576_v0  ;;  %8945 = vmatprep.subr.bf16.mxu1 %v8944_v39  ;;  %v8948_v46 = vpack.c.bf16 %v176_v43, %v175_v42  ;;  %v1522_v47 = vld [vmem:[#allocation4 + $0xc0] sm:$0xff]  ;;  %v1523_v48 = vld [vmem:[#allocation4 + $0xc8] sm:$0xff] }
  0x24   :  { %77 = vst.msk [vmem:[#allocation2 + $0x108] sm:$0x3] %vm44_vm1, %v9576_v0  ;;  %79 = vst.msk [vmem:[#allocation2 + $0x118] sm:$0x3] %vm44_vm1, %v9576_v0  ;;  %v9886_v50 = vpack.c.bf16 %v1523_v48, %v1522_v47  ;;  %v601_v57 = vld [vmem:[#allocation4 + $0x40] sm:$0xff]  ;;  %v602_v58 = vld [vmem:[#allocation4 + $0x48] sm:$0xff] }
  0x25   :  { %80 = vst.msk [vmem:[#allocation2 + $0x120] sm:$0xff] %vm42_vm0, %v9576_v0  ;;  %82 = vst.msk [vmem:[#allocation2 + $0x130] sm:$0xff] %vm42_vm0, %v9576_v0  ;;  %v185_v53 = vld [vmem:[#allocation2 + $0xa1] sm:$0xff]  ;;  %v8952_v59 = vpack.c.bf16 %v602_v58, %v601_v57  ;;  %v1524_v3 = vld [vmem:[#allocation4 + $0xd0] sm:$0xff] }
  0x26   :  { %81 = vst.msk [vmem:[#allocation2 + $0x128] sm:$0x3] %vm44_vm1, %v9576_v0  ;;  %83 = vst.msk [vmem:[#allocation2 + $0x138] sm:$0x3] %vm44_vm1, %v9576_v0  ;;  %v157_v1 = vld [vmem:[#allocation2] sm:$0xff]  ;;  %v1525_v4 = vld [vmem:[#allocation4 + $0xd8] sm:$0xff] }
  0x27   :  { %84 = vst.msk [vmem:[#allocation3] sm:$0xff] %vm42_vm0, %v9576_v0  ;;  %86 = vst.msk [vmem:[#allocation3 + $0x10] sm:$0xff] %vm42_vm0, %v9576_v0  ;;  %v603_v6 = vld [vmem:[#allocation4 + $0x50] sm:$0xff]  ;;  %v604_v7 = vld [vmem:[#allocation4 + $0x58] sm:$0xff]  ;;  %v8988_v11 = vpack.c.bf16 %v1525_v4, %v1524_v3 }
  0x28   :  { %85 = vst.msk [vmem:[#allocation3 + $0x8] sm:$0x3] %vm44_vm1, %v9576_v0  ;;  %87 = vst.msk [vmem:[#allocation3 + $0x18] sm:$0x3] %vm44_vm1, %v9576_v0  ;;  %v8956_v12 = vpack.c.bf16 %v604_v7, %v603_v6  ;;  %v1752_v13 = vld [vmem:[#allocation4 + $0xe0] sm:$0xff]  ;;  %v832_v17 = vld [vmem:[#allocation4 + $0x68] sm:$0xff] }
  0x29   :  { %88 = vst.msk [vmem:[#allocation3 + $0x20] sm:$0xff] %vm42_vm0, %v9576_v0  ;;  %90 = vst.msk [vmem:[#allocation3 + $0x30] sm:$0xff] %vm42_vm0, %v9576_v0  ;;  %v831_v16 = vld [vmem:[#allocation4 + $0x60] sm:$0xff]  ;;  %v833_v57 = vld [vmem:[#allocation4 + $0x70] sm:$0xff] }
  0x2a   :  { %89 = vst.msk [vmem:[#allocation3 + $0x28] sm:$0x3] %vm44_vm1, %v9576_v0  ;;  %91 = vst.msk [vmem:[#allocation3 + $0x38] sm:$0x3] %vm44_vm1, %v9576_v0  ;;  %v834_v58 = vld [vmem:[#allocation4 + $0x78] sm:$0xff]  ;;  %v1982_v3 = vld [vmem:[#allocation4 + $0x100] sm:$0xff] }
  0x2b   :  { %92 = vst.msk [vmem:[#allocation3 + $0x40] sm:$0xff] %vm42_vm0, %v9576_v0  ;;  %94 = vst.msk [vmem:[#allocation3 + $0x50] sm:$0xff] %vm42_vm0, %v9576_v0  ;;  %v1983_v4 = vld [vmem:[#allocation4 + $0x108] sm:$0xff]  ;;  %v1512_v7 = vld [vmem:[#allocation2 + $0x90] sm:$0xff] }
  0x2c   :  { %93 = vst.msk [vmem:[#allocation3 + $0x48] sm:$0x3] %vm44_vm1, %v9576_v0  ;;  %95 = vst.msk [vmem:[#allocation3 + $0x58] sm:$0x3] %vm44_vm1, %v9576_v0  ;;  %v9000_v6 = vpack.c.bf16 %v1983_v4, %v1982_v3 }
  0x2d   :  { %96 = vst.msk [vmem:[#allocation3 + $0x60] sm:$0xff] %vm42_vm0, %v9576_v0  ;;  %98 = vst.msk [vmem:[#allocation3 + $0x70] sm:$0xff] %vm42_vm0, %v9576_v0 }
  0x2e   :  { %97 = vst.msk [vmem:[#allocation3 + $0x68] sm:$0x3] %vm44_vm1, %v9576_v0  ;;  %99 = vst.msk [vmem:[#allocation3 + $0x78] sm:$0x3] %vm44_vm1, %v9576_v0 }
  0x2f   :  { %100 = vst.msk [vmem:[#allocation3 + $0x80] sm:$0xff] %vm42_vm0, %v9576_v0  ;;  %102 = vst.msk [vmem:[#allocation3 + $0x90] sm:$0xff] %vm42_vm0, %v9576_v0 }
  0x30   :  { %101 = vst.msk [vmem:[#allocation3 + $0x88] sm:$0x3] %vm44_vm1, %v9576_v0  ;;  %103 = vst.msk [vmem:[#allocation3 + $0x98] sm:$0x3] %vm44_vm1, %v9576_v0 }
  0x31   :  { %104 = vst.msk [vmem:[#allocation3 + $0xa0] sm:$0xff] %vm42_vm0, %v9576_v0  ;;  %106 = vst.msk [vmem:[#allocation3 + $0xb0] sm:$0xff] %vm42_vm0, %v9576_v0 }
  0x32   :  { %105 = vst.msk [vmem:[#allocation3 + $0xa8] sm:$0x3] %vm44_vm1, %v9576_v0  ;;  %107 = vst.msk [vmem:[#allocation3 + $0xb8] sm:$0x3] %vm44_vm1, %v9576_v0 }
  0x33   :  { %108 = vst.msk [vmem:[#allocation3 + $0xc0] sm:$0xff] %vm42_vm0, %v9576_v0  ;;  %110 = vst.msk [vmem:[#allocation3 + $0xd0] sm:$0xff] %vm42_vm0, %v9576_v0 }
  0x34   :  { %109 = vst.msk [vmem:[#allocation3 + $0xc8] sm:$0x3] %vm44_vm1, %v9576_v0  ;;  %111 = vst.msk [vmem:[#allocation3 + $0xd8] sm:$0x3] %vm44_vm1, %v9576_v0 }
  0x35   :  { %112 = vst.msk [vmem:[#allocation3 + $0xe0] sm:$0xff] %vm42_vm0, %v9576_v0  ;;  %114 = vst.msk [vmem:[#allocation3 + $0xf0] sm:$0xff] %vm42_vm0, %v9576_v0 }
  0x36   :  { %113 = vst.msk [vmem:[#allocation3 + $0xe8] sm:$0x3] %vm44_vm1, %v9576_v0  ;;  %115 = vst.msk [vmem:[#allocation3 + $0xf8] sm:$0x3] %vm44_vm1, %v9576_v0 }
  0x37   :  { %116 = vst.msk [vmem:[#allocation3 + $0x100] sm:$0xff] %vm42_vm0, %v9576_v0  ;;  %118 = vst.msk [vmem:[#allocation3 + $0x110] sm:$0xff] %vm42_vm0, %v9576_v0 }
  0x38   :  { %117 = vst.msk [vmem:[#allocation3 + $0x108] sm:$0x3] %vm44_vm1, %v9576_v0  ;;  %119 = vst.msk [vmem:[#allocation3 + $0x118] sm:$0x3] %vm44_vm1, %v9576_v0 }
  0x39   :  { %120 = vst.msk [vmem:[#allocation3 + $0x120] sm:$0xff] %vm42_vm0, %v9576_v0  ;;  %122 = vst.msk [vmem:[#allocation3 + $0x130] sm:$0xff] %vm42_vm0, %v9576_v0 }
  0x3a   :  { %121 = vst.msk [vmem:[#allocation3 + $0x128] sm:$0x3] %vm44_vm1, %v9576_v0  ;;  %123 = vst.msk [vmem:[#allocation3 + $0x138] sm:$0x3] %vm44_vm1, %v9576_v0 }
  0x3b   :  { %141 = vst.msk [vmem:[#allocation2 + $0x11] sm:$0xff] %vm42_vm0, %v124_v14  ;;  %142 = vst.msk [vmem:[#allocation2 + $0x21] sm:$0xff] %vm42_vm0, %v125_v15  ;;  %v1753_v14 = vld [vmem:[#allocation4 + $0xe8] sm:$0xff] }
  0x3c   :  { %143 = vst.msk [vmem:[#allocation2 + $0x31] sm:$0xff] %vm42_vm0, %v126_v18  ;;  %144 = vst.msk [vmem:[#allocation2 + $0x41] sm:$0xff] %vm42_vm0, %v127_v19 }
  0x3d   :  { %145 = vst.msk [vmem:[#allocation2 + $0x51] sm:$0xff] %vm42_vm0, %v128_v20  ;;  %146 = vst.msk [vmem:[#allocation2 + $0x61] sm:$0xff] %vm42_vm0, %v129_v21  ;;  %v9978_v21 = vpack.c.bf16 %v1753_v14, %v1752_v13  ;;  %v1520_v13 = vld [vmem:[#allocation2 + $0x130] sm:$0xff] }
  0x3e   :  { %147 = vst.msk [vmem:[#allocation2 + $0x71] sm:$0xff] %vm42_vm0, %v130_v22  ;;  %148 = vst.msk [vmem:[#allocation2 + $0x81] sm:$0xff] %vm42_vm0, %v131_v24  ;;  %v9982_v22 = vpack.c.bf16 %v832_v17, %v831_v16  ;;  %v1984_v14 = vld [vmem:[#allocation4 + $0x110] sm:$0xff]  ;;  %v1985_v16 = vld [vmem:[#allocation4 + $0x118] sm:$0xff] }
  0x3f   :  { %149 = vst.msk [vmem:[#allocation2 + $0xb1] sm:$0xff] %vm42_vm0, %v132_v25  ;;  %150 = vst.msk [vmem:[#allocation2 + $0xc1] sm:$0xff] %vm42_vm0, %v133_v26  ;;  %v9004_v17 = vpack.c.bf16 %v1985_v16, %v1984_v14 }
  0x40   :  { %151 = vst.msk [vmem:[#allocation2 + $0xd1] sm:$0xff] %vm42_vm0, %v134_v29  ;;  %152 = vst.msk [vmem:[#allocation2 + $0xe1] sm:$0xff] %vm42_vm0, %v135_v30  ;;  %v165_v29 = vld [vmem:[#allocation2 + $0xa0] sm:$0xff] }
  0x41   :  { %153 = vst.msk [vmem:[#allocation2 + $0xf1] sm:$0xff] %vm42_vm0, %v136_v31  ;;  %154 = vst.msk [vmem:[#allocation2 + $0x101] sm:$0xff] %vm42_vm0, %v137_v34 }
  0x42   :  { %v1044_v36 = vld [vmem:[#allocation2 + $0x11] sm:$0xff]  ;;  %v9855_v37 = vld [vmem:[#allocation2 + $0x21] sm:$0xff]  ;;  %155 = vst.msk [vmem:[#allocation2 + $0x111] sm:$0xff] %vm42_vm0, %v138_v35  ;;  %156 = vst.msk [vmem:[#allocation2 + $0x121] sm:$0xff] %vm42_vm0, %v139_v40 }
  0x43   :  { %8176 = vmatprep.mubr.msk.f32.mxu0 %vm42_vm0, %v1044_v36  ;;  %8049 = vmatmul.mubr.msk.f32.vlgmr.msra.gmra.mrb[0].mxu1 %vm42_vm0, %v1044_v36  ;;  %v9863_v41 = vld [vmem:[#allocation2 + $0x31] sm:$0xff]  ;;  %v9872_v44 = vld [vmem:[#allocation2 + $0x41] sm:$0xff] }
  0x44   :  { %8177 = vmatmul.mubr.msk.f32.vlgmr.msra.gmra.mrb[0].mxu0 %vm42_vm0, %v9855_v37  ;;  %8051 = vmatprep.mubr.msk.f32.mxu1 %vm42_vm0, %v9855_v37  ;;  %v9874_v45 = vld [vmem:[#allocation2 + $0x51] sm:$0xff]  ;;  %v9884_v49 = vld [vmem:[#allocation2 + $0x61] sm:$0xff] }
  0x45   :  { %8979 = vmatpush3.bf16.msra.mxu0 %v8976_v23  ;;  %8179 = vmatprep.mubr.msk.f32.mxu0 %vm42_vm0, %v9863_v41  ;;  %v9888_v51 = vld [vmem:[#allocation2 + $0x71] sm:$0xff]  ;;  %v9898_v52 = vld [vmem:[#allocation2 + $0x81] sm:$0xff] }
  0x46   :  { %8981 = vmatprep.subr.bf16.mxu0 %v8980_v38  ;;  %8947 = vmatpush3.bf16.msra.mxu1 %v8944_v39  ;;  %v1052_v54 = vld [vmem:[#allocation2 + $0xb1] sm:$0xff]  ;;  %v9907_v55 = vld [vmem:[#allocation2 + $0xc1] sm:$0xff] }
  0x47   :  { %8052 = vmatmul.mubr.msk.f32.gmra.mrb[2].mxu1 %vm42_vm0, %v9863_v41  ;;  %8949 = vmatprep.subr.bf16.mxu1 %v8948_v46  ;;  %v9909_v56 = vld [vmem:[#allocation2 + $0xd1] sm:$0xff]  ;;  %v9918_v60 = vld [vmem:[#allocation2 + $0xe1] sm:$0xff] }
  0x48   :  { %8180 = vmatmul.mubr.msk.f32.gmra.mrb[2].mxu0 %vm42_vm0, %v9872_v44  ;;  %8054 = vmatprep.mubr.msk.f32.mxu1 %vm42_vm0, %v9872_v44  ;;  %v9920_v61 = vld [vmem:[#allocation2 + $0xf1] sm:$0xff]  ;;  %v9930_v62 = vld [vmem:[#allocation2 + $0x101] sm:$0xff] }
  0x49   :  { %8182 = vmatprep.mubr.msk.f32.mxu0 %vm42_vm0, %v9874_v45  ;;  %8983 = vmatpush3.bf16.msra.mxu0 %v8980_v38  ;;  %v9932_v63 = vld [vmem:[#allocation2 + $0x111] sm:$0xff]  ;;  %v9942_v0 = vld [vmem:[#allocation2 + $0x121] sm:$0xff] }
  0x4a   :  { %8985 = vmatprep.subr.bf16.mxu0 %v9886_v50  ;;  %8951 = vmatpush3.bf16.msra.mxu1 %v8948_v46  ;;  %v9944_v2 = vld [vmem:[#allocation2 + $0x12] sm:$0xff]  ;;  %v9955_v8 = vld [vmem:[#allocation2 + $0x22] sm:$0xff] }
  0x4b   :  { %8055 = vmatmul.mubr.msk.f32.gmra.mrb[4].mxu1 %vm42_vm0, %v9874_v45  ;;  %8953 = vmatprep.subr.bf16.mxu1 %v8952_v59  ;;  %v9951_v5 = vld [vmem:[#allocation2 + $0x10] sm:$0xff]  ;;  %v9957_v9 = vld [vmem:[#allocation2 + $0x20] sm:$0xff] }
  0x4c   :  { %8183 = vmatmul.mubr.msk.f32.gmra.mrb[4].mxu0 %vm42_vm0, %v9884_v49  ;;  %8057 = vmatprep.mubr.msk.f32.mxu1 %vm42_vm0, %v9884_v49  ;;  %v9959_v10 = vld [vmem:[#allocation2 + $0x32] sm:$0xff]  ;;  %v9972_v18 = vld [vmem:[#allocation2 + $0x42] sm:$0xff] }
  0x4d   :  { %8185 = vmatprep.mubr.msk.f32.mxu0 %vm42_vm0, %v9888_v51  ;;  %v9967_v15 = vld [vmem:[#allocation2 + $0x30] sm:$0xff]  ;;  %v9974_v19 = vld [vmem:[#allocation2 + $0x40] sm:$0xff] }
  0x4e   :  { %v9976_v20 = vld [vmem:[#allocation2 + $0x52] sm:$0xff]  ;;  %v9992_v24 = vld [vmem:[#allocation2 + $0x62] sm:$0xff] }
  0x4f   :  { %8058 = vmatmul.mubr.msk.f32.gmra.mrb[6].mxu1 %vm42_vm0, %v9888_v51  ;;  %v9988_v23 = vld [vmem:[#allocation2 + $0x50] sm:$0xff]  ;;  %v9994_v25 = vld [vmem:[#allocation2 + $0x60] sm:$0xff] }
  0x50   :  { %8186 = vmatmul.mubr.msk.f32.gmra.mrb[6].mxu0 %vm42_vm0, %v9898_v52  ;;  %8060 = vmatprep.mubr.msk.f32.mxu1 %vm42_vm0, %v185_v53  ;;  %v9996_v26 = vld [vmem:[#allocation2 + $0x72] sm:$0xff]  ;;  %v10010_v28 = vld [vmem:[#allocation2 + $0x82] sm:$0xff] }
  0x51   :  { %8188 = vmatprep.mubr.msk.f32.mxu0 %vm42_vm0, %v1052_v54  ;;  %v10006_v27 = vld [vmem:[#allocation2 + $0x70] sm:$0xff]  ;;  %v10023_v32 = vld [vmem:[#allocation2 + $0xc2] sm:$0xff] }
  0x52   :  { %v10012_v30 = vld [vmem:[#allocation2 + $0xb2] sm:$0xff]  ;;  %v10025_v33 = vld [vmem:[#allocation2 + $0xc0] sm:$0xff] }
  0x53   :  { %8061 = vmatmul.mubr.msk.f32.gmra.mrb[8].mxu1 %vm42_vm0, %v1052_v54  ;;  %v10019_v31 = vld [vmem:[#allocation2 + $0xb0] sm:$0xff]  ;;  %v10039_v36 = vld [vmem:[#allocation2 + $0xe2] sm:$0xff]  ;;  %v1755_v54 = vld [vmem:[#allocation4 + $0xf8] sm:$0xff] }
  0x54   :  { %8189 = vmatmul.mubr.msk.f32.gmra.mrb[8].mxu0 %vm42_vm0, %v9907_v55  ;;  %8063 = vmatprep.mubr.msk.f32.mxu1 %vm42_vm0, %v9907_v55  ;;  %v10027_v34 = vld [vmem:[#allocation2 + $0xd2] sm:$0xff]  ;;  %v10041_v38 = vld [vmem:[#allocation2 + $0xe0] sm:$0xff] }
  0x55   :  { %8191 = vmatprep.mubr.msk.f32.mxu0 %vm42_vm0, %v9909_v56  ;;  %v10035_v35 = vld [vmem:[#allocation2 + $0xd0] sm:$0xff]  ;;  %v10055_v42 = vld [vmem:[#allocation2 + $0x102] sm:$0xff] }
  0x56   :  { %v10043_v39 = vld [vmem:[#allocation2 + $0xf2] sm:$0xff]  ;;  %v10057_v43 = vld [vmem:[#allocation2 + $0x100] sm:$0xff] }
  0x57   :  { %8064 = vmatmul.mubr.msk.f32.gmra.mrb[10].mxu1 %vm42_vm0, %v9909_v56  ;;  %v10051_v40 = vld [vmem:[#allocation2 + $0xf0] sm:$0xff]  ;;  %v10071_v48 = vld [vmem:[#allocation2 + $0x122] sm:$0xff] }
  0x58   :  { %8192 = vmatmul.mubr.msk.f32.gmra.mrb[10].mxu0 %vm42_vm0, %v9918_v60  ;;  %8066 = vmatprep.mubr.msk.f32.mxu1 %vm42_vm0, %v9918_v60  ;;  %v10059_v46 = vld [vmem:[#allocation2 + $0x112] sm:$0xff] }
  0x59   :  { %8194 = vmatprep.mubr.msk.f32.mxu0 %vm42_vm0, %v9920_v61  ;;  %v10067_v47 = vld [vmem:[#allocation2 + $0x110] sm:$0xff] }
  0x5a   :  { %v1754_v53 = vld [vmem:[#allocation4 + $0xf0] sm:$0xff] }
  0x5b   :  { %8067 = vmatmul.mubr.msk.f32.gmra.mrb[12].mxu1 %vm42_vm0, %v9920_v61 }
  0x5c   :  { %8195 = vmatmul.mubr.msk.f32.gmra.mrb[12].mxu0 %vm42_vm0, %v9930_v62  ;;  %8069 = vmatprep.mubr.msk.f32.mxu1 %vm42_vm0, %v9930_v62 }
  0x5d   :  { %8197 = vmatprep.mubr.msk.f32.mxu0 %vm42_vm0, %v9932_v63 }
  0x5f   :  { %8070 = vmatmul.mubr.msk.f32.gmra.mrb[14].mxu1 %vm42_vm0, %v9932_v63 }
  0x60   :  { %8198 = vmatmul.mubr.msk.f32.gmra.mrb[14].mxu0 %vm42_vm0, %v9942_v0  ;;  %8080 = vmatprep.mubr.msk.f32.mxu1 %vm42_vm0, %v157_v1  ;;  %v8964_v1 = vpack.c.bf16 %v834_v58, %v833_v57 }
  0x61   :  { %8208 = vmatprep.mubr.msk.f32.mxu0 %vm42_vm0, %v9944_v2 }
  0x63   :  { %8081 = vmatmul.mubr.msk.f32.vlgmr.msra.gmra.mrb[0].mxu1 %vm42_vm0, %v9951_v5 }
  0x64   :  { %8209 = vmatmul.mubr.msk.f32.vlgmr.msra.gmra.mrb[0].mxu0 %vm42_vm0, %v9955_v8  ;;  %8083 = vmatprep.mubr.msk.f32.mxu1 %vm42_vm0, %v9957_v9 }
  0x65   :  { %8987 = vmatpush3.bf16.msra.mxu0 %v9886_v50  ;;  %8211 = vmatprep.mubr.msk.f32.mxu0 %vm42_vm0, %v9959_v10  ;;  %v584_v50 = vld [vmem:[#allocation2 + $0x2] sm:$0xff] }
  0x66   :  { %8989 = vmatprep.subr.bf16.mxu0 %v8988_v11  ;;  %8955 = vmatpush3.bf16.msra.mxu1 %v8952_v59  ;;  %v8996_v59 = vpack.c.bf16 %v1755_v54, %v1754_v53 }
  0x67   :  { %8084 = vmatmul.mubr.msk.f32.gmra.mrb[2].mxu1 %vm42_vm0, %v9967_v15  ;;  %8957 = vmatprep.subr.bf16.mxu1 %v8956_v12 }
  0x68   :  { %8212 = vmatmul.mubr.msk.f32.gmra.mrb[2].mxu0 %vm42_vm0, %v9972_v18  ;;  %8086 = vmatprep.mubr.msk.f32.mxu1 %vm42_vm0, %v9974_v19 }
  0x69   :  { %8214 = vmatprep.mubr.msk.f32.mxu0 %vm42_vm0, %v9976_v20  ;;  %8991 = vmatpush3.bf16.msra.mxu0 %v8988_v11  ;;  %v592_v11 = vld [vmem:[#allocation2 + $0xa2] sm:$0xff] }
  0x6a   :  { %8959 = vmatpush3.bf16.msra.mxu1 %v8956_v12  ;;  %8993 = vmatprep.subr.bf16.mxu0 %v9978_v21  ;;  %v1519_v12 = vld [vmem:[#allocation2 + $0x120] sm:$0xff] }
  0x6b   :  { %8087 = vmatmul.mubr.msk.f32.gmra.mrb[4].mxu1 %vm42_vm0, %v9988_v23  ;;  %8961 = vmatprep.subr.bf16.mxu1 %v9982_v22 }
  0x6c   :  { %8215 = vmatmul.mubr.msk.f32.gmra.mrb[4].mxu0 %vm42_vm0, %v9992_v24  ;;  %8089 = vmatprep.mubr.msk.f32.mxu1 %vm42_vm0, %v9994_v25 }
  0x6d   :  { %8217 = vmatprep.mubr.msk.f32.mxu0 %vm42_vm0, %v9996_v26 }
  0x6f   :  { %8090 = vmatmul.mubr.msk.f32.gmra.mrb[6].mxu1 %vm42_vm0, %v10006_v27 }
  0x70   :  { %8218 = vmatmul.mubr.msk.f32.gmra.mrb[6].mxu0 %vm42_vm0, %v10010_v28  ;;  %8092 = vmatprep.mubr.msk.f32.mxu1 %vm42_vm0, %v165_v29 }
  0x71   :  { %8220 = vmatprep.mubr.msk.f32.mxu0 %vm42_vm0, %v10012_v30 }
  0x73   :  { %8093 = vmatmul.mubr.msk.f32.gmra.mrb[8].mxu1 %vm42_vm0, %v10019_v31 }
  0x74   :  { %8221 = vmatmul.mubr.msk.f32.gmra.mrb[8].mxu0 %vm42_vm0, %v10023_v32  ;;  %8095 = vmatprep.mubr.msk.f32.mxu1 %vm42_vm0, %v10025_v33 }
  0x75   :  { %8223 = vmatprep.mubr.msk.f32.mxu0 %vm42_vm0, %v10027_v34 }
  0x77   :  { %8096 = vmatmul.mubr.msk.f32.gmra.mrb[10].mxu1 %vm42_vm0, %v10035_v35 }
  0x78   :  { %8224 = vmatmul.mubr.msk.f32.gmra.mrb[10].mxu0 %vm42_vm0, %v10039_v36  ;;  %8098 = vmatprep.mubr.msk.f32.mxu1 %vm42_vm0, %v10041_v38 }
  0x79   :  { %8226 = vmatprep.mubr.msk.f32.mxu0 %vm42_vm0, %v10043_v39 }
  0x7b   :  { %8099 = vmatmul.mubr.msk.f32.gmra.mrb[12].mxu1 %vm42_vm0, %v10051_v40 }
  0x7c   :  { %8227 = vmatmul.mubr.msk.f32.gmra.mrb[12].mxu0 %vm42_vm0, %v10055_v42  ;;  %8101 = vmatprep.mubr.msk.f32.mxu1 %vm42_vm0, %v10057_v43 }
  0x7d   :  { %8229 = vmatprep.mubr.msk.f32.mxu0 %vm42_vm0, %v10059_v46 }
  0x7f   :  { %8102 = vmatmul.mubr.msk.f32.gmra.mrb[14].mxu1 %vm42_vm0, %v10067_v47 }
  0x80   :  { %8230 = vmatmul.mubr.msk.f32.gmra.mrb[14].mxu0 %vm42_vm0, %v10071_v48  ;;  %8112 = vmatprep.mubr.msk.f32.mxu1 %vm42_vm0, %v584_v50 }
  0x81   :  { %8240 = vmatprep.mubr.msk.f32.mxu0 %vm42_vm0, %v9957_v9 }
  0x83   :  { %8113 = vmatmul.mubr.msk.f32.vlgmr.msra.gmra.mrb[0].mxu1 %vm42_vm0, %v9944_v2  ;;  %v1511_v2 = vld [vmem:[#allocation2 + $0x80] sm:$0xff] }
  0x84   :  { %8241 = vmatmul.mubr.msk.f32.vlgmr.msra.gmra.mrb[0].mxu0 %vm42_vm0, %v9967_v15  ;;  %8115 = vmatprep.mubr.msk.f32.mxu1 %vm42_vm0, %v9955_v8 }
  0x85   :  { %8995 = vmatpush3.bf16.msra.mxu0 %v9978_v21  ;;  %8243 = vmatprep.mubr.msk.f32.mxu0 %vm42_vm0, %v9974_v19 }
  0x86   :  { %8997 = vmatprep.subr.bf16.mxu0 %v8996_v59  ;;  %8963 = vmatpush3.bf16.msra.mxu1 %v9982_v22 }
  0x87   :  { %8116 = vmatmul.mubr.msk.f32.gmra.mrb[2].mxu1 %vm42_vm0, %v9959_v10  ;;  %8965 = vmatprep.subr.bf16.mxu1 %v8964_v1 }
  0x88   :  { %8244 = vmatmul.mubr.msk.f32.gmra.mrb[2].mxu0 %vm42_vm0, %v9988_v23  ;;  %8118 = vmatprep.mubr.msk.f32.mxu1 %vm42_vm0, %v9972_v18 }
  0x89   :  { %8246 = vmatprep.mubr.msk.f32.mxu0 %vm42_vm0, %v9994_v25  ;;  %8999 = vmatpush3.bf16.msra.mxu0 %v8996_v59 }
  0x8a   :  { %8967 = vmatpush3.bf16.msra.mxu1 %v8964_v1  ;;  %9001 = vmatprep.subr.bf16.mxu0 %v9000_v6 }
  0x8b   :  { %8119 = vmatmul.mubr.msk.f32.gmra.mrb[4].mxu1 %vm42_vm0, %v9976_v20 }
  0x8c   :  { %8247 = vmatmul.mubr.msk.f32.gmra.mrb[4].mxu0 %vm42_vm0, %v10006_v27  ;;  %8121 = vmatprep.mubr.msk.f32.mxu1 %vm42_vm0, %v9992_v24 }
  0x8d   :  { %8249 = vmatprep.mubr.msk.f32.mxu0 %vm42_vm0, %v1511_v2 }
  0x8f   :  { %8122 = vmatmul.mubr.msk.f32.gmra.mrb[6].mxu1 %vm42_vm0, %v9996_v26 }
  0x90   :  { %8250 = vmatmul.mubr.msk.f32.gmra.mrb[6].mxu0 %vm42_vm0, %v1512_v7  ;;  %8124 = vmatprep.mubr.msk.f32.mxu1 %vm42_vm0, %v592_v11 }
  0x91   :  { %8252 = vmatprep.mubr.msk.f32.mxu0 %vm42_vm0, %v10025_v33 }
  0x93   :  { %8125 = vmatmul.mubr.msk.f32.gmra.mrb[8].mxu1 %vm42_vm0, %v10012_v30  ;;  %v10250_v30 = vld [vmem:[%s11401_s2] ss:$0 sm:$0xff] }
  0x94   :  { %8253 = vmatmul.mubr.msk.f32.gmra.mrb[8].mxu0 %vm42_vm0, %v10035_v35  ;;  %8127 = vmatprep.mubr.msk.f32.mxu1 %vm42_vm0, %v10023_v32 }
  0x95   :  { %8255 = vmatprep.mubr.msk.f32.mxu0 %vm42_vm0, %v10041_v38 }
  0x97   :  { %8128 = vmatmul.mubr.msk.f32.gmra.mrb[10].mxu1 %vm42_vm0, %v10027_v34 }
  0x98   :  { %8256 = vmatmul.mubr.msk.f32.gmra.mrb[10].mxu0 %vm42_vm0, %v10051_v40  ;;  %8130 = vmatprep.mubr.msk.f32.mxu1 %vm42_vm0, %v10039_v36 }
  0x99   :  { %8258 = vmatprep.mubr.msk.f32.mxu0 %vm42_vm0, %v10057_v43 }
  0x9b   :  { %8131 = vmatmul.mubr.msk.f32.gmra.mrb[12].mxu1 %vm42_vm0, %v10043_v39 }
  0x9c   :  { %8259 = vmatmul.mubr.msk.f32.gmra.mrb[12].mxu0 %vm42_vm0, %v10067_v47  ;;  %8133 = vmatprep.mubr.msk.f32.mxu1 %vm42_vm0, %v10055_v42 }
  0x9d   :  { %8261 = vmatprep.mubr.msk.f32.mxu0 %vm42_vm0, %v1519_v12 }
  0x9f   :  { %8134 = vmatmul.mubr.msk.f32.gmra.mrb[14].mxu1 %vm42_vm0, %v10059_v46 }
  0xa0   :  { %8262 = vmatmul.mubr.msk.f32.gmra.mrb[14].mxu0 %vm42_vm0, %v1520_v13  ;;  %8144 = vmatprep.mubr.msk.f32.mxu1 %vm42_vm0, %v9951_v5 }
  0xa1   :  { %8272 = vmatprep.mubr.msk.f32.mxu0 %vm42_vm0, %v9855_v37  ;;  %v1742_v37 = vld [vmem:[#allocation2 + $0x91] sm:$0xff] }
  0xa3   :  { %8145 = vmatmul.mubr.msk.f32.vlgmr.msra.gmra.mrb[0].mxu1 %vm42_vm0, %v9957_v9 }
  0xa4   :  { %8273 = vmatmul.mubr.msk.f32.vlgmr.msra.gmra.mrb[0].mxu0 %vm42_vm0, %v9863_v41  ;;  %8147 = vmatprep.mubr.msk.f32.mxu1 %vm42_vm0, %v9967_v15  ;;  %v1750_v41 = vld [vmem:[#allocation2 + $0x131] sm:$0xff] }
  0xa5   :  { %9003 = vmatpush3.bf16.msra.mxu0 %v9000_v6  ;;  %8275 = vmatprep.mubr.msk.f32.mxu0 %vm42_vm0, %v9872_v44  ;;  %v1972_v44 = vld [vmem:[#allocation2 + $0x92] sm:$0xff] }
  0xa6   :  { %9005 = vmatprep.subr.bf16.mxu0 %v9004_v17 }
  0xa7   :  { %8148 = vmatmul.mubr.msk.f32.gmra.mrb[2].mxu1 %vm42_vm0, %v9974_v19 }
  0xa8   :  { %8276 = vmatmul.mubr.msk.f32.gmra.mrb[2].mxu0 %vm42_vm0, %v9874_v45  ;;  %8150 = vmatprep.mubr.msk.f32.mxu1 %vm42_vm0, %v9988_v23  ;;  %v1980_v45 = vld [vmem:[#allocation2 + $0x132] sm:$0xff] }
  0xa9   :  { %8278 = vmatprep.mubr.msk.f32.mxu0 %vm42_vm0, %v9884_v49  ;;  %9007 = vmatpush3.bf16.msra.mxu0 %v9004_v17  ;;  %v2344_v49 = vld [vmem:[#allocation4 + $0x140] sm:$0xff] }
  0xab   :  { %8151 = vmatmul.mubr.msk.f32.gmra.mrb[4].mxu1 %vm42_vm0, %v9994_v25 }
  0xac   :  { %8279 = vmatmul.mubr.msk.f32.gmra.mrb[4].mxu0 %vm42_vm0, %v9888_v51  ;;  %8153 = vmatprep.mubr.msk.f32.mxu1 %vm42_vm0, %v10006_v27  ;;  %v2345_v51 = vld [vmem:[#allocation4 + $0x148] sm:$0xff] }
  0xad   :  { %8281 = vmatprep.mubr.msk.f32.mxu0 %vm42_vm0, %v9898_v52  ;;  %v9008_v52 = vpack.c.bf16 %v2345_v51, %v2344_v49  ;;  %v2325_v49 = vld [vmem:[#allocation4 + $0x130] sm:$0xff]  ;;  %v2326_v51 = vld [vmem:[#allocation4 + $0x138] sm:$0xff] }
  0xaf   :  { %8154 = vmatmul.mubr.msk.f32.gmra.mrb[6].mxu1 %vm42_vm0, %v1511_v2  ;;  %9009 = vmatprep.subr.bf16.mxu1 %v9008_v52 }
  0xb0   :  { %8282 = vmatmul.mubr.msk.f32.gmra.mrb[6].mxu0 %vm42_vm0, %v1742_v37  ;;  %8156 = vmatprep.mubr.msk.f32.mxu1 %vm42_vm0, %v10019_v31 }
  0xb1   :  { %8284 = vmatprep.mubr.msk.f32.mxu0 %vm42_vm0, %v9907_v55  ;;  %9011 = vmatpush3.bf16.msra.mxu1 %v9008_v52  ;;  %v2346_v55 = vld [vmem:[#allocation4 + $0x150] sm:$0xff] }
  0xb3   :  { %8157 = vmatmul.mubr.msk.f32.gmra.mrb[8].mxu1 %vm42_vm0, %v10025_v33  ;;  %v10255_v33 = vld [vmem:[%s11402_s3] ss:$0 sm:$0xff] }
  0xb4   :  { %8285 = vmatmul.mubr.msk.f32.gmra.mrb[8].mxu0 %vm42_vm0, %v9909_v56  ;;  %8159 = vmatprep.mubr.msk.f32.mxu1 %vm42_vm0, %v10035_v35  ;;  %v2347_v56 = vld [vmem:[#allocation4 + $0x158] sm:$0xff] }
  0xb5   :  { %8287 = vmatprep.mubr.msk.f32.mxu0 %vm42_vm0, %v9918_v60  ;;  %v9012_v60 = vpack.c.bf16 %v2347_v56, %v2346_v55 }
  0xb7   :  { %8160 = vmatmul.mubr.msk.f32.gmra.mrb[10].mxu1 %vm42_vm0, %v10041_v38  ;;  %9013 = vmatprep.subr.bf16.mxu1 %v9012_v60 }
  0xb8   :  { %8288 = vmatmul.mubr.msk.f32.gmra.mrb[10].mxu0 %vm42_vm0, %v9920_v61  ;;  %8162 = vmatprep.mubr.msk.f32.mxu1 %vm42_vm0, %v10051_v40  ;;  %v2327_v61 = vld [vmem:[#allocation3 + $0x1] sm:$0xff] }
  0xb9   :  { %8290 = vmatprep.mubr.msk.f32.mxu0 %vm42_vm0, %v9930_v62  ;;  %9015 = vmatpush3.bf16.msra.mxu1 %v9012_v60  ;;  %v2323_v62 = vld [vmem:[#allocation4 + $0x120] sm:$0xff] }
  0xbb   :  { %8163 = vmatmul.mubr.msk.f32.gmra.mrb[12].mxu1 %vm42_vm0, %v10057_v43 }
  0xbc   :  { %8291 = vmatmul.mubr.msk.f32.gmra.mrb[12].mxu0 %vm42_vm0, %v9932_v63  ;;  %8165 = vmatprep.mubr.msk.f32.mxu1 %vm42_vm0, %v10067_v47  ;;  %v2324_v63 = vld [vmem:[#allocation4 + $0x128] sm:$0xff] }
  0xbd   :  { %8293 = vmatprep.mubr.msk.f32.mxu0 %vm42_vm0, %v9942_v0  ;;  %v10228_v0 = vpack.c.bf16 %v2324_v63, %v2323_v62 }
  0xbf   :  { %8166 = vmatmul.mubr.msk.f32.gmra.mrb[14].mxu1 %vm42_vm0, %v1519_v12  ;;  %9017 = vmatprep.subr.bf16.mxu1 %v10228_v0 }
  0xc0   :  { %8294 = vmatmul.mubr.msk.f32.gmra.mrb[14].mxu0 %vm42_vm0, %v1750_v41  ;;  %8336 = vmatprep.mubr.msk.f32.mxu1 %vm42_vm0, %v2327_v61 }
  0xc1   :  { %8304 = vmatprep.mubr.msk.f32.mxu0 %vm42_vm0, %v9955_v8 }
  0xc4   :  { %8305 = vmatmul.mubr.msk.f32.vlgmr.msra.gmra.mrb[0].mxu0 %vm42_vm0, %v9959_v10 }
  0xc5   :  { %8307 = vmatprep.mubr.msk.f32.mxu0 %vm42_vm0, %v9972_v18 }
  0xc8   :  { %8308 = vmatmul.mubr.msk.f32.gmra.mrb[2].mxu0 %vm42_vm0, %v9976_v20 }
  0xc9   :  { %8310 = vmatprep.mubr.msk.f32.mxu0 %vm42_vm0, %v9992_v24 }
  0xcc   :  { %8311 = vmatmul.mubr.msk.f32.gmra.mrb[4].mxu0 %vm42_vm0, %v9996_v26 }
  0xcd   :  { %8313 = vmatprep.mubr.msk.f32.mxu0 %vm42_vm0, %v10010_v28 }
  0xd0   :  { %8314 = vmatmul.mubr.msk.f32.gmra.mrb[6].mxu0 %vm42_vm0, %v1972_v44 }
  0xd1   :  { %8316 = vmatprep.mubr.msk.f32.mxu0 %vm42_vm0, %v10023_v32 }
  0xd4   :  { %8317 = vmatmul.mubr.msk.f32.gmra.mrb[8].mxu0 %vm42_vm0, %v10027_v34 }
  0xd5   :  { %8319 = vmatprep.mubr.msk.f32.mxu0 %vm42_vm0, %v10039_v36 }
  0xd8   :  { %8320 = vmatmul.mubr.msk.f32.gmra.mrb[10].mxu0 %vm42_vm0, %v10043_v39 }
  0xd9   :  { %8322 = vmatprep.mubr.msk.f32.mxu0 %vm42_vm0, %v10055_v42 }
  0xdc   :  { %8323 = vmatmul.mubr.msk.f32.gmra.mrb[12].mxu0 %vm42_vm0, %v10059_v46 }
  0xdd   :  { %8325 = vmatprep.mubr.msk.f32.mxu0 %vm42_vm0, %v10071_v48 }
  0xe0   :  { %8326 = vmatmul.mubr.msk.f32.gmra.mrb[14].mxu0 %vm42_vm0, %v1980_v45 }
 0x176   :  { %v8146_v5 = vpop.f32.mrb[0].mxu1 }
 0x177   :  { %v949_v8 = vpop.f32.mrb[1].mxu1 }
 0x17a   :  { %v8149_v9 = vpop.f32.mrb[2].mxu1 }
 0x17b   :  { %v959_v10 = vpop.f32.mrb[3].mxu1 }
 0x17e   :  { %v8152_v15 = vpop.f32.mrb[4].mxu1 }
 0x17f   :  { %v969_v18 = vpop.f32.mrb[5].mxu1 }
 0x182   :  { %v8155_v19 = vpop.f32.mrb[6].mxu1 }
 0x183   :  { %v979_v20 = vpop.f32.mrb[7].mxu1 }
 0x186   :  { %v10231_v21 = vpop.f32.mrb[8].mxu1 }
 0x187   :  { %v10233_v22 = vpop.f32.mrb[9].mxu1 }
 0x18a   :  { %v10235_v23 = vpop.f32.mrb[10].mxu1 }
 0x18b   :  { %v10237_v24 = vpop.f32.mrb[11].mxu1 }
 0x18e   :  { %v10239_v25 = vpop.f32.mrb[12].mxu1 }
 0x18f   :  { %v10241_v26 = vpop.f32.mrb[13].mxu1 }
 0x192   :  { %v10243_v27 = vpop.f32.mrb[14].mxu1 }
 0x193   :  { %v10245_v28 = vpop.f32.mrb[15].mxu1 }
 0x197   :  { %v8306_v29 = vpop.f32.mrb[0].mxu0 }
 0x198   :  { %v9160_v31 = vadd.f32 %v8306_v29, %v8146_v5  ;;  %v2100_v32 = vpop.f32.mrb[1].mxu0  ;;  %v2752_v29 = vld [vmem:[#allocation4 + $0x168] sm:$0xff] }
 0x199   :  { %v9161_v34 = vadd.f32 %v2100_v32, %v949_v8 }
 0x19a   :  { %v2203_v35 = vmul.f32 %v9160_v31, %v10250_v30 }
 0x19b   :  { %v2202_v36 = vmul.f32 %v9161_v34, %v10250_v30  ;;  %v8309_v38 = vpop.f32.mrb[2].mxu0 }
 0x19c   :  { %v2226_v39 = vadd.f32 %v10255_v33, %v2203_v35  ;;  %v9162_v40 = vadd.f32 %v8309_v38, %v8149_v9  ;;  %v2110_v42 = vpop.f32.mrb[3].mxu0  ;;  %v9020_v9 = vpack.c.bf16 %v2326_v51, %v2325_v49 }
 0x19d   :  { %v2225_v43 = vadd.f32 %v10255_v33, %v2202_v36  ;;  %v9163_v46 = vadd.f32 %v2110_v42, %v959_v10 }
 0x19e   :  { %vm2242_vm2 = vcmp.gt.f32.partialorder %v2226_v39, 0.0  ;;  %v2258_v47 = vmul.f32 0.01, %v2226_v39  ;;  %v2205_v48 = vmul.f32 %v9162_v40, %v10250_v30 }
 0x19f   :  { %vm2241_vm3 = vcmp.gt.f32.partialorder %v2225_v43, 0.0  ;;  %v2257_v50 = vmul.f32 0.01, %v2225_v43  ;;  %v2204_v53 = vmul.f32 %v9163_v46, %v10250_v30  ;;  %v8312_v54 = vpop.f32.mrb[4].mxu0 }
 0x1a0   :  { %v2274_v57 = vsel %vm2242_vm2, %v2226_v39, %v2258_v47  ;;  %v2228_v58 = vadd.f32 %v10255_v33, %v2205_v48  ;;  %v9164_v59 = vadd.f32 %v8312_v54, %v8152_v15  ;;  %v2120_v1 = vpop.f32.mrb[5].mxu0 }
 0x1a1   :  { %2291 = vst.msk [vmem:[#allocation3 + $0x21] sm:$0xff] %vm42_vm0, %v2274_v57  ;;  %v2273_v3 = vsel %vm2241_vm3, %v2225_v43, %v2257_v50  ;;  %v2227_v4 = vadd.f32 %v10255_v33, %v2204_v53  ;;  %v9165_v6 = vadd.f32 %v2120_v1, %v969_v18 }
 0x1a2   :  { %2290 = vst.msk [vmem:[#allocation3 + $0x11] sm:$0xff] %vm42_vm0, %v2273_v3  ;;  %vm2244_vm4 = vcmp.gt.f32.partialorder %v2228_v58, 0.0  ;;  %v2260_v2 = vmul.f32 0.01, %v2228_v58  ;;  %v2207_v7 = vmul.f32 %v9164_v59, %v10250_v30 }
 0x1a3   :  { %vm2243_vm5 = vcmp.gt.f32.partialorder %v2227_v4, 0.0  ;;  %v2259_v11 = vmul.f32 0.01, %v2227_v4  ;;  %v2206_v12 = vmul.f32 %v9165_v6, %v10250_v30  ;;  %v8315_v13 = vpop.f32.mrb[6].mxu0 }
 0x1a4   :  { %v2276_v14 = vsel %vm2244_vm4, %v2228_v58, %v2260_v2  ;;  %v2230_v16 = vadd.f32 %v10255_v33, %v2207_v7  ;;  %v9166_v17 = vadd.f32 %v8315_v13, %v8155_v19  ;;  %v2130_v37 = vpop.f32.mrb[7].mxu0 }
 0x1a5   :  { %2293 = vst.msk [vmem:[#allocation3 + $0x41] sm:$0xff] %vm42_vm0, %v2276_v14  ;;  %v2275_v41 = vsel %vm2243_vm5, %v2227_v4, %v2259_v11  ;;  %v2229_v44 = vadd.f32 %v10255_v33, %v2206_v12  ;;  %v9167_v45 = vadd.f32 %v2130_v37, %v979_v20  ;;  %v2751_v20 = vld [vmem:[#allocation4 + $0x160] sm:$0xff] }
 0x1a6   :  { %2292 = vst.msk [vmem:[#allocation3 + $0x31] sm:$0xff] %vm42_vm0, %v2275_v41  ;;  %vm2246_vm6 = vcmp.gt.f32.partialorder %v2230_v16, 0.0  ;;  %v2262_v52 = vmul.f32 0.01, %v2230_v16  ;;  %v2209_v55 = vmul.f32 %v9166_v17, %v10250_v30  ;;  %v10294_v42 = vpack.c.bf16 %v2752_v29, %v2751_v20  ;;  %v2335_v41 = vld [vmem:[#allocation3 + $0xa1] sm:$0xff] }
 0x1a7   :  { %vm2245_vm7 = vcmp.gt.f32.partialorder %v2229_v44, 0.0  ;;  %v2261_v56 = vmul.f32 0.01, %v2229_v44  ;;  %v2208_v60 = vmul.f32 %v9167_v45, %v10250_v30  ;;  %v8318_v61 = vpop.f32.mrb[8].mxu0  ;;  %v2306_v29 = vld [vmem:[#allocation3] sm:$0xff] }
 0x1a8   :  { %v2278_v62 = vsel %vm2246_vm6, %v2230_v16, %v2262_v52  ;;  %v2232_v63 = vadd.f32 %v10255_v33, %v2209_v55  ;;  %v9168_v5 = vadd.f32 %v8318_v61, %v10231_v21  ;;  %v2140_v8 = vpop.f32.mrb[9].mxu0  ;;  %v10286_v21 = vld [vmem:[#allocation3 + $0x21] sm:$0xff] }
 0x1a9   :  { %2295 = vst.msk [vmem:[#allocation3 + $0x61] sm:$0xff] %vm42_vm0, %v2278_v62  ;;  %v2277_v10 = vsel %vm2245_vm7, %v2229_v44, %v2261_v56  ;;  %v2231_v15 = vadd.f32 %v10255_v33, %v2208_v60  ;;  %v9169_v18 = vadd.f32 %v2140_v8, %v10233_v22  ;;  %v10280_v19 = vld [vmem:[#allocation3 + $0x11] sm:$0xff] }
 0x1aa   :  { %2294 = vst.msk [vmem:[#allocation3 + $0x51] sm:$0xff] %vm42_vm0, %v2277_v10  ;;  %vm2248_vm8 = vcmp.gt.f32.partialorder %v2232_v63, 0.0  ;;  %v2264_v31 = vmul.f32 0.01, %v2232_v63  ;;  %v2211_v32 = vmul.f32 %v9168_v5, %v10250_v30  ;;  %8337 = vmatmul.mubr.msk.f32.vlgmr.msra.gmra.mrb[16].mxu1 %vm42_vm0, %v10280_v19 }
 0x1ab   :  { %vm2247_vm9 = vcmp.gt.f32.partialorder %v2231_v15, 0.0  ;;  %v2263_v34 = vmul.f32 0.01, %v2231_v15  ;;  %v2210_v35 = vmul.f32 %v9169_v18, %v10250_v30  ;;  %v8321_v22 = vpop.f32.mrb[10].mxu0  ;;  %8339 = vmatprep.mubr.msk.f32.mxu1 %vm42_vm0, %v10286_v21  ;;  %9019 = vmatpush3.bf16.msra.mxu1 %v10228_v0 }
 0x1ac   :  { %v2280_v36 = vsel %vm2248_vm8, %v2232_v63, %v2264_v31  ;;  %v2234_v38 = vadd.f32 %v10255_v33, %v2211_v32  ;;  %v9170_v39 = vadd.f32 %v8321_v22, %v10235_v23  ;;  %v2150_v40 = vpop.f32.mrb[11].mxu0  ;;  %9021 = vmatprep.subr.bf16.mxu1 %v9020_v9  ;;  %v10305_v23 = vld [vmem:[#allocation3 + $0x41] sm:$0xff]  ;;  %v2753_v32 = vld [vmem:[#allocation4 + $0x170] sm:$0xff] }
 0x1ad   :  { %2297 = vst.msk [vmem:[#allocation3 + $0x81] sm:$0xff] %vm42_vm0, %v2280_v36  ;;  %v2279_v43 = vsel %vm2247_vm9, %v2231_v15, %v2263_v34  ;;  %v2233_v46 = vadd.f32 %v10255_v33, %v2210_v35  ;;  %v9171_v47 = vadd.f32 %v2150_v40, %v10237_v24  ;;  %v10299_v48 = vld [vmem:[#allocation3 + $0x31] sm:$0xff]  ;;  %v2981_v36 = vld [vmem:[#allocation4 + $0x180] sm:$0xff] }
 0x1ae   :  { %2296 = vst.msk [vmem:[#allocation3 + $0x71] sm:$0xff] %vm42_vm0, %v2279_v43  ;;  %vm2250_vm10 = vcmp.gt.f32.partialorder %v2234_v38, 0.0  ;;  %v2266_v0 = vmul.f32 0.01, %v2234_v38  ;;  %v2213_v50 = vmul.f32 %v9170_v39, %v10250_v30  ;;  %8340 = vmatmul.mubr.msk.f32.gmra.mrb[18].mxu1 %vm42_vm0, %v10299_v48  ;;  %v2754_v34 = vld [vmem:[#allocation4 + $0x178] sm:$0xff]  ;;  %v10375_v22 = vld [vmem:[#allocation3 + $0x10] sm:$0xff] }
 0x1af   :  { %vm2249_vm11 = vcmp.gt.f32.partialorder %v2233_v46, 0.0  ;;  %v2265_v53 = vmul.f32 0.01, %v2233_v46  ;;  %v2212_v54 = vmul.f32 %v9171_v47, %v10250_v30  ;;  %v8324_v57 = vpop.f32.mrb[12].mxu0  ;;  %8342 = vmatprep.mubr.msk.f32.mxu1 %vm42_vm0, %v10305_v23  ;;  %9023 = vmatpush3.bf16.msra.mxu1 %v9020_v9  ;;  %v9028_v35 = vpack.c.bf16 %v2754_v34, %v2753_v32  ;;  %v10379_v39 = vld [vmem:[#allocation3 + $0x20] sm:$0xff]  ;;  %v10384_v43 = vld [vmem:[#allocation3 + $0x30] sm:$0xff] }
 0x1b0   :  { %v2282_v24 = vsel %vm2250_vm10, %v2234_v38, %v2266_v0  ;;  %v2236_v58 = vadd.f32 %v10255_v33, %v2213_v50  ;;  %v9172_v59 = vadd.f32 %v8324_v57, %v10239_v25  ;;  %v2160_v1 = vpop.f32.mrb[13].mxu0  ;;  %9025 = vmatprep.subr.bf16.mxu1 %v10294_v42  ;;  %v10322_v25 = vld [vmem:[#allocation3 + $0x61] sm:$0xff]  ;;  %v3443_v34 = vld [vmem:[#allocation4 + $0x1d0] sm:$0xff] }
 0x1b1   :  { %2299 = vst.msk [vmem:[#allocation3 + $0xc1] sm:$0xff] %vm42_vm0, %v2282_v24  ;;  %v2281_v3 = vsel %vm2249_vm11, %v2233_v46, %v2265_v53  ;;  %v2235_v4 = vadd.f32 %v10255_v33, %v2212_v54  ;;  %v9173_v6 = vadd.f32 %v2160_v1, %v10241_v26  ;;  %v10316_v2 = vld [vmem:[#allocation3 + $0x51] sm:$0xff]  ;;  %v2982_v38 = vld [vmem:[#allocation4 + $0x188] sm:$0xff]  ;;  %v10388_v46 = vld [vmem:[#allocation3 + $0x40] sm:$0xff] }
 0x1b2   :  { %2298 = vst.msk [vmem:[#allocation3 + $0xb1] sm:$0xff] %vm42_vm0, %v2281_v3  ;;  %vm2252_vm12 = vcmp.gt.f32.partialorder %v2236_v58, 0.0  ;;  %v2268_v7 = vmul.f32 0.01, %v2236_v58  ;;  %v2215_v11 = vmul.f32 %v9172_v59, %v10250_v30  ;;  %8343 = vmatmul.mubr.msk.f32.gmra.mrb[20].mxu1 %vm42_vm0, %v10316_v2  ;;  %v9032_v40 = vpack.c.bf16 %v2982_v38, %v2981_v36  ;;  %v10392_v47 = vld [vmem:[#allocation3 + $0x50] sm:$0xff]  ;;  %v2314_v0 = vld [vmem:[#allocation3 + $0xa0] sm:$0xff] }
 0x1b3   :  { %vm2251_vm13 = vcmp.gt.f32.partialorder %v2235_v4, 0.0  ;;  %v2267_v12 = vmul.f32 0.01, %v2235_v4  ;;  %v2214_v13 = vmul.f32 %v9173_v6, %v10250_v30  ;;  %v8327_v14 = vpop.f32.mrb[14].mxu0  ;;  %8345 = vmatprep.mubr.msk.f32.mxu1 %vm42_vm0, %v10322_v25  ;;  %v2734_v1 = vld [vmem:[#allocation3 + $0x2] sm:$0xff]  ;;  %v2984_v6 = vld [vmem:[#allocation4 + $0x198] sm:$0xff] }
 0x1b4   :  { %v2284_v26 = vsel %vm2252_vm12, %v2236_v58, %v2268_v7  ;;  %v2238_v16 = vadd.f32 %v10255_v33, %v2215_v11  ;;  %v9174_v17 = vadd.f32 %v8327_v14, %v10243_v27  ;;  %v2170_v37 = vpop.f32.mrb[15].mxu0  ;;  %v10434_v11 = vld [vmem:[#allocation3 + $0x12] sm:$0xff]  ;;  %v10438_v14 = vld [vmem:[#allocation3 + $0x22] sm:$0xff] }
 0x1b5   :  { %2301 = vst.msk [vmem:[#allocation3 + $0xe1] sm:$0xff] %vm42_vm0, %v2284_v26  ;;  %v2283_v44 = vsel %vm2251_vm13, %v2235_v4, %v2267_v12  ;;  %v2237_v45 = vadd.f32 %v10255_v33, %v2214_v13  ;;  %v9175_v49 = vadd.f32 %v2170_v37, %v10245_v28  ;;  %v10332_v51 = vld [vmem:[#allocation3 + $0x71] sm:$0xff]  ;;  %v3211_v12 = vld [vmem:[#allocation4 + $0x1a0] sm:$0xff]  ;;  %v3212_v13 = vld [vmem:[#allocation4 + $0x1a8] sm:$0xff] }
 0x1b6   :  { %2300 = vst.msk [vmem:[#allocation3 + $0xd1] sm:$0xff] %vm42_vm0, %v2283_v44  ;;  %vm2254_vm14 = vcmp.gt.f32.partialorder %v2238_v16, 0.0  ;;  %v2270_v52 = vmul.f32 0.01, %v2238_v16  ;;  %v2217_v55 = vmul.f32 %v9174_v17, %v10250_v30  ;;  %8346 = vmatmul.mubr.msk.f32.gmra.mrb[22].mxu1 %vm42_vm0, %v10332_v51  ;;  %v10400_v50 = vld [vmem:[#allocation3 + $0x70] sm:$0xff]  ;;  %v9040_v26 = vpack.c.bf16 %v3212_v13, %v3211_v12  ;;  %v10446_v17 = vld [vmem:[#allocation3 + $0x42] sm:$0xff] }
 0x1b7   :  { %vm2253_vm15 = vcmp.gt.f32.partialorder %v2237_v45, 0.0  ;;  %v2269_v27 = vmul.f32 0.01, %v2237_v45  ;;  %v2216_v56 = vmul.f32 %v9175_v49, %v10250_v30  ;;  %8348 = vmatprep.mubr.msk.f32.mxu1 %vm42_vm0, %v2335_v41  ;;  %v2983_v4 = vld [vmem:[#allocation4 + $0x190] sm:$0xff]  ;;  %v10454_v41 = vld [vmem:[#allocation3 + $0x62] sm:$0xff] }
 0x1b8   :  { %v2286_v60 = vsel %vm2254_vm14, %v2238_v16, %v2270_v52  ;;  %v2240_v28 = vadd.f32 %v10255_v33, %v2217_v55  ;;  %v10348_v30 = vld [vmem:[#allocation3 + $0xc1] sm:$0xff]  ;;  %v9036_v7 = vpack.c.bf16 %v2984_v6, %v2983_v4  ;;  %v10442_v16 = vld [vmem:[#allocation3 + $0x32] sm:$0xff] }
 0x1b9   :  { %2303 = vst.msk [vmem:[#allocation3 + $0x101] sm:$0xff] %vm42_vm0, %v2286_v60  ;;  %v2285_v61 = vsel %vm2253_vm15, %v2237_v45, %v2269_v27  ;;  %v2239_v62 = vadd.f32 %v10255_v33, %v2216_v56  ;;  %v10343_v63 = vld [vmem:[#allocation3 + $0xb1] sm:$0xff]  ;;  %v10409_v54 = vld [vmem:[#allocation3 + $0xc0] sm:$0xff]  ;;  %v3673_v38 = vld [vmem:[#allocation4 + $0x1e8] sm:$0xff] }
 0x1ba   :  { %2302 = vst.msk [vmem:[#allocation3 + $0xf1] sm:$0xff] %vm42_vm0, %v2285_v61  ;;  %vm2256_vm1 = vcmp.gt.f32.partialorder %v2240_v28, 0.0  ;;  %v2272_v5 = vmul.f32 0.01, %v2240_v28  ;;  %8349 = vmatmul.mubr.msk.f32.gmra.mrb[24].mxu1 %vm42_vm0, %v10343_v63  ;;  %v10405_v53 = vld [vmem:[#allocation3 + $0xb0] sm:$0xff]  ;;  %v2742_v44 = vld [vmem:[#allocation3 + $0xa2] sm:$0xff] }
 0x1bb   :  { %vm2255_vm2 = vcmp.gt.f32.partialorder %v2239_v62, 0.0  ;;  %v2271_v8 = vmul.f32 0.01, %v2239_v62  ;;  %8351 = vmatprep.mubr.msk.f32.mxu1 %vm42_vm0, %v10348_v30  ;;  %v10450_v37 = vld [vmem:[#allocation3 + $0x52] sm:$0xff]  ;;  %v10467_v52 = vld [vmem:[#allocation3 + $0xc2] sm:$0xff] }
 0x1bc   :  { %v2288_v9 = vsel %vm2256_vm1, %v2240_v28, %v2272_v5  ;;  %v10358_v15 = vld [vmem:[#allocation3 + $0xe1] sm:$0xff]  ;;  %v10458_v45 = vld [vmem:[#allocation3 + $0x72] sm:$0xff] }
 0x1bd   :  { %2305 = vst.msk [vmem:[#allocation3 + $0x121] sm:$0xff] %vm42_vm0, %v2288_v9  ;;  %v2287_v33 = vsel %vm2255_vm2, %v2239_v62, %v2271_v8  ;;  %v10353_v10 = vld [vmem:[#allocation3 + $0xd1] sm:$0xff]  ;;  %v10417_v24 = vld [vmem:[#allocation3 + $0xe0] sm:$0xff]  ;;  %v3442_v9 = vld [vmem:[#allocation4 + $0x1c8] sm:$0xff] }
 0x1be   :  { %2304 = vst.msk [vmem:[#allocation3 + $0x111] sm:$0xff] %vm42_vm0, %v2287_v33  ;;  %8352 = vmatmul.mubr.msk.f32.gmra.mrb[26].mxu1 %vm42_vm0, %v10353_v10  ;;  %v10413_v57 = vld [vmem:[#allocation3 + $0xd0] sm:$0xff]  ;;  %v10475_v27 = vld [vmem:[#allocation3 + $0xe2] sm:$0xff]  ;;  %v3214_v62 = vld [vmem:[#allocation4 + $0x1b8] sm:$0xff] }
 0x1bf   :  { %8354 = vmatprep.mubr.msk.f32.mxu1 %vm42_vm0, %v10358_v15  ;;  %v10463_v49 = vld [vmem:[#allocation3 + $0xb2] sm:$0xff]  ;;  %v3441_v8 = vld [vmem:[#allocation4 + $0x1c0] sm:$0xff]  ;;  %v4496_v4 = vld [vmem:[#allocation4 + $0x268] sm:$0xff] }
 0x1c0   :  { %v10366_v20 = vld [vmem:[#allocation3 + $0x101] sm:$0xff]  ;;  %v10471_v55 = vld [vmem:[#allocation3 + $0xd2] sm:$0xff]  ;;  %v9048_v33 = vpack.c.bf16 %v3442_v9, %v3441_v8 }
 0x1c1   :  { %v10362_v18 = vld [vmem:[#allocation3 + $0xf1] sm:$0xff]  ;;  %v10425_v59 = vld [vmem:[#allocation3 + $0x100] sm:$0xff]  ;;  %v3903_v13 = vld [vmem:[#allocation4 + $0x208] sm:$0xff] }
 0x1c2   :  { %8355 = vmatmul.mubr.msk.f32.gmra.mrb[28].mxu1 %vm42_vm0, %v10362_v18  ;;  %v10421_v58 = vld [vmem:[#allocation3 + $0xf0] sm:$0xff]  ;;  %v10483_v60 = vld [vmem:[#allocation3 + $0x102] sm:$0xff] }
 0x1c3   :  { %8357 = vmatprep.mubr.msk.f32.mxu1 %vm42_vm0, %v10366_v20  ;;  %v10479_v56 = vld [vmem:[#allocation3 + $0xf2] sm:$0xff]  ;;  %v3672_v36 = vld [vmem:[#allocation4 + $0x1e0] sm:$0xff]  ;;  %v4133_v8 = vld [vmem:[#allocation4 + $0x228] sm:$0xff] }
 0x1c4   :  { %v3213_v61 = vld [vmem:[#allocation4 + $0x1b0] sm:$0xff]  ;;  %v10523_v32 = vld [vmem:[#allocation3 + $0x120] sm:$0xff] }
 0x1c5   :  { %v10370_v31 = vld [vmem:[#allocation3 + $0x111] sm:$0xff]  ;;  %v9044_v5 = vpack.c.bf16 %v3214_v62, %v3213_v61  ;;  %v3902_v12 = vld [vmem:[#allocation4 + $0x200] sm:$0xff] }
 0x1c6   :  { %8358 = vmatmul.mubr.msk.f32.gmra.mrb[30].mxu1 %vm42_vm0, %v10370_v31  ;;  %v10429_v3 = vld [vmem:[#allocation3 + $0x110] sm:$0xff]  ;;  %v3905_v61 = vld [vmem:[#allocation4 + $0x218] sm:$0xff] }
 0x1c7   :  { %8368 = vmatprep.mubr.msk.f32.mxu1 %vm42_vm0, %v2306_v29  ;;  %v10487_v28 = vld [vmem:[#allocation3 + $0x112] sm:$0xff]  ;;  %v10505_v29 = vld [vmem:[#allocation3 + $0x80] sm:$0xff] }
 0x1ca   :  { %8369 = vmatmul.mubr.msk.f32.vlgmr.msra.gmra.mrb[16].mxu1 %vm42_vm0, %v10375_v22 }
 0x1cb   :  { %8371 = vmatprep.mubr.msk.f32.mxu1 %vm42_vm0, %v10379_v39  ;;  %9027 = vmatpush3.bf16.msra.mxu1 %v10294_v42  ;;  %v10396_v42 = vld [vmem:[#allocation3 + $0x60] sm:$0xff] }
 0x1cc   :  { %9029 = vmatprep.subr.bf16.mxu1 %v9028_v35 }
 0x1ce   :  { %8372 = vmatmul.mubr.msk.f32.gmra.mrb[18].mxu1 %vm42_vm0, %v10384_v43 }
 0x1cf   :  { %8374 = vmatprep.mubr.msk.f32.mxu1 %vm42_vm0, %v10388_v46  ;;  %9031 = vmatpush3.bf16.msra.mxu1 %v9028_v35  ;;  %v3444_v35 = vld [vmem:[#allocation4 + $0x1d8] sm:$0xff] }
 0x1d0   :  { %9033 = vmatprep.subr.bf16.mxu1 %v9032_v40 }
 0x1d2   :  { %8375 = vmatmul.mubr.msk.f32.gmra.mrb[20].mxu1 %vm42_vm0, %v10392_v47 }
 0x1d3   :  { %8377 = vmatprep.mubr.msk.f32.mxu1 %vm42_vm0, %v10396_v42 }
 0x1d6   :  { %8378 = vmatmul.mubr.msk.f32.gmra.mrb[22].mxu1 %vm42_vm0, %v10400_v50 }
 0x1d7   :  { %8380 = vmatprep.mubr.msk.f32.mxu1 %vm42_vm0, %v2314_v0  ;;  %v10559_v0 = vld [vmem:[#allocation3 + $0x121] sm:$0xff] }
 0x1da   :  { %8381 = vmatmul.mubr.msk.f32.gmra.mrb[24].mxu1 %vm42_vm0, %v10405_v53 }
 0x1db   :  { %8383 = vmatprep.mubr.msk.f32.mxu1 %vm42_vm0, %v10409_v54 }
 0x1de   :  { %8384 = vmatmul.mubr.msk.f32.gmra.mrb[26].mxu1 %vm42_vm0, %v10413_v57 }
 0x1df   :  { %8386 = vmatprep.mubr.msk.f32.mxu1 %vm42_vm0, %v10417_v24 }
 0x1e2   :  { %8387 = vmatmul.mubr.msk.f32.gmra.mrb[28].mxu1 %vm42_vm0, %v10421_v58 }
 0x1e3   :  { %8389 = vmatprep.mubr.msk.f32.mxu1 %vm42_vm0, %v10425_v59 }
 0x1e6   :  { %8390 = vmatmul.mubr.msk.f32.gmra.mrb[30].mxu1 %vm42_vm0, %v10429_v3 }
 0x1e7   :  { %8400 = vmatprep.mubr.msk.f32.mxu1 %vm42_vm0, %v2734_v1  ;;  %v4495_v1 = vld [vmem:[#allocation4 + $0x260] sm:$0xff] }
 0x1e8   :  { %v9080_v6 = vpack.c.bf16 %v4496_v4, %v4495_v1 }
 0x1ea   :  { %8401 = vmatmul.mubr.msk.f32.vlgmr.msra.gmra.mrb[16].mxu1 %vm42_vm0, %v10434_v11  ;;  %9081 = vmatprep.subr.bf16.mxu0 %v9080_v6 }
 0x1eb   :  { %8403 = vmatprep.mubr.msk.f32.mxu1 %vm42_vm0, %v10438_v14  ;;  %9035 = vmatpush3.bf16.msra.mxu1 %v9032_v40  ;;  %v9056_v40 = vpack.c.bf16 %v3673_v38, %v3672_v36 }
 0x1ec   :  { %9037 = vmatprep.subr.bf16.mxu1 %v9036_v7  ;;  %9083 = vmatpush3.bf16.msra.mxu0 %v9080_v6 }
 0x1ee   :  { %8404 = vmatmul.mubr.msk.f32.gmra.mrb[18].mxu1 %vm42_vm0, %v10442_v16 }
 0x1ef   :  { %8406 = vmatprep.mubr.msk.f32.mxu1 %vm42_vm0, %v10446_v17  ;;  %9039 = vmatpush3.bf16.msra.mxu1 %v9036_v7 }
 0x1f0   :  { %9041 = vmatprep.subr.bf16.mxu1 %v9040_v26 }
 0x1f2   :  { %8407 = vmatmul.mubr.msk.f32.gmra.mrb[20].mxu1 %vm42_vm0, %v10450_v37 }
 0x1f3   :  { %8409 = vmatprep.mubr.msk.f32.mxu1 %vm42_vm0, %v10454_v41 }
 0x1f6   :  { %8410 = vmatmul.mubr.msk.f32.gmra.mrb[22].mxu1 %vm42_vm0, %v10458_v45 }
 0x1f7   :  { %8412 = vmatprep.mubr.msk.f32.mxu1 %vm42_vm0, %v2742_v44  ;;  %v10595_v44 = vld [vmem:[#allocation3 + $0x122] sm:$0xff] }
 0x1fa   :  { %8413 = vmatmul.mubr.msk.f32.gmra.mrb[24].mxu1 %vm42_vm0, %v10463_v49 }
 0x1fb   :  { %8415 = vmatprep.mubr.msk.f32.mxu1 %vm42_vm0, %v10467_v52 }
 0x1fe   :  { %8416 = vmatmul.mubr.msk.f32.gmra.mrb[26].mxu1 %vm42_vm0, %v10471_v55 }
 0x1ff   :  { %8418 = vmatprep.mubr.msk.f32.mxu1 %vm42_vm0, %v10475_v27 }
 0x202   :  { %8419 = vmatmul.mubr.msk.f32.gmra.mrb[28].mxu1 %vm42_vm0, %v10479_v56 }
 0x203   :  { %8421 = vmatprep.mubr.msk.f32.mxu1 %vm42_vm0, %v10483_v60 }
 0x206   :  { %8422 = vmatmul.mubr.msk.f32.gmra.mrb[30].mxu1 %vm42_vm0, %v10487_v28 }
 0x207   :  { %8432 = vmatprep.mubr.msk.f32.mxu1 %vm42_vm0, %v10375_v22  ;;  %v9052_v22 = vpack.c.bf16 %v3444_v35, %v3443_v34 }
 0x20a   :  { %8433 = vmatmul.mubr.msk.f32.vlgmr.msra.gmra.mrb[16].mxu1 %vm42_vm0, %v10379_v39 }
 0x20b   :  { %8435 = vmatprep.mubr.msk.f32.mxu1 %vm42_vm0, %v10384_v43  ;;  %9043 = vmatpush3.bf16.msra.mxu1 %v9040_v26  ;;  %v9064_v26 = vpack.c.bf16 %v3903_v13, %v3902_v12 }
 0x20c   :  { %9045 = vmatprep.subr.bf16.mxu1 %v9044_v5 }
 0x20e   :  { %8436 = vmatmul.mubr.msk.f32.gmra.mrb[18].mxu1 %vm42_vm0, %v10388_v46 }
 0x20f   :  { %8438 = vmatprep.mubr.msk.f32.mxu1 %vm42_vm0, %v10392_v47  ;;  %9047 = vmatpush3.bf16.msra.mxu1 %v9044_v5  ;;  %v4132_v5 = vld [vmem:[#allocation4 + $0x220] sm:$0xff] }
 0x210   :  { %9049 = vmatprep.subr.bf16.mxu1 %v9048_v33  ;;  %v9072_v9 = vpack.c.bf16 %v4133_v8, %v4132_v5 }
 0x212   :  { %8439 = vmatmul.mubr.msk.f32.gmra.mrb[20].mxu1 %vm42_vm0, %v10396_v42 }
 0x213   :  { %8441 = vmatprep.mubr.msk.f32.mxu1 %vm42_vm0, %v10400_v50 }
 0x216   :  { %8442 = vmatmul.mubr.msk.f32.gmra.mrb[22].mxu1 %vm42_vm0, %v10505_v29 }
 0x217   :  { %8444 = vmatprep.mubr.msk.f32.mxu1 %vm42_vm0, %v10405_v53  ;;  %v3675_v53 = vld [vmem:[#allocation4 + $0x1f8] sm:$0xff] }
 0x21a   :  { %8445 = vmatmul.mubr.msk.f32.gmra.mrb[24].mxu1 %vm42_vm0, %v10409_v54 }
 0x21b   :  { %8447 = vmatprep.mubr.msk.f32.mxu1 %vm42_vm0, %v10413_v57 }
 0x21e   :  { %8448 = vmatmul.mubr.msk.f32.gmra.mrb[26].mxu1 %vm42_vm0, %v10417_v24 }
 0x21f   :  { %8450 = vmatprep.mubr.msk.f32.mxu1 %vm42_vm0, %v10421_v58 }
 0x222   :  { %8451 = vmatmul.mubr.msk.f32.gmra.mrb[28].mxu1 %vm42_vm0, %v10425_v59 }
 0x223   :  { %8453 = vmatprep.mubr.msk.f32.mxu1 %vm42_vm0, %v10429_v3 }
 0x226   :  { %8454 = vmatmul.mubr.msk.f32.gmra.mrb[30].mxu1 %vm42_vm0, %v10523_v32 }
 0x227   :  { %8464 = vmatprep.mubr.msk.f32.mxu1 %vm42_vm0, %v10280_v19  ;;  %v10541_v19 = vld [vmem:[#allocation3 + $0x81] sm:$0xff] }
 0x22a   :  { %8465 = vmatmul.mubr.msk.f32.vlgmr.msra.gmra.mrb[16].mxu1 %vm42_vm0, %v10286_v21 }
 0x22b   :  { %8467 = vmatprep.mubr.msk.f32.mxu1 %vm42_vm0, %v10299_v48  ;;  %9051 = vmatpush3.bf16.msra.mxu1 %v9048_v33 }
 0x22c   :  { %9053 = vmatprep.subr.bf16.mxu1 %v9052_v22 }
 0x22e   :  { %8468 = vmatmul.mubr.msk.f32.gmra.mrb[18].mxu1 %vm42_vm0, %v10305_v23 }
 0x22f   :  { %8470 = vmatprep.mubr.msk.f32.mxu1 %vm42_vm0, %v10316_v2  ;;  %9055 = vmatpush3.bf16.msra.mxu1 %v9052_v22 }
 0x230   :  { %9057 = vmatprep.subr.bf16.mxu1 %v9056_v40 }
 0x232   :  { %8471 = vmatmul.mubr.msk.f32.gmra.mrb[20].mxu1 %vm42_vm0, %v10322_v25 }
 0x233   :  { %8473 = vmatprep.mubr.msk.f32.mxu1 %vm42_vm0, %v10332_v51 }
 0x236   :  { %8474 = vmatmul.mubr.msk.f32.gmra.mrb[22].mxu1 %vm42_vm0, %v10541_v19 }
 0x237   :  { %8476 = vmatprep.mubr.msk.f32.mxu1 %vm42_vm0, %v10343_v63  ;;  %v3674_v63 = vld [vmem:[#allocation4 + $0x1f0] sm:$0xff] }
 0x238   :  { %v9060_v7 = vpack.c.bf16 %v3675_v53, %v3674_v63 }
 0x23a   :  { %8477 = vmatmul.mubr.msk.f32.gmra.mrb[24].mxu1 %vm42_vm0, %v10348_v30 }
 0x23b   :  { %8479 = vmatprep.mubr.msk.f32.mxu1 %vm42_vm0, %v10353_v10 }
 0x23e   :  { %8480 = vmatmul.mubr.msk.f32.gmra.mrb[26].mxu1 %vm42_vm0, %v10358_v15 }
 0x23f   :  { %8482 = vmatprep.mubr.msk.f32.mxu1 %vm42_vm0, %v10362_v18 }
 0x242   :  { %8483 = vmatmul.mubr.msk.f32.gmra.mrb[28].mxu1 %vm42_vm0, %v10366_v20 }
 0x243   :  { %8485 = vmatprep.mubr.msk.f32.mxu1 %vm42_vm0, %v10370_v31 }
 0x246   :  { %8486 = vmatmul.mubr.msk.f32.gmra.mrb[30].mxu1 %vm42_vm0, %v10559_v0 }
 0x247   :  { %8496 = vmatprep.mubr.msk.f32.mxu1 %vm42_vm0, %v10434_v11  ;;  %v10577_v11 = vld [vmem:[#allocation3 + $0x82] sm:$0xff] }
 0x24a   :  { %8497 = vmatmul.mubr.msk.f32.vlgmr.msra.gmra.mrb[16].mxu1 %vm42_vm0, %v10438_v14 }
 0x24b   :  { %8499 = vmatprep.mubr.msk.f32.mxu1 %vm42_vm0, %v10442_v16  ;;  %9059 = vmatpush3.bf16.msra.mxu1 %v9056_v40 }
 0x24c   :  { %9061 = vmatprep.subr.bf16.mxu1 %v9060_v7 }
 0x24e   :  { %8500 = vmatmul.mubr.msk.f32.gmra.mrb[18].mxu1 %vm42_vm0, %v10446_v17 }
 0x24f   :  { %8502 = vmatprep.mubr.msk.f32.mxu1 %vm42_vm0, %v10450_v37  ;;  %9063 = vmatpush3.bf16.msra.mxu1 %v9060_v7 }
 0x250   :  { %9065 = vmatprep.subr.bf16.mxu1 %v9064_v26 }
 0x252   :  { %8503 = vmatmul.mubr.msk.f32.gmra.mrb[20].mxu1 %vm42_vm0, %v10454_v41 }
 0x253   :  { %8505 = vmatprep.mubr.msk.f32.mxu1 %vm42_vm0, %v10458_v45 }
 0x256   :  { %8506 = vmatmul.mubr.msk.f32.gmra.mrb[22].mxu1 %vm42_vm0, %v10577_v11 }
 0x257   :  { %8508 = vmatprep.mubr.msk.f32.mxu1 %vm42_vm0, %v10463_v49  ;;  %v3904_v49 = vld [vmem:[#allocation4 + $0x210] sm:$0xff] }
 0x258   :  { %v9068_v62 = vpack.c.bf16 %v3905_v61, %v3904_v49  ;;  %v4902_v61 = vld [vmem:[#allocation4 + $0x280] sm:$0xff] }
 0x25a   :  { %8509 = vmatmul.mubr.msk.f32.gmra.mrb[24].mxu1 %vm42_vm0, %v10467_v52 }
 0x25b   :  { %8511 = vmatprep.mubr.msk.f32.mxu1 %vm42_vm0, %v10471_v55 }
 0x25e   :  { %8512 = vmatmul.mubr.msk.f32.gmra.mrb[26].mxu1 %vm42_vm0, %v10475_v27 }
 0x25f   :  { %8514 = vmatprep.mubr.msk.f32.mxu1 %vm42_vm0, %v10479_v56 }
 0x262   :  { %8515 = vmatmul.mubr.msk.f32.gmra.mrb[28].mxu1 %vm42_vm0, %v10483_v60 }
 0x263   :  { %8517 = vmatprep.mubr.msk.f32.mxu1 %vm42_vm0, %v10487_v28 }
 0x266   :  { %8518 = vmatmul.mubr.msk.f32.gmra.mrb[30].mxu1 %vm42_vm0, %v10595_v44 }
 0x267   :  { %8528 = vmatprep.mubr.msk.f32.mxu1 %vm42_vm0, %v10379_v39  ;;  %v3662_v39 = vld [vmem:[#allocation3 + $0x90] sm:$0xff] }
 0x26a   :  { %8529 = vmatmul.mubr.msk.f32.vlgmr.msra.gmra.mrb[16].mxu1 %vm42_vm0, %v10384_v43  ;;  %v3670_v43 = vld [vmem:[#allocation3 + $0x130] sm:$0xff] }
 0x26b   :  { %8531 = vmatprep.mubr.msk.f32.mxu1 %vm42_vm0, %v10388_v46  ;;  %9067 = vmatpush3.bf16.msra.mxu1 %v9064_v26  ;;  %v4134_v46 = vld [vmem:[#allocation4 + $0x230] sm:$0xff] }
 0x26c   :  { %9069 = vmatprep.subr.bf16.mxu1 %v9068_v62 }
 0x26e   :  { %8532 = vmatmul.mubr.msk.f32.gmra.mrb[18].mxu1 %vm42_vm0, %v10392_v47  ;;  %v4135_v47 = vld [vmem:[#allocation4 + $0x238] sm:$0xff] }
 0x26f   :  { %8534 = vmatprep.mubr.msk.f32.mxu1 %vm42_vm0, %v10396_v42  ;;  %9071 = vmatpush3.bf16.msra.mxu1 %v9068_v62  ;;  %v9076_v42 = vpack.c.bf16 %v4135_v47, %v4134_v46  ;;  %v4903_v62 = vld [vmem:[#allocation4 + $0x288] sm:$0xff] }
 0x270   :  { %9073 = vmatprep.subr.bf16.mxu1 %v9072_v9 }
 0x272   :  { %8535 = vmatmul.mubr.msk.f32.gmra.mrb[20].mxu1 %vm42_vm0, %v10400_v50 }
 0x273   :  { %8537 = vmatprep.mubr.msk.f32.mxu1 %vm42_vm0, %v10505_v29 }
 0x276   :  { %8538 = vmatmul.mubr.msk.f32.gmra.mrb[22].mxu1 %vm42_vm0, %v3662_v39 }
 0x277   :  { %8540 = vmatprep.mubr.msk.f32.mxu1 %vm42_vm0, %v10409_v54  ;;  %v10701_v54 = vld [vmem:[%s11402_s3 + $0x1] ss:$0 sm:$0xff] }
 0x27a   :  { %8541 = vmatmul.mubr.msk.f32.gmra.mrb[24].mxu1 %vm42_vm0, %v10413_v57 }
 0x27b   :  { %8543 = vmatprep.mubr.msk.f32.mxu1 %vm42_vm0, %v10417_v24 }
 0x27e   :  { %8544 = vmatmul.mubr.msk.f32.gmra.mrb[26].mxu1 %vm42_vm0, %v10421_v58 }
 0x27f   :  { %8546 = vmatprep.mubr.msk.f32.mxu1 %vm42_vm0, %v10425_v59 }
 0x282   :  { %8547 = vmatmul.mubr.msk.f32.gmra.mrb[28].mxu1 %vm42_vm0, %v10429_v3 }
 0x283   :  { %8549 = vmatprep.mubr.msk.f32.mxu1 %vm42_vm0, %v10523_v32 }
 0x286   :  { %8550 = vmatmul.mubr.msk.f32.gmra.mrb[30].mxu1 %vm42_vm0, %v3670_v43 }
 0x287   :  { %8560 = vmatprep.mubr.msk.f32.mxu1 %vm42_vm0, %v10286_v21  ;;  %v3892_v21 = vld [vmem:[#allocation3 + $0x91] sm:$0xff] }
 0x28a   :  { %8561 = vmatmul.mubr.msk.f32.vlgmr.msra.gmra.mrb[16].mxu1 %vm42_vm0, %v10299_v48  ;;  %v3900_v48 = vld [vmem:[#allocation3 + $0x131] sm:$0xff] }
 0x28b   :  { %8563 = vmatprep.mubr.msk.f32.mxu1 %vm42_vm0, %v10305_v23  ;;  %9075 = vmatpush3.bf16.msra.mxu1 %v9072_v9  ;;  %v4122_v23 = vld [vmem:[#allocation3 + $0x92] sm:$0xff] }
 0x28c   :  { %9077 = vmatprep.subr.bf16.mxu1 %v9076_v42 }
 0x28e   :  { %8564 = vmatmul.mubr.msk.f32.gmra.mrb[18].mxu1 %vm42_vm0, %v10316_v2  ;;  %v4130_v2 = vld [vmem:[#allocation3 + $0x132] sm:$0xff] }
 0x28f   :  { %8566 = vmatprep.mubr.msk.f32.mxu1 %vm42_vm0, %v10322_v25  ;;  %9079 = vmatpush3.bf16.msra.mxu1 %v9076_v42  ;;  %v4497_v25 = vld [vmem:[#allocation4 + $0x270] sm:$0xff] }
 0x292   :  { %8567 = vmatmul.mubr.msk.f32.gmra.mrb[20].mxu1 %vm42_vm0, %v10332_v51  ;;  %v4498_v51 = vld [vmem:[#allocation4 + $0x278] sm:$0xff] }
 0x293   :  { %8569 = vmatprep.mubr.msk.f32.mxu1 %vm42_vm0, %v10541_v19  ;;  %v4476_v19 = vld [vmem:[#allocation4 + $0x250] sm:$0xff] }
 0x296   :  { %8570 = vmatmul.mubr.msk.f32.gmra.mrb[22].mxu1 %vm42_vm0, %v3892_v21  ;;  %v10737_v21 = vpack.c.bf16 %v4903_v62, %v4902_v61 }
 0x297   :  { %8572 = vmatprep.mubr.msk.f32.mxu1 %vm42_vm0, %v10348_v30  ;;  %v9084_v30 = vpack.c.bf16 %v4498_v51, %v4497_v25 }
 0x299   :  { %9085 = vmatprep.subr.bf16.mxu0 %v9084_v30 }
 0x29a   :  { %8573 = vmatmul.mubr.msk.f32.gmra.mrb[24].mxu1 %vm42_vm0, %v10353_v10  ;;  %9087 = vmatpush3.bf16.msra.mxu0 %v9084_v30  ;;  %v4478_v10 = vld [vmem:[#allocation2 + $0x1] sm:$0xff] }
 0x29b   :  { %8575 = vmatprep.mubr.msk.f32.mxu1 %vm42_vm0, %v10358_v15  ;;  %8624 = vmatprep.mubr.msk.f32.mxu0 %vm42_vm0, %v4478_v10  ;;  %v4474_v15 = vld [vmem:[#allocation4 + $0x240] sm:$0xff] }
 0x29e   :  { %8576 = vmatmul.mubr.msk.f32.gmra.mrb[26].mxu1 %vm42_vm0, %v10362_v18  ;;  %v4475_v18 = vld [vmem:[#allocation4 + $0x248] sm:$0xff] }
 0x29f   :  { %8578 = vmatprep.mubr.msk.f32.mxu1 %vm42_vm0, %v10366_v20  ;;  %v10690_v20 = vpack.c.bf16 %v4475_v18, %v4474_v15 }
 0x2a1   :  { %9089 = vmatprep.subr.bf16.mxu0 %v10690_v20 }
 0x2a2   :  { %8579 = vmatmul.mubr.msk.f32.gmra.mrb[28].mxu1 %vm42_vm0, %v10370_v31  ;;  %v10696_v31 = vld [vmem:[%s11401_s2 + $0x1] ss:$0 sm:$0xff] }
 0x2a3   :  { %8581 = vmatprep.mubr.msk.f32.mxu1 %vm42_vm0, %v10559_v0  ;;  %v4477_v0 = vld [vmem:[#allocation4 + $0x258] sm:$0xff] }
 0x2a4   :  { %v9092_v13 = vpack.c.bf16 %v4477_v0, %v4476_v19 }
 0x2a6   :  { %8582 = vmatmul.mubr.msk.f32.gmra.mrb[30].mxu1 %vm42_vm0, %v3900_v48 }
 0x2a7   :  { %8592 = vmatprep.mubr.msk.f32.mxu1 %vm42_vm0, %v10438_v14 }
 0x2aa   :  { %8593 = vmatmul.mubr.msk.f32.vlgmr.msra.gmra.mrb[16].mxu1 %vm42_vm0, %v10442_v16 }
 0x2ab   :  { %8595 = vmatprep.mubr.msk.f32.mxu1 %vm42_vm0, %v10446_v17 }
 0x2ae   :  { %8596 = vmatmul.mubr.msk.f32.gmra.mrb[18].mxu1 %vm42_vm0, %v10450_v37 }
 0x2af   :  { %8598 = vmatprep.mubr.msk.f32.mxu1 %vm42_vm0, %v10454_v41 }
 0x2b2   :  { %8599 = vmatmul.mubr.msk.f32.gmra.mrb[20].mxu1 %vm42_vm0, %v10458_v45 }
 0x2b3   :  { %8601 = vmatprep.mubr.msk.f32.mxu1 %vm42_vm0, %v10577_v11 }
 0x2b6   :  { %8602 = vmatmul.mubr.msk.f32.gmra.mrb[22].mxu1 %vm42_vm0, %v4122_v23 }
 0x2b7   :  { %8604 = vmatprep.mubr.msk.f32.mxu1 %vm42_vm0, %v10467_v52 }
 0x2ba   :  { %8605 = vmatmul.mubr.msk.f32.gmra.mrb[24].mxu1 %vm42_vm0, %v10471_v55 }
 0x2bb   :  { %8607 = vmatprep.mubr.msk.f32.mxu1 %vm42_vm0, %v10475_v27 }
 0x2be   :  { %8608 = vmatmul.mubr.msk.f32.gmra.mrb[26].mxu1 %vm42_vm0, %v10479_v56 }
 0x2bf   :  { %8610 = vmatprep.mubr.msk.f32.mxu1 %vm42_vm0, %v10483_v60 }
 0x2c2   :  { %8611 = vmatmul.mubr.msk.f32.gmra.mrb[28].mxu1 %vm42_vm0, %v10487_v28 }
 0x2c3   :  { %8613 = vmatprep.mubr.msk.f32.mxu1 %vm42_vm0, %v10595_v44 }
 0x2c6   :  { %8614 = vmatmul.mubr.msk.f32.gmra.mrb[30].mxu1 %vm42_vm0, %v4130_v2 }
 0x37d   :  { %v8594_v50 = vpop.f32.mrb[16].mxu1 }
 0x37e   :  { %v4354_v57 = vmul.f32 %v8594_v50, %v10696_v31  ;;  %v4250_v24 = vpop.f32.mrb[17].mxu1 }
 0x37f   :  { %v4353_v58 = vmul.f32 %v10696_v31, %v4250_v24 }
 0x380   :  { %v4378_v59 = vadd.f32 %v10701_v54, %v4354_v57 }
 0x381   :  { %v4377_v3 = vadd.f32 %v10701_v54, %v4353_v58  ;;  %v8597_v14 = vpop.f32.mrb[18].mxu1 }
 0x382   :  { %vm4394_vm3 = vcmp.gt.f32.partialorder %v4378_v59, 0.0  ;;  %v4410_v16 = vmul.f32 0.01, %v4378_v59  ;;  %v4356_v17 = vmul.f32 %v8597_v14, %v10696_v31  ;;  %v4260_v37 = vpop.f32.mrb[19].mxu1 }
 0x383   :  { %vm4393_vm4 = vcmp.gt.f32.partialorder %v4377_v3, 0.0  ;;  %v4409_v41 = vmul.f32 0.01, %v4377_v3  ;;  %v4355_v45 = vmul.f32 %v10696_v31, %v4260_v37 }
 0x384   :  { %v4426_v52 = vsel %vm4394_vm3, %v4378_v59, %v4410_v16  ;;  %v4380_v55 = vadd.f32 %v10701_v54, %v4356_v17 }
 0x385   :  { %4442 = vst.msk [vmem:[#allocation2 + $0x21] sm:$0xff] %vm42_vm0, %v4426_v52  ;;  %v4425_v27 = vsel %vm4393_vm4, %v4377_v3, %v4409_v41  ;;  %v4379_v56 = vadd.f32 %v10701_v54, %v4355_v45  ;;  %v8600_v60 = vpop.f32.mrb[20].mxu1 }
 0x386   :  { %4441 = vst.msk [vmem:[#allocation2 + $0x11] sm:$0xff] %vm42_vm0, %v4425_v27  ;;  %vm4396_vm5 = vcmp.gt.f32.partialorder %v4380_v55, 0.0  ;;  %v4412_v28 = vmul.f32 0.01, %v4380_v55  ;;  %v4358_v33 = vmul.f32 %v8600_v60, %v10696_v31  ;;  %v4270_v29 = vpop.f32.mrb[21].mxu1  ;;  %v4486_v27 = vld [vmem:[#allocation2 + $0xa1] sm:$0xff] }
 0x387   :  { %vm4395_vm6 = vcmp.gt.f32.partialorder %v4379_v56, 0.0  ;;  %v4411_v32 = vmul.f32 0.01, %v4379_v56  ;;  %v4357_v34 = vmul.f32 %v10696_v31, %v4270_v29 }
 0x388   :  { %v4428_v35 = vsel %vm4396_vm5, %v4380_v55, %v4412_v28  ;;  %v4382_v22 = vadd.f32 %v10701_v54, %v4358_v33 }
 0x389   :  { %4444 = vst.msk [vmem:[#allocation2 + $0x41] sm:$0xff] %vm42_vm0, %v4428_v35  ;;  %v4427_v36 = vsel %vm4395_vm6, %v4379_v56, %v4411_v32  ;;  %v4381_v38 = vadd.f32 %v10701_v54, %v4357_v34  ;;  %v8603_v40 = vpop.f32.mrb[22].mxu1 }
 0x38a   :  { %4443 = vst.msk [vmem:[#allocation2 + $0x31] sm:$0xff] %vm42_vm0, %v4427_v36  ;;  %vm4398_vm7 = vcmp.gt.f32.partialorder %v4382_v22, 0.0  ;;  %v4414_v63 = vmul.f32 0.01, %v4382_v22  ;;  %v4360_v53 = vmul.f32 %v8603_v40, %v10696_v31  ;;  %v4280_v1 = vpop.f32.mrb[23].mxu1 }
 0x38b   :  { %vm4397_vm8 = vcmp.gt.f32.partialorder %v4381_v38, 0.0  ;;  %v4413_v4 = vmul.f32 0.01, %v4381_v38  ;;  %v4359_v6 = vmul.f32 %v10696_v31, %v4280_v1 }
 0x38c   :  { %v4430_v7 = vsel %vm4398_vm7, %v4382_v22, %v4414_v63  ;;  %v4384_v12 = vadd.f32 %v10701_v54, %v4360_v53  ;;  %v10730_v39 = vld [vmem:[#allocation2 + $0x21] sm:$0xff] }
 0x38d   :  { %4446 = vst.msk [vmem:[#allocation2 + $0x61] sm:$0xff] %vm42_vm0, %v4430_v7  ;;  %v4429_v26 = vsel %vm4397_vm8, %v4381_v38, %v4413_v4  ;;  %v4383_v11 = vadd.f32 %v10701_v54, %v4359_v6  ;;  %v8606_v44 = vpop.f32.mrb[24].mxu1  ;;  %v10724_v49 = vld [vmem:[#allocation2 + $0x11] sm:$0xff] }
 0x38e   :  { %4445 = vst.msk [vmem:[#allocation2 + $0x51] sm:$0xff] %vm42_vm0, %v4429_v26  ;;  %vm4400_vm9 = vcmp.gt.f32.partialorder %v4384_v12, 0.0  ;;  %v4416_v5 = vmul.f32 0.01, %v4384_v12  ;;  %v4362_v8 = vmul.f32 %v8606_v44, %v10696_v31  ;;  %v4290_v9 = vpop.f32.mrb[25].mxu1  ;;  %8625 = vmatmul.mubr.msk.f32.vlgmr.msra.gmra.mrb[16].mxu0 %vm42_vm0, %v10724_v49  ;;  %v4905_v44 = vld [vmem:[#allocation4 + $0x298] sm:$0xff] }
 0x38f   :  { %vm4399_vm10 = vcmp.gt.f32.partialorder %v4383_v11, 0.0  ;;  %v4415_v43 = vmul.f32 0.01, %v4383_v11  ;;  %v4361_v46 = vmul.f32 %v10696_v31, %v4290_v9  ;;  %8627 = vmatprep.mubr.msk.f32.mxu0 %vm42_vm0, %v10730_v39  ;;  %9091 = vmatpush3.bf16.msra.mxu0 %v10690_v20  ;;  %v10813_v62 = vld [vmem:[#allocation2 + $0x10] sm:$0xff]  ;;  %v10817_v9 = vld [vmem:[#allocation2 + $0x20] sm:$0xff] }
 0x390   :  { %v4432_v47 = vsel %vm4400_vm9, %v4384_v12, %v4416_v5  ;;  %v4386_v42 = vadd.f32 %v10701_v54, %v4362_v8  ;;  %9093 = vmatprep.subr.bf16.mxu0 %v9092_v13  ;;  %v10747_v15 = vld [vmem:[#allocation2 + $0x41] sm:$0xff] }
 0x391   :  { %4448 = vst.msk [vmem:[#allocation2 + $0x81] sm:$0xff] %vm42_vm0, %v4432_v47  ;;  %v4431_v48 = vsel %vm4399_vm10, %v4383_v11, %v4415_v43  ;;  %v4385_v23 = vadd.f32 %v10701_v54, %v4361_v46  ;;  %v8609_v2 = vpop.f32.mrb[26].mxu1  ;;  %v10741_v25 = vld [vmem:[#allocation2 + $0x31] sm:$0xff]  ;;  %v5132_v5 = vld [vmem:[#allocation4 + $0x2a0] sm:$0xff]  ;;  %v5133_v8 = vld [vmem:[#allocation4 + $0x2a8] sm:$0xff] }
 0x392   :  { %4447 = vst.msk [vmem:[#allocation2 + $0x71] sm:$0xff] %vm42_vm0, %v4431_v48  ;;  %vm4402_vm11 = vcmp.gt.f32.partialorder %v4386_v42, 0.0  ;;  %v4418_v51 = vmul.f32 0.01, %v4386_v42  ;;  %v4364_v30 = vmul.f32 %v8609_v2, %v10696_v31  ;;  %v4300_v10 = vpop.f32.mrb[27].mxu1  ;;  %8628 = vmatmul.mubr.msk.f32.gmra.mrb[18].mxu0 %vm42_vm0, %v10741_v25  ;;  %v4904_v11 = vld [vmem:[#allocation4 + $0x290] sm:$0xff]  ;;  %v9104_v43 = vpack.c.bf16 %v5133_v8, %v5132_v5 }
 0x393   :  { %vm4401_vm12 = vcmp.gt.f32.partialorder %v4385_v23, 0.0  ;;  %v4417_v18 = vmul.f32 0.01, %v4385_v23  ;;  %v4363_v20 = vmul.f32 %v10696_v31, %v4300_v10  ;;  %8630 = vmatprep.mubr.msk.f32.mxu0 %vm42_vm0, %v10747_v15  ;;  %9095 = vmatpush3.bf16.msra.mxu0 %v9092_v13  ;;  %v4457_v13 = vld [vmem:[#allocation2] sm:$0xff]  ;;  %v9100_v61 = vpack.c.bf16 %v4905_v44, %v4904_v11  ;;  %v10822_v46 = vld [vmem:[#allocation2 + $0x30] sm:$0xff]  ;;  %v5823_v8 = vld [vmem:[#allocation4 + $0x308] sm:$0xff] }
 0x394   :  { %v4434_v50 = vsel %vm4402_vm11, %v4386_v42, %v4418_v51  ;;  %v4388_v57 = vadd.f32 %v10701_v54, %v4364_v30  ;;  %9097 = vmatprep.subr.bf16.mxu0 %v10737_v21  ;;  %v10762_v37 = vld [vmem:[#allocation2 + $0x61] sm:$0xff]  ;;  %v5594_v44 = vld [vmem:[#allocation4 + $0x2f0] sm:$0xff] }
 0x395   :  { %4450 = vst.msk [vmem:[#allocation2 + $0xc1] sm:$0xff] %vm42_vm0, %v4434_v50  ;;  %v4433_v24 = vsel %vm4401_vm12, %v4385_v23, %v4417_v18  ;;  %v4387_v58 = vadd.f32 %v10701_v54, %v4363_v20  ;;  %v8612_v59 = vpop.f32.mrb[28].mxu1  ;;  %v10756_v3 = vld [vmem:[#allocation2 + $0x51] sm:$0xff]  ;;  %v10826_v47 = vld [vmem:[#allocation2 + $0x40] sm:$0xff] }
 0x396   :  { %4449 = vst.msk [vmem:[#allocation2 + $0xb1] sm:$0xff] %vm42_vm0, %v4433_v24  ;;  %vm4404_vm13 = vcmp.gt.f32.partialorder %v4388_v57, 0.0  ;;  %v4420_v14 = vmul.f32 0.01, %v4388_v57  ;;  %v4366_v16 = vmul.f32 %v8612_v59, %v10696_v31  ;;  %v4310_v17 = vpop.f32.mrb[29].mxu1  ;;  %8631 = vmatmul.mubr.msk.f32.gmra.mrb[20].mxu0 %vm42_vm0, %v10756_v3  ;;  %v10830_v42 = vld [vmem:[#allocation2 + $0x50] sm:$0xff] }
 0x397   :  { %vm4403_vm14 = vcmp.gt.f32.partialorder %v4387_v58, 0.0  ;;  %v4419_v41 = vmul.f32 0.01, %v4387_v58  ;;  %v4365_v45 = vmul.f32 %v10696_v31, %v4310_v17  ;;  %8633 = vmatprep.mubr.msk.f32.mxu0 %vm42_vm0, %v10762_v37  ;;  %v4465_v48 = vld [vmem:[#allocation2 + $0xa0] sm:$0xff]  ;;  %v5134_v24 = vld [vmem:[#allocation4 + $0x2b0] sm:$0xff]  ;;  %v5363_v17 = vld [vmem:[#allocation4 + $0x2c8] sm:$0xff] }
 0x398   :  { %v4436_v52 = vsel %vm4404_vm13, %v4388_v57, %v4420_v14  ;;  %v4390_v55 = vadd.f32 %v10701_v54, %v4366_v16  ;;  %v4885_v50 = vld [vmem:[#allocation2 + $0x2] sm:$0xff]  ;;  %v10872_v14 = vld [vmem:[#allocation2 + $0x12] sm:$0xff] }
 0x399   :  { %4452 = vst.msk [vmem:[#allocation2 + $0xe1] sm:$0xff] %vm42_vm0, %v4436_v52  ;;  %v4435_v56 = vsel %vm4403_vm14, %v4387_v58, %v4419_v41  ;;  %v4389_v60 = vadd.f32 %v10701_v54, %v4365_v45  ;;  %v8615_v28 = vpop.f32.mrb[30].mxu1  ;;  %v10770_v33 = vld [vmem:[#allocation2 + $0x71] sm:$0xff]  ;;  %v5362_v16 = vld [vmem:[#allocation4 + $0x2c0] sm:$0xff] }
 0x39a   :  { %4451 = vst.msk [vmem:[#allocation2 + $0xd1] sm:$0xff] %vm42_vm0, %v4435_v56  ;;  %vm4406_vm15 = vcmp.gt.f32.partialorder %v4390_v55, 0.0  ;;  %v4422_v29 = vmul.f32 0.01, %v4390_v55  ;;  %v4368_v32 = vmul.f32 %v8615_v28, %v10696_v31  ;;  %v4320_v34 = vpop.f32.mrb[31].mxu1  ;;  %8634 = vmatmul.mubr.msk.f32.gmra.mrb[22].mxu0 %vm42_vm0, %v10770_v33  ;;  %v10838_v23 = vld [vmem:[#allocation2 + $0x70] sm:$0xff]  ;;  %v9112_v45 = vpack.c.bf16 %v5363_v17, %v5362_v16 }
 0x39b   :  { %vm4405_vm1 = vcmp.gt.f32.partialorder %v4389_v60, 0.0  ;;  %v4421_v35 = vmul.f32 0.01, %v4389_v60  ;;  %v4367_v22 = vmul.f32 %v10696_v31, %v4320_v34  ;;  %8636 = vmatprep.mubr.msk.f32.mxu0 %vm42_vm0, %v4486_v27  ;;  %v5135_v58 = vld [vmem:[#allocation4 + $0x2b8] sm:$0xff]  ;;  %v10876_v41 = vld [vmem:[#allocation2 + $0x22] sm:$0xff] }
 0x39c   :  { %v4438_v36 = vsel %vm4406_vm15, %v4390_v55, %v4422_v29  ;;  %v4392_v38 = vadd.f32 %v10701_v54, %v4368_v32  ;;  %v10786_v31 = vld [vmem:[#allocation2 + $0xc1] sm:$0xff]  ;;  %v9108_v59 = vpack.c.bf16 %v5135_v58, %v5134_v24  ;;  %v10880_v52 = vld [vmem:[#allocation2 + $0x32] sm:$0xff] }
 0x39d   :  { %4454 = vst.msk [vmem:[#allocation2 + $0x101] sm:$0xff] %vm42_vm0, %v4438_v36  ;;  %v4437_v40 = vsel %vm4405_vm1, %v4389_v60, %v4421_v35  ;;  %v4391_v19 = vadd.f32 %v10701_v54, %v4367_v22  ;;  %v10781_v0 = vld [vmem:[#allocation2 + $0xb1] sm:$0xff]  ;;  %v10847_v51 = vld [vmem:[#allocation2 + $0xc0] sm:$0xff]  ;;  %v6624_v24 = vld [vmem:[%s11403_s4 + $0x8] sm:$0xff] }
 0x39e   :  { %4453 = vst.msk [vmem:[#allocation2 + $0xf1] sm:$0xff] %vm42_vm0, %v4437_v40  ;;  %vm4408_vm2 = vcmp.gt.f32.partialorder %v4392_v38, 0.0  ;;  %v4424_v63 = vmul.f32 0.01, %v4392_v38  ;;  %8637 = vmatmul.mubr.msk.f32.gmra.mrb[24].mxu0 %vm42_vm0, %v10781_v0  ;;  %v10843_v2 = vld [vmem:[#allocation2 + $0xb0] sm:$0xff]  ;;  %v10884_v55 = vld [vmem:[#allocation2 + $0x42] sm:$0xff] }
 0x39f   :  { %vm4407_vm3 = vcmp.gt.f32.partialorder %v4391_v19, 0.0  ;;  %v4423_v53 = vmul.f32 0.01, %v4391_v19  ;;  %8639 = vmatprep.mubr.msk.f32.mxu0 %vm42_vm0, %v10786_v31  ;;  %v10888_v27 = vld [vmem:[#allocation2 + $0x52] sm:$0xff]  ;;  %v10892_v56 = vld [vmem:[#allocation2 + $0x62] sm:$0xff] }
 0x3a0   :  { %v4440_v1 = vsel %vm4408_vm2, %v4392_v38, %v4424_v63  ;;  %v10796_v6 = vld [vmem:[#allocation2 + $0xe1] sm:$0xff]  ;;  %v10896_v28 = vld [vmem:[#allocation2 + $0x72] sm:$0xff] }
 0x3a1   :  { %4456 = vst.msk [vmem:[#allocation2 + $0x121] sm:$0xff] %vm42_vm0, %v4440_v1  ;;  %v4439_v54 = vsel %vm4407_vm3, %v4391_v19, %v4423_v53  ;;  %v10791_v4 = vld [vmem:[#allocation2 + $0xd1] sm:$0xff]  ;;  %v10855_v10 = vld [vmem:[#allocation2 + $0xe0] sm:$0xff]  ;;  %v5593_v1 = vld [vmem:[#allocation4 + $0x2e8] sm:$0xff] }
 0x3a2   :  { %4455 = vst.msk [vmem:[#allocation2 + $0x111] sm:$0xff] %vm42_vm0, %v4439_v54  ;;  %8640 = vmatmul.mubr.msk.f32.gmra.mrb[26].mxu0 %vm42_vm0, %v10791_v4  ;;  %v10851_v30 = vld [vmem:[#allocation2 + $0xd0] sm:$0xff]  ;;  %v4893_v60 = vld [vmem:[#allocation2 + $0xa2] sm:$0xff]  ;;  %v5365_v19 = vld [vmem:[#allocation4 + $0x2d8] sm:$0xff] }
 0x3a3   :  { %8642 = vmatprep.mubr.msk.f32.mxu0 %vm42_vm0, %v10796_v6  ;;  %v10901_v29 = vld [vmem:[#allocation2 + $0xb2] sm:$0xff]  ;;  %v10905_v32 = vld [vmem:[#allocation2 + $0xc2] sm:$0xff] }
 0x3a4   :  { %v10804_v12 = vld [vmem:[#allocation2 + $0x101] sm:$0xff]  ;;  %v10909_v34 = vld [vmem:[#allocation2 + $0xd2] sm:$0xff] }
 0x3a5   :  { %v10800_v7 = vld [vmem:[#allocation2 + $0xf1] sm:$0xff]  ;;  %v10863_v20 = vld [vmem:[#allocation2 + $0x100] sm:$0xff]  ;;  %v6053_v17 = vld [vmem:[#allocation4 + $0x328] sm:$0xff] }
 0x3a6   :  { %8643 = vmatmul.mubr.msk.f32.gmra.mrb[28].mxu0 %vm42_vm0, %v10800_v7  ;;  %v10859_v18 = vld [vmem:[#allocation2 + $0xf0] sm:$0xff]  ;;  %v10913_v35 = vld [vmem:[#allocation2 + $0xe2] sm:$0xff] }
 0x3a7   :  { %8645 = vmatprep.mubr.msk.f32.mxu0 %vm42_vm0, %v10804_v12  ;;  %v10917_v22 = vld [vmem:[#allocation2 + $0xf2] sm:$0xff]  ;;  %v10921_v36 = vld [vmem:[#allocation2 + $0x102] sm:$0xff] }
 0x3a8   :  { %v5364_v40 = vld [vmem:[#allocation4 + $0x2d0] sm:$0xff]  ;;  %v5592_v53 = vld [vmem:[#allocation4 + $0x2e0] sm:$0xff] }
 0x3a9   :  { %v10808_v26 = vld [vmem:[#allocation2 + $0x111] sm:$0xff]  ;;  %v9116_v63 = vpack.c.bf16 %v5365_v19, %v5364_v40  ;;  %v9120_v54 = vpack.c.bf16 %v5593_v1, %v5592_v53  ;;  %v10961_v11 = vld [vmem:[#allocation2 + $0x120] sm:$0xff]  ;;  %v6283_v53 = vld [vmem:[#allocation4 + $0x348] sm:$0xff] }
 0x3aa   :  { %8646 = vmatmul.mubr.msk.f32.gmra.mrb[30].mxu0 %vm42_vm0, %v10808_v26  ;;  %v10867_v57 = vld [vmem:[#allocation2 + $0x110] sm:$0xff]  ;;  %v5822_v5 = vld [vmem:[#allocation4 + $0x300] sm:$0xff]  ;;  %v6055_v40 = vld [vmem:[#allocation4 + $0x338] sm:$0xff] }
 0x3ab   :  { %8656 = vmatprep.mubr.msk.f32.mxu0 %vm42_vm0, %v4457_v13  ;;  %v10925_v38 = vld [vmem:[#allocation2 + $0x112] sm:$0xff]  ;;  %v10943_v13 = vld [vmem:[#allocation2 + $0x80] sm:$0xff] }
 0x3ac   :  { %v6052_v16 = vld [vmem:[#allocation4 + $0x320] sm:$0xff] }
 0x3ae   :  { %8657 = vmatmul.mubr.msk.f32.vlgmr.msra.gmra.mrb[16].mxu0 %vm42_vm0, %v10813_v62 }
 0x3af   :  { %8659 = vmatprep.mubr.msk.f32.mxu0 %vm42_vm0, %v10817_v9  ;;  %9099 = vmatpush3.bf16.msra.mxu0 %v10737_v21  ;;  %v10834_v21 = vld [vmem:[#allocation2 + $0x60] sm:$0xff] }
 0x3b0   :  { %9101 = vmatprep.subr.bf16.mxu0 %v9100_v61 }
 0x3b2   :  { %8660 = vmatmul.mubr.msk.f32.gmra.mrb[18].mxu0 %vm42_vm0, %v10822_v46 }
 0x3b3   :  { %8662 = vmatprep.mubr.msk.f32.mxu0 %vm42_vm0, %v10826_v47  ;;  %9103 = vmatpush3.bf16.msra.mxu0 %v9100_v61  ;;  %v5595_v61 = vld [vmem:[#allocation4 + $0x2f8] sm:$0xff] }
 0x3b4   :  { %9105 = vmatprep.subr.bf16.mxu0 %v9104_v43 }
 0x3b6   :  { %8663 = vmatmul.mubr.msk.f32.gmra.mrb[20].mxu0 %vm42_vm0, %v10830_v42 }
 0x3b7   :  { %8665 = vmatprep.mubr.msk.f32.mxu0 %vm42_vm0, %v10834_v21 }
 0x3ba   :  { %8666 = vmatmul.mubr.msk.f32.gmra.mrb[22].mxu0 %vm42_vm0, %v10838_v23 }
 0x3bb   :  { %8668 = vmatprep.mubr.msk.f32.mxu0 %vm42_vm0, %v4465_v48  ;;  %v10997_v48 = vld [vmem:[#allocation2 + $0x121] sm:$0xff] }
 0x3be   :  { %8669 = vmatmul.mubr.msk.f32.gmra.mrb[24].mxu0 %vm42_vm0, %v10843_v2 }
 0x3bf   :  { %8671 = vmatprep.mubr.msk.f32.mxu0 %vm42_vm0, %v10847_v51 }
 0x3c2   :  { %8672 = vmatmul.mubr.msk.f32.gmra.mrb[26].mxu0 %vm42_vm0, %v10851_v30 }
 0x3c3   :  { %8674 = vmatprep.mubr.msk.f32.mxu0 %vm42_vm0, %v10855_v10 }
 0x3c6   :  { %8675 = vmatmul.mubr.msk.f32.gmra.mrb[28].mxu0 %vm42_vm0, %v10859_v18 }
 0x3c7   :  { %8677 = vmatprep.mubr.msk.f32.mxu0 %vm42_vm0, %v10863_v20 }
 0x3ca   :  { %8678 = vmatmul.mubr.msk.f32.gmra.mrb[30].mxu0 %vm42_vm0, %v10867_v57 }
 0x3cb   :  { %8688 = vmatprep.mubr.msk.f32.mxu0 %vm42_vm0, %v4885_v50  ;;  %v6623_v50 = vld [vmem:[%s11403_s4] sm:$0xff] }
 0x3cc   :  { %v9152_v58 = vpack.c.bf16 %v6624_v24, %v6623_v50 }
 0x3ce   :  { %8689 = vmatmul.mubr.msk.f32.vlgmr.msra.gmra.mrb[16].mxu0 %vm42_vm0, %v10872_v14  ;;  %9153 = vmatprep.subr.bf16.mxu1 %v9152_v58 }
 0x3cf   :  { %8691 = vmatprep.mubr.msk.f32.mxu0 %vm42_vm0, %v10876_v41  ;;  %9107 = vmatpush3.bf16.msra.mxu0 %v9104_v43  ;;  %v9128_v43 = vpack.c.bf16 %v5823_v8, %v5822_v5 }
 0x3d0   :  { %9109 = vmatprep.subr.bf16.mxu0 %v9108_v59  ;;  %9155 = vmatpush3.bf16.msra.mxu1 %v9152_v58 }
 0x3d2   :  { %8692 = vmatmul.mubr.msk.f32.gmra.mrb[18].mxu0 %vm42_vm0, %v10880_v52 }
 0x3d3   :  { %8694 = vmatprep.mubr.msk.f32.mxu0 %vm42_vm0, %v10884_v55  ;;  %9111 = vmatpush3.bf16.msra.mxu0 %v9108_v59 }
 0x3d4   :  { %9113 = vmatprep.subr.bf16.mxu0 %v9112_v45 }
 0x3d6   :  { %8695 = vmatmul.mubr.msk.f32.gmra.mrb[20].mxu0 %vm42_vm0, %v10888_v27 }
 0x3d7   :  { %8697 = vmatprep.mubr.msk.f32.mxu0 %vm42_vm0, %v10892_v56 }
 0x3da   :  { %8698 = vmatmul.mubr.msk.f32.gmra.mrb[22].mxu0 %vm42_vm0, %v10896_v28 }
 0x3db   :  { %8700 = vmatprep.mubr.msk.f32.mxu0 %vm42_vm0, %v4893_v60  ;;  %v11039_v60 = vld [vmem:[#allocation2 + $0x122] sm:$0xff] }
 0x3de   :  { %8701 = vmatmul.mubr.msk.f32.gmra.mrb[24].mxu0 %vm42_vm0, %v10901_v29 }
 0x3df   :  { %8703 = vmatprep.mubr.msk.f32.mxu0 %vm42_vm0, %v10905_v32 }
 0x3e2   :  { %8704 = vmatmul.mubr.msk.f32.gmra.mrb[26].mxu0 %vm42_vm0, %v10909_v34 }
 0x3e3   :  { %8706 = vmatprep.mubr.msk.f32.mxu0 %vm42_vm0, %v10913_v35 }
 0x3e6   :  { %8707 = vmatmul.mubr.msk.f32.gmra.mrb[28].mxu0 %vm42_vm0, %v10917_v22 }
 0x3e7   :  { %8709 = vmatprep.mubr.msk.f32.mxu0 %vm42_vm0, %v10921_v36 }
 0x3ea   :  { %8710 = vmatmul.mubr.msk.f32.gmra.mrb[30].mxu0 %vm42_vm0, %v10925_v38 }
 0x3eb   :  { %8720 = vmatprep.mubr.msk.f32.mxu0 %vm42_vm0, %v10813_v62  ;;  %v9124_v62 = vpack.c.bf16 %v5595_v61, %v5594_v44 }
 0x3ee   :  { %8721 = vmatmul.mubr.msk.f32.vlgmr.msra.gmra.mrb[16].mxu0 %vm42_vm0, %v10817_v9 }
 0x3ef   :  { %8723 = vmatprep.mubr.msk.f32.mxu0 %vm42_vm0, %v10822_v46  ;;  %9115 = vmatpush3.bf16.msra.mxu0 %v9112_v45  ;;  %v9136_v45 = vpack.c.bf16 %v6053_v17, %v6052_v16 }
 0x3f0   :  { %9117 = vmatprep.subr.bf16.mxu0 %v9116_v63 }
 0x3f2   :  { %8724 = vmatmul.mubr.msk.f32.gmra.mrb[18].mxu0 %vm42_vm0, %v10826_v47 }
 0x3f3   :  { %8726 = vmatprep.mubr.msk.f32.mxu0 %vm42_vm0, %v10830_v42  ;;  %9119 = vmatpush3.bf16.msra.mxu0 %v9116_v63  ;;  %v6282_v63 = vld [vmem:[#allocation4 + $0x340] sm:$0xff] }
 0x3f4   :  { %9121 = vmatprep.subr.bf16.mxu0 %v9120_v54  ;;  %v9144_v1 = vpack.c.bf16 %v6283_v53, %v6282_v63 }
 0x3f6   :  { %8727 = vmatmul.mubr.msk.f32.gmra.mrb[20].mxu0 %vm42_vm0, %v10834_v21 }
 0x3f7   :  { %8729 = vmatprep.mubr.msk.f32.mxu0 %vm42_vm0, %v10838_v23 }
 0x3fa   :  { %8730 = vmatmul.mubr.msk.f32.gmra.mrb[22].mxu0 %vm42_vm0, %v10943_v13 }
 0x3fb   :  { %8732 = vmatprep.mubr.msk.f32.mxu0 %vm42_vm0, %v10843_v2  ;;  %v5825_v2 = vld [vmem:[#allocation4 + $0x318] sm:$0xff] }
 0x3fe   :  { %8733 = vmatmul.mubr.msk.f32.gmra.mrb[24].mxu0 %vm42_vm0, %v10847_v51 }
 0x3ff   :  { %8735 = vmatprep.mubr.msk.f32.mxu0 %vm42_vm0, %v10851_v30 }
 0x402   :  { %8736 = vmatmul.mubr.msk.f32.gmra.mrb[26].mxu0 %vm42_vm0, %v10855_v10 }
 0x403   :  { %8738 = vmatprep.mubr.msk.f32.mxu0 %vm42_vm0, %v10859_v18 }
 0x406   :  { %8739 = vmatmul.mubr.msk.f32.gmra.mrb[28].mxu0 %vm42_vm0, %v10863_v20 }
 0x407   :  { %8741 = vmatprep.mubr.msk.f32.mxu0 %vm42_vm0, %v10867_v57 }
 0x40a   :  { %8742 = vmatmul.mubr.msk.f32.gmra.mrb[30].mxu0 %vm42_vm0, %v10961_v11 }
 0x40b   :  { %8752 = vmatprep.mubr.msk.f32.mxu0 %vm42_vm0, %v10724_v49  ;;  %v10979_v49 = vld [vmem:[#allocation2 + $0x81] sm:$0xff] }
 0x40e   :  { %8753 = vmatmul.mubr.msk.f32.vlgmr.msra.gmra.mrb[16].mxu0 %vm42_vm0, %v10730_v39 }
 0x40f   :  { %8755 = vmatprep.mubr.msk.f32.mxu0 %vm42_vm0, %v10741_v25  ;;  %9123 = vmatpush3.bf16.msra.mxu0 %v9120_v54 }
 0x410   :  { %9125 = vmatprep.subr.bf16.mxu0 %v9124_v62 }
 0x412   :  { %8756 = vmatmul.mubr.msk.f32.gmra.mrb[18].mxu0 %vm42_vm0, %v10747_v15 }
 0x413   :  { %8758 = vmatprep.mubr.msk.f32.mxu0 %vm42_vm0, %v10756_v3  ;;  %9127 = vmatpush3.bf16.msra.mxu0 %v9124_v62 }
 0x414   :  { %9129 = vmatprep.subr.bf16.mxu0 %v9128_v43 }
 0x416   :  { %8759 = vmatmul.mubr.msk.f32.gmra.mrb[20].mxu0 %vm42_vm0, %v10762_v37 }
 0x417   :  { %8761 = vmatprep.mubr.msk.f32.mxu0 %vm42_vm0, %v10770_v33 }
 0x41a   :  { %8762 = vmatmul.mubr.msk.f32.gmra.mrb[22].mxu0 %vm42_vm0, %v10979_v49 }
 0x41b   :  { %8764 = vmatprep.mubr.msk.f32.mxu0 %vm42_vm0, %v10781_v0  ;;  %v5824_v0 = vld [vmem:[#allocation4 + $0x310] sm:$0xff] }
 0x41c   :  { %v9132_v59 = vpack.c.bf16 %v5825_v2, %v5824_v0 }
 0x41e   :  { %8765 = vmatmul.mubr.msk.f32.gmra.mrb[24].mxu0 %vm42_vm0, %v10786_v31 }
 0x41f   :  { %8767 = vmatprep.mubr.msk.f32.mxu0 %vm42_vm0, %v10791_v4 }
 0x422   :  { %8768 = vmatmul.mubr.msk.f32.gmra.mrb[26].mxu0 %vm42_vm0, %v10796_v6 }
 0x423   :  { %8770 = vmatprep.mubr.msk.f32.mxu0 %vm42_vm0, %v10800_v7 }
 0x426   :  { %8771 = vmatmul.mubr.msk.f32.gmra.mrb[28].mxu0 %vm42_vm0, %v10804_v12 }
 0x427   :  { %8773 = vmatprep.mubr.msk.f32.mxu0 %vm42_vm0, %v10808_v26 }
 0x42a   :  { %8774 = vmatmul.mubr.msk.f32.gmra.mrb[30].mxu0 %vm42_vm0, %v10997_v48 }
 0x42b   :  { %8784 = vmatprep.mubr.msk.f32.mxu0 %vm42_vm0, %v10872_v14  ;;  %v11021_v14 = vld [vmem:[#allocation2 + $0x82] sm:$0xff] }
 0x42e   :  { %8785 = vmatmul.mubr.msk.f32.vlgmr.msra.gmra.mrb[16].mxu0 %vm42_vm0, %v10876_v41 }
 0x42f   :  { %8787 = vmatprep.mubr.msk.f32.mxu0 %vm42_vm0, %v10880_v52  ;;  %9131 = vmatpush3.bf16.msra.mxu0 %v9128_v43 }
 0x430   :  { %9133 = vmatprep.subr.bf16.mxu0 %v9132_v59 }
 0x432   :  { %8788 = vmatmul.mubr.msk.f32.gmra.mrb[18].mxu0 %vm42_vm0, %v10884_v55 }
 0x433   :  { %8790 = vmatprep.mubr.msk.f32.mxu0 %vm42_vm0, %v10888_v27  ;;  %9135 = vmatpush3.bf16.msra.mxu0 %v9132_v59 }
 0x434   :  { %9137 = vmatprep.subr.bf16.mxu0 %v9136_v45 }
 0x436   :  { %8791 = vmatmul.mubr.msk.f32.gmra.mrb[20].mxu0 %vm42_vm0, %v10892_v56 }
 0x437   :  { %8793 = vmatprep.mubr.msk.f32.mxu0 %vm42_vm0, %v10896_v28 }
 0x43a   :  { %8794 = vmatmul.mubr.msk.f32.gmra.mrb[22].mxu0 %vm42_vm0, %v11021_v14 }
 0x43b   :  { %8796 = vmatprep.mubr.msk.f32.mxu0 %vm42_vm0, %v10901_v29  ;;  %v6054_v29 = vld [vmem:[#allocation4 + $0x330] sm:$0xff] }
 0x43c   :  { %v9140_v19 = vpack.c.bf16 %v6055_v40, %v6054_v29 }
 0x43e   :  { %8797 = vmatmul.mubr.msk.f32.gmra.mrb[24].mxu0 %vm42_vm0, %v10905_v32 }
 0x43f   :  { %8799 = vmatprep.mubr.msk.f32.mxu0 %vm42_vm0, %v10909_v34 }
 0x442   :  { %8800 = vmatmul.mubr.msk.f32.gmra.mrb[26].mxu0 %vm42_vm0, %v10913_v35 }
 0x443   :  { %8802 = vmatprep.mubr.msk.f32.mxu0 %vm42_vm0, %v10917_v22 }
 0x446   :  { %8803 = vmatmul.mubr.msk.f32.gmra.mrb[28].mxu0 %vm42_vm0, %v10921_v36 }
 0x447   :  { %8805 = vmatprep.mubr.msk.f32.mxu0 %vm42_vm0, %v10925_v38 }
 0x44a   :  { %8806 = vmatmul.mubr.msk.f32.gmra.mrb[30].mxu0 %vm42_vm0, %v11039_v60 }
 0x44b   :  { %8816 = vmatprep.mubr.msk.f32.mxu0 %vm42_vm0, %v10817_v9  ;;  %v5812_v9 = vld [vmem:[#allocation2 + $0x90] sm:$0xff] }
 0x44e   :  { %8817 = vmatmul.mubr.msk.f32.vlgmr.msra.gmra.mrb[16].mxu0 %vm42_vm0, %v10822_v46  ;;  %v5820_v46 = vld [vmem:[#allocation2 + $0x130] sm:$0xff] }
 0x44f   :  { %8819 = vmatprep.mubr.msk.f32.mxu0 %vm42_vm0, %v10826_v47  ;;  %9139 = vmatpush3.bf16.msra.mxu0 %v9136_v45  ;;  %v6284_v47 = vld [vmem:[#allocation4 + $0x350] sm:$0xff] }
 0x450   :  { %9141 = vmatprep.subr.bf16.mxu0 %v9140_v19 }
 0x452   :  { %8820 = vmatmul.mubr.msk.f32.gmra.mrb[18].mxu0 %vm42_vm0, %v10830_v42  ;;  %v6285_v42 = vld [vmem:[#allocation4 + $0x358] sm:$0xff] }
 0x453   :  { %8822 = vmatprep.mubr.msk.f32.mxu0 %vm42_vm0, %v10834_v21  ;;  %9143 = vmatpush3.bf16.msra.mxu0 %v9140_v19  ;;  %v9148_v21 = vpack.c.bf16 %v6285_v42, %v6284_v47 }
 0x454   :  { %9145 = vmatprep.subr.bf16.mxu0 %v9144_v1 }
 0x456   :  { %8823 = vmatmul.mubr.msk.f32.gmra.mrb[20].mxu0 %vm42_vm0, %v10838_v23 }
 0x457   :  { %8825 = vmatprep.mubr.msk.f32.mxu0 %vm42_vm0, %v10943_v13 }
 0x45a   :  { %8826 = vmatmul.mubr.msk.f32.gmra.mrb[22].mxu0 %vm42_vm0, %v5812_v9 }
 0x45b   :  { %8828 = vmatprep.mubr.msk.f32.mxu0 %vm42_vm0, %v10847_v51 }
 0x45e   :  { %8829 = vmatmul.mubr.msk.f32.gmra.mrb[24].mxu0 %vm42_vm0, %v10851_v30 }
 0x45f   :  { %8831 = vmatprep.mubr.msk.f32.mxu0 %vm42_vm0, %v10855_v10 }
 0x462   :  { %8832 = vmatmul.mubr.msk.f32.gmra.mrb[26].mxu0 %vm42_vm0, %v10859_v18 }
 0x463   :  { %8834 = vmatprep.mubr.msk.f32.mxu0 %vm42_vm0, %v10863_v20 }
 0x466   :  { %8835 = vmatmul.mubr.msk.f32.gmra.mrb[28].mxu0 %vm42_vm0, %v10867_v57 }
 0x467   :  { %8837 = vmatprep.mubr.msk.f32.mxu0 %vm42_vm0, %v10961_v11 }
 0x46a   :  { %8838 = vmatmul.mubr.msk.f32.gmra.mrb[30].mxu0 %vm42_vm0, %v5820_v46 }
 0x46b   :  { %8848 = vmatprep.mubr.msk.f32.mxu0 %vm42_vm0, %v10730_v39  ;;  %v6042_v39 = vld [vmem:[#allocation2 + $0x91] sm:$0xff] }
 0x46e   :  { %8849 = vmatmul.mubr.msk.f32.vlgmr.msra.gmra.mrb[16].mxu0 %vm42_vm0, %v10741_v25  ;;  %v6050_v25 = vld [vmem:[#allocation2 + $0x131] sm:$0xff] }
 0x46f   :  { %8851 = vmatprep.mubr.msk.f32.mxu0 %vm42_vm0, %v10747_v15  ;;  %9147 = vmatpush3.bf16.msra.mxu0 %v9144_v1  ;;  %v6272_v15 = vld [vmem:[#allocation2 + $0x92] sm:$0xff] }
 0x470   :  { %9149 = vmatprep.subr.bf16.mxu0 %v9148_v21 }
 0x472   :  { %8852 = vmatmul.mubr.msk.f32.gmra.mrb[18].mxu0 %vm42_vm0, %v10756_v3  ;;  %v6280_v3 = vld [vmem:[#allocation2 + $0x132] sm:$0xff] }
 0x473   :  { %8854 = vmatprep.mubr.msk.f32.mxu0 %vm42_vm0, %v10762_v37  ;;  %9151 = vmatpush3.bf16.msra.mxu0 %v9148_v21  ;;  %v6625_v37 = vld [vmem:[%s11403_s4 + $0x10] sm:$0xff] }
 0x476   :  { %8855 = vmatmul.mubr.msk.f32.gmra.mrb[20].mxu0 %vm42_vm0, %v10770_v33  ;;  %v6626_v33 = vld [vmem:[%s11403_s4 + $0x18] sm:$0xff] }
 0x477   :  { %8857 = vmatprep.mubr.msk.f32.mxu0 %vm42_vm0, %v10979_v49 }
 0x47a   :  { %8858 = vmatmul.mubr.msk.f32.gmra.mrb[22].mxu0 %vm42_vm0, %v6042_v39 }
 0x47b   :  { %8860 = vmatprep.mubr.msk.f32.mxu0 %vm42_vm0, %v10786_v31  ;;  %v9156_v31 = vpack.c.bf16 %v6626_v33, %v6625_v37 }
 0x47d   :  { %9157 = vmatprep.subr.bf16.mxu1 %v9156_v31 }
 0x47e   :  { %8861 = vmatmul.mubr.msk.f32.gmra.mrb[24].mxu0 %vm42_vm0, %v10791_v4  ;;  %9159 = vmatpush3.bf16.msra.mxu1 %v9156_v31  ;;  %v11142_v4 = vld [vmem:[%s11401_s2 + $0x2] ss:$0 sm:$0xff] }
 0x47f   :  { %8863 = vmatprep.mubr.msk.f32.mxu0 %vm42_vm0, %v10796_v6 }
 0x482   :  { %8864 = vmatmul.mubr.msk.f32.gmra.mrb[26].mxu0 %vm42_vm0, %v10800_v7  ;;  %v11147_v7 = vld [vmem:[%s11402_s3 + $0x2] ss:$0 sm:$0xff] }
 0x483   :  { %8866 = vmatprep.mubr.msk.f32.mxu0 %vm42_vm0, %v10804_v12 }
 0x486   :  { %8867 = vmatmul.mubr.msk.f32.gmra.mrb[28].mxu0 %vm42_vm0, %v10808_v26 }
 0x487   :  { %8869 = vmatprep.mubr.msk.f32.mxu0 %vm42_vm0, %v10997_v48 }
 0x48a   :  { %8870 = vmatmul.mubr.msk.f32.gmra.mrb[30].mxu0 %vm42_vm0, %v6050_v25 }
 0x48b   :  { %8880 = vmatprep.mubr.msk.f32.mxu0 %vm42_vm0, %v10876_v41 }
 0x48e   :  { %8881 = vmatmul.mubr.msk.f32.vlgmr.msra.gmra.mrb[16].mxu0 %vm42_vm0, %v10880_v52 }
 0x48f   :  { %8883 = vmatprep.mubr.msk.f32.mxu0 %vm42_vm0, %v10884_v55 }
 0x492   :  { %8884 = vmatmul.mubr.msk.f32.gmra.mrb[18].mxu0 %vm42_vm0, %v10888_v27 }
 0x493   :  { %8886 = vmatprep.mubr.msk.f32.mxu0 %vm42_vm0, %v10892_v56 }
 0x496   :  { %8887 = vmatmul.mubr.msk.f32.gmra.mrb[20].mxu0 %vm42_vm0, %v10896_v28 }
 0x497   :  { %8889 = vmatprep.mubr.msk.f32.mxu0 %vm42_vm0, %v11021_v14 }
 0x49a   :  { %8890 = vmatmul.mubr.msk.f32.gmra.mrb[22].mxu0 %vm42_vm0, %v6272_v15 }
 0x49b   :  { %8892 = vmatprep.mubr.msk.f32.mxu0 %vm42_vm0, %v10905_v32 }
 0x49e   :  { %8893 = vmatmul.mubr.msk.f32.gmra.mrb[24].mxu0 %vm42_vm0, %v10909_v34 }
 0x49f   :  { %8895 = vmatprep.mubr.msk.f32.mxu0 %vm42_vm0, %v10913_v35 }
 0x4a2   :  { %8896 = vmatmul.mubr.msk.f32.gmra.mrb[26].mxu0 %vm42_vm0, %v10917_v22 }
 0x4a3   :  { %8898 = vmatprep.mubr.msk.f32.mxu0 %vm42_vm0, %v10921_v36 }
 0x4a6   :  { %8899 = vmatmul.mubr.msk.f32.gmra.mrb[28].mxu0 %vm42_vm0, %v10925_v38 }
 0x4a7   :  { %8901 = vmatprep.mubr.msk.f32.mxu0 %vm42_vm0, %v11039_v60 }
 0x4aa   :  { %8902 = vmatmul.mubr.msk.f32.gmra.mrb[30].mxu0 %vm42_vm0, %v6280_v3 }
 0x561   :  { %v8882_v6 = vpop.f32.mrb[16].mxu0 }
 0x562   :  { %v6504_v12 = vmul.f32 %v8882_v6, %v11142_v4  ;;  %v6400_v26 = vpop.f32.mrb[17].mxu0 }
 0x563   :  { %v6503_v23 = vmul.f32 %v11142_v4, %v6400_v26 }
 0x564   :  { %v6528_v51 = vadd.f32 %v11147_v7, %v6504_v12 }
 0x565   :  { %v6527_v30 = vadd.f32 %v11147_v7, %v6503_v23  ;;  %v8885_v10 = vpop.f32.mrb[18].mxu0 }
 0x566   :  { %vm6544_vm4 = vcmp.gt.f32.partialorder %v6528_v51, 0.0  ;;  %v6560_v18 = vmul.f32 0.01, %v6528_v51  ;;  %v6506_v20 = vmul.f32 %v8885_v10, %v11142_v4  ;;  %v6410_v57 = vpop.f32.mrb[19].mxu0 }
 0x567   :  { %vm6543_vm5 = vcmp.gt.f32.partialorder %v6527_v30, 0.0  ;;  %v6559_v41 = vmul.f32 0.01, %v6527_v30  ;;  %v6505_v52 = vmul.f32 %v11142_v4, %v6410_v57 }
 0x568   :  { %v6576_v55 = vsel %vm6544_vm4, %v6528_v51, %v6560_v18  ;;  %v6530_v27 = vadd.f32 %v11147_v7, %v6506_v20 }
 0x569   :  { %6592 = vst.msk [vmem:[#allocation3 + $0x21] sm:$0xff] %vm42_vm0, %v6576_v55  ;;  %v6575_v56 = vsel %vm6543_vm5, %v6527_v30, %v6559_v41  ;;  %v6529_v28 = vadd.f32 %v11147_v7, %v6505_v52  ;;  %v8888_v32 = vpop.f32.mrb[20].mxu0 }
 0x56a   :  { %6591 = vst.msk [vmem:[#allocation3 + $0x11] sm:$0xff] %vm42_vm0, %v6575_v56  ;;  %vm6546_vm6 = vcmp.gt.f32.partialorder %v6530_v27, 0.0  ;;  %v6562_v34 = vmul.f32 0.01, %v6530_v27  ;;  %v6508_v35 = vmul.f32 %v8888_v32, %v11142_v4  ;;  %v6420_v22 = vpop.f32.mrb[21].mxu0 }
 0x56b   :  { %vm6545_vm7 = vcmp.gt.f32.partialorder %v6529_v28, 0.0  ;;  %v6561_v36 = vmul.f32 0.01, %v6529_v28  ;;  %v6507_v38 = vmul.f32 %v11142_v4, %v6420_v22 }
 0x56c   :  { %v6578_v54 = vsel %vm6546_vm6, %v6530_v27, %v6562_v34  ;;  %v6532_v13 = vadd.f32 %v11147_v7, %v6508_v35 }
 0x56d   :  { %6594 = vst.msk [vmem:[#allocation3 + $0x41] sm:$0xff] %vm42_vm0, %v6578_v54  ;;  %v6577_v11 = vsel %vm6545_vm7, %v6529_v28, %v6561_v36  ;;  %v6531_v44 = vadd.f32 %v11147_v7, %v6507_v38  ;;  %v8891_v61 = vpop.f32.mrb[22].mxu0 }
 0x56e   :  { %6593 = vst.msk [vmem:[#allocation3 + $0x31] sm:$0xff] %vm42_vm0, %v6577_v11  ;;  %vm6548_vm8 = vcmp.gt.f32.partialorder %v6532_v13, 0.0  ;;  %v6564_v62 = vmul.f32 0.01, %v6532_v13  ;;  %v6510_v5 = vmul.f32 %v8891_v61, %v11142_v4  ;;  %v6430_v8 = vpop.f32.mrb[23].mxu0 }
 0x56f   :  { %vm6547_vm9 = vcmp.gt.f32.partialorder %v6531_v44, 0.0  ;;  %v6563_v43 = vmul.f32 0.01, %v6531_v44  ;;  %v6509_v49 = vmul.f32 %v11142_v4, %v6430_v8 }
 0x570   :  { %v6580_v48 = vsel %vm6548_vm8, %v6532_v13, %v6564_v62  ;;  %v6534_v0 = vadd.f32 %v11147_v7, %v6510_v5  ;;  %v6608_v45 = vld [vmem:[#allocation3 + $0x21] sm:$0xff] }
 0x571   :  { %6596 = vst.msk [vmem:[#allocation3 + $0x61] sm:$0xff] %vm42_vm0, %v6580_v48  ;;  %v6579_v2 = vsel %vm6547_vm9, %v6531_v44, %v6563_v43  ;;  %v6533_v50 = vadd.f32 %v11147_v7, %v6509_v49  ;;  %v8894_v24 = vpop.f32.mrb[24].mxu0  ;;  %v6607_v58 = vld [vmem:[#allocation3 + $0x11] sm:$0xff]  ;;  %v11216_v48 = vld [vmem:[%s11404_s5] ss:$0 sm:$0xff]  ;;  %s9577_s5 = smov 96  }
 0x572   :  { %6595 = vst.msk [vmem:[#allocation3 + $0x51] sm:$0xff] %vm42_vm0, %v6579_v2  ;;  %vm6550_vm10 = vcmp.gt.f32.partialorder %v6534_v0, 0.0  ;;  %v6566_v59 = vmul.f32 0.01, %v6534_v0  ;;  %v6512_v16 = vmul.f32 %v8894_v24, %v11142_v4  ;;  %v6440_v17 = vpop.f32.mrb[25].mxu0  ;;  %8912 = vmatprep.mubr.msk.f32.mxu1 %vm42_vm0, %v6607_v58 }
 0x573   :  { %vm6549_vm11 = vcmp.gt.f32.partialorder %v6533_v50, 0.0  ;;  %v6565_v14 = vmul.f32 0.01, %v6533_v50  ;;  %v6511_v60 = vmul.f32 %v11142_v4, %v6440_v17  ;;  %8913 = vmatmul.mubr.msk.f32.vlgmr.msra.gmra.mrb[32].mxu1 %vm42_vm0, %v6608_v45  ;;  %v11221_v2 = vld [vmem:[%s11405_s6] ss:$0 sm:$0xff] }
 0x574   :  { %v6582_v29 = vsel %vm6550_vm10, %v6534_v0, %v6566_v59  ;;  %v6536_v40 = vadd.f32 %v11147_v7, %v6512_v16  ;;  %v6610_v42 = vld [vmem:[#allocation3 + $0x41] sm:$0xff] }
 0x575   :  { %6598 = vst.msk [vmem:[#allocation3 + $0x81] sm:$0xff] %vm42_vm0, %v6582_v29  ;;  %v6581_v19 = vsel %vm6549_vm11, %v6533_v50, %v6565_v14  ;;  %v6535_v63 = vadd.f32 %v11147_v7, %v6511_v60  ;;  %v8897_v53 = vpop.f32.mrb[26].mxu0  ;;  %v6609_v1 = vld [vmem:[#allocation3 + $0x31] sm:$0xff] }
 0x576   :  { %6597 = vst.msk [vmem:[#allocation3 + $0x71] sm:$0xff] %vm42_vm0, %v6581_v19  ;;  %vm6552_vm12 = vcmp.gt.f32.partialorder %v6536_v40, 0.0  ;;  %v6568_v9 = vmul.f32 0.01, %v6536_v40  ;;  %v6514_v46 = vmul.f32 %v8897_v53, %v11142_v4  ;;  %v6450_v47 = vpop.f32.mrb[27].mxu0  ;;  %8915 = vmatprep.mubr.msk.f32.mxu1 %vm42_vm0, %v6609_v1 }
 0x577   :  { %vm6551_vm13 = vcmp.gt.f32.partialorder %v6535_v63, 0.0  ;;  %v6567_v21 = vmul.f32 0.01, %v6535_v63  ;;  %v6513_v39 = vmul.f32 %v11142_v4, %v6450_v47  ;;  %8916 = vmatmul.mubr.msk.f32.gmra.mrb[34].mxu1 %vm42_vm0, %v6610_v42 }
 0x578   :  { %v6584_v25 = vsel %vm6552_vm12, %v6536_v40, %v6568_v9  ;;  %v6538_v15 = vadd.f32 %v11147_v7, %v6514_v46  ;;  %v6612_v23 = vld [vmem:[#allocation3 + $0x61] sm:$0xff] }
 0x579   :  { %6600 = vst.msk [vmem:[#allocation3 + $0xc1] sm:$0xff] %vm42_vm0, %v6584_v25  ;;  %v6583_v3 = vsel %vm6551_vm13, %v6535_v63, %v6567_v21  ;;  %v6537_v37 = vadd.f32 %v11147_v7, %v6513_v39  ;;  %v8900_v33 = vpop.f32.mrb[28].mxu0  ;;  %v6611_v31 = vld [vmem:[#allocation3 + $0x51] sm:$0xff] }
 0x57a   :  { %6599 = vst.msk [vmem:[#allocation3 + $0xb1] sm:$0xff] %vm42_vm0, %v6583_v3  ;;  %vm6554_vm14 = vcmp.gt.f32.partialorder %v6538_v15, 0.0  ;;  %v6570_v6 = vmul.f32 0.01, %v6538_v15  ;;  %v6516_v12 = vmul.f32 %v8900_v33, %v11142_v4  ;;  %v6460_v26 = vpop.f32.mrb[29].mxu0  ;;  %8918 = vmatprep.mubr.msk.f32.mxu1 %vm42_vm0, %v6611_v31 }
 0x57b   :  { %vm6553_vm15 = vcmp.gt.f32.partialorder %v6537_v37, 0.0  ;;  %v6569_v51 = vmul.f32 0.01, %v6537_v37  ;;  %v6515_v30 = vmul.f32 %v11142_v4, %v6460_v26  ;;  %8919 = vmatmul.mubr.msk.f32.gmra.mrb[36].mxu1 %vm42_vm0, %v6612_v23 }
 0x57c   :  { %v6586_v10 = vsel %vm6554_vm14, %v6538_v15, %v6570_v6  ;;  %v6540_v18 = vadd.f32 %v11147_v7, %v6516_v12  ;;  %v6614_v28 = vld [vmem:[#allocation3 + $0x81] sm:$0xff] }
 0x57d   :  { %6602 = vst.msk [vmem:[#allocation3 + $0xe1] sm:$0xff] %vm42_vm0, %v6586_v10  ;;  %v6585_v20 = vsel %vm6553_vm15, %v6537_v37, %v6569_v51  ;;  %v6539_v57 = vadd.f32 %v11147_v7, %v6515_v30  ;;  %v8903_v41 = vpop.f32.mrb[30].mxu0  ;;  %v6613_v52 = vld [vmem:[#allocation3 + $0x71] sm:$0xff] }
 0x57e   :  { %6601 = vst.msk [vmem:[#allocation3 + $0xd1] sm:$0xff] %vm42_vm0, %v6585_v20  ;;  %vm6556_vm1 = vcmp.gt.f32.partialorder %v6540_v18, 0.0  ;;  %v6572_v55 = vmul.f32 0.01, %v6540_v18  ;;  %v6518_v27 = vmul.f32 %v8903_v41, %v11142_v4  ;;  %v6470_v56 = vpop.f32.mrb[31].mxu0  ;;  %8921 = vmatprep.mubr.msk.f32.mxu1 %vm42_vm0, %v6613_v52 }
 0x57f   :  { %vm6555_vm2 = vcmp.gt.f32.partialorder %v6539_v57, 0.0  ;;  %v6571_v32 = vmul.f32 0.01, %v6539_v57  ;;  %v6517_v34 = vmul.f32 %v11142_v4, %v6470_v56  ;;  %8922 = vmatmul.mubr.msk.f32.gmra.mrb[38].mxu1 %vm42_vm0, %v6614_v28 }
 0x580   :  { %v6588_v35 = vsel %vm6556_vm1, %v6540_v18, %v6572_v55  ;;  %v6542_v22 = vadd.f32 %v11147_v7, %v6518_v27  ;;  %v6616_v11 = vld [vmem:[#allocation3 + $0xc1] sm:$0xff] }
 0x581   :  { %6604 = vst.msk [vmem:[#allocation3 + $0x101] sm:$0xff] %vm42_vm0, %v6588_v35  ;;  %v6587_v36 = vsel %vm6555_vm2, %v6539_v57, %v6571_v32  ;;  %v6541_v38 = vadd.f32 %v11147_v7, %v6517_v34  ;;  %v6615_v54 = vld [vmem:[#allocation3 + $0xb1] sm:$0xff] }
 0x582   :  { %6603 = vst.msk [vmem:[#allocation3 + $0xf1] sm:$0xff] %vm42_vm0, %v6587_v36  ;;  %vm6558_vm3 = vcmp.gt.f32.partialorder %v6542_v22, 0.0  ;;  %v6574_v13 = vmul.f32 0.01, %v6542_v22  ;;  %8924 = vmatprep.mubr.msk.f32.mxu1 %vm42_vm0, %v6615_v54 }
 0x583   :  { %vm6557_vm4 = vcmp.gt.f32.partialorder %v6541_v38, 0.0  ;;  %v6573_v4 = vmul.f32 0.01, %v6541_v38  ;;  %8925 = vmatmul.mubr.msk.f32.gmra.mrb[40].mxu1 %vm42_vm0, %v6616_v11 }
 0x584   :  { %v6590_v44 = vsel %vm6558_vm3, %v6542_v22, %v6574_v13  ;;  %v6618_v7 = vld [vmem:[#allocation3 + $0xe1] sm:$0xff] }
 0x585   :  { %6606 = vst.msk [vmem:[#allocation3 + $0x121] sm:$0xff] %vm42_vm0, %v6590_v44  ;;  %v6589_v61 = vsel %vm6557_vm4, %v6541_v38, %v6573_v4  ;;  %v6617_v62 = vld [vmem:[#allocation3 + $0xd1] sm:$0xff] }
 0x586   :  { %6605 = vst.msk [vmem:[#allocation3 + $0x111] sm:$0xff] %vm42_vm0, %v6589_v61  ;;  %8927 = vmatprep.mubr.msk.f32.mxu1 %vm42_vm0, %v6617_v62 }
 0x587   :  { %8928 = vmatmul.mubr.msk.f32.gmra.mrb[42].mxu1 %vm42_vm0, %v6618_v7 }
 0x588   :  { %v6620_v8 = vld [vmem:[#allocation3 + $0x101] sm:$0xff] }
 0x589   :  { %v6619_v5 = vld [vmem:[#allocation3 + $0xf1] sm:$0xff] }
 0x58a   :  { %8930 = vmatprep.mubr.msk.f32.mxu1 %vm42_vm0, %v6619_v5 }
 0x58b   :  { %8931 = vmatmul.mubr.msk.f32.gmra.mrb[44].mxu1 %vm42_vm0, %v6620_v8 }
 0x58c   :  { %v6622_v49 = vld [vmem:[#allocation3 + $0x121] sm:$0xff] }
 0x58d   :  { %v6621_v43 = vld [vmem:[#allocation3 + $0x111] sm:$0xff] }
 0x58e   :  { %8933 = vmatprep.mubr.msk.f32.mxu1 %vm42_vm0, %v6621_v43 }
 0x58f   :  { %8934 = vmatmul.mubr.msk.f32.gmra.mrb[46].mxu1 %vm42_vm0, %v6622_v49 }
 0x646   :  { %v8914_v0 = vpop.f32.mrb[32].mxu1 }
 0x647   :  { %v6828_v50 = vmul.f32 %v8914_v0, %v11216_v48  ;;  %v6741_v24 = vpop.f32.mrb[33].mxu1 }
 0x648   :  { %v6827_v58 = vmul.f32 %v11216_v48, %v6741_v24 }
 0x649   :  { %v6851_v59 = vadd.f32 %v11221_v2, %v6828_v50 }
 0x64a   :  { %v6850_v16 = vadd.f32 %v11221_v2, %v6827_v58  ;;  %v8917_v17 = vpop.f32.mrb[34].mxu1 }
 0x64b   :  { %v6830_v45 = vmul.f32 %v8917_v17, %v11216_v48  ;;  %v6751_v14 = vpop.f32.mrb[35].mxu1  ;;  %vm6867_vm5 = vcmp.gt.f32.partialorder %v6851_v59, 0.0  ;;  %v6883_v60 = vmul.f32 0.01, %v6851_v59 }
 0x64c   :  { %v6829_v29 = vmul.f32 %v11216_v48, %v6751_v14  ;;  %vm6866_vm6 = vcmp.gt.f32.partialorder %v6850_v16, 0.0  ;;  %v6882_v40 = vmul.f32 0.01, %v6850_v16 }
 0x64d   :  { %v6853_v19 = vadd.f32 %v11221_v2, %v6830_v45  ;;  %v6899_v63 = vsel %vm6867_vm5, %v6851_v59, %v6883_v60 }
 0x64e   :  { %v6852_v53 = vadd.f32 %v11221_v2, %v6829_v29  ;;  %6948 = vrot.lane.b32.xlu0 %v6899_v63, %s9577_s5  ;;  %6915 = vst.msk [vmem:[%s11406_s7 + $0x8] sm:$0xff] %vm42_vm0, %v6899_v63  ;;  %v8920_v1 = vpop.f32.mrb[36].mxu1  ;;  %v6898_v9 = vsel %vm6866_vm6, %v6850_v16, %v6882_v40  ;;  %vm6994_vm6 = vcmask 23552  }
 0x64f   :  { %v6832_v46 = vmul.f32 %v8920_v1, %v11216_v48  ;;  %v6761_v47 = vpop.f32.mrb[37].mxu1  ;;  %6914 = vst.msk [vmem:[%s11406_s7] sm:$0xff] %vm42_vm0, %v6898_v9  ;;  %vm6869_vm7 = vcmp.gt.f32.partialorder %v6853_v19, 0.0  ;;  %v6885_v42 = vmul.f32 0.01, %v6853_v19 }
 0x650   :  { %v6831_v21 = vmul.f32 %v11216_v48, %v6761_v47  ;;  %vm6868_vm8 = vcmp.gt.f32.partialorder %v6852_v53, 0.0  ;;  %v6884_v39 = vmul.f32 0.01, %v6852_v53 }
 0x651   :  { %v6855_v25 = vadd.f32 %v11221_v2, %v6832_v46  ;;  %v6901_v15 = vsel %vm6869_vm7, %v6853_v19, %v6885_v42 }
 0x652   :  { %v6854_v3 = vadd.f32 %v11221_v2, %v6831_v21  ;;  %6946 = vrot.lane.b32.xlu0 %v6898_v9, %s9577_s5  ;;  %6952 = vrot.lane.b32.xlu1 %v6901_v15, %s9577_s5  ;;  %6917 = vst.msk [vmem:[%s11406_s7 + $0x18] sm:$0xff] %vm42_vm0, %v6901_v15  ;;  %v8923_v37 = vpop.f32.mrb[38].mxu1  ;;  %v6900_v33 = vsel %vm6868_vm8, %v6852_v53, %v6884_v39 }
 0x653   :  { %v6834_v31 = vmul.f32 %v8923_v37, %v11216_v48  ;;  %v6771_v6 = vpop.f32.mrb[39].mxu1  ;;  %6916 = vst.msk [vmem:[%s11406_s7 + $0x10] sm:$0xff] %vm42_vm0, %v6900_v33  ;;  %vm6871_vm9 = vcmp.gt.f32.partialorder %v6855_v25, 0.0  ;;  %v6887_v12 = vmul.f32 0.01, %v6855_v25 }
 0x654   :  { %v6833_v26 = vmul.f32 %v11216_v48, %v6771_v6  ;;  %vm6870_vm10 = vcmp.gt.f32.partialorder %v6854_v3, 0.0  ;;  %v6886_v23 = vmul.f32 0.01, %v6854_v3 }
 0x655   :  { %v6857_v51 = vadd.f32 %v11221_v2, %v6834_v31  ;;  %v6903_v30 = vsel %vm6871_vm9, %v6855_v25, %v6887_v12 }
 0x656   :  { %v6856_v10 = vadd.f32 %v11221_v2, %v6833_v26  ;;  %6950 = vrot.lane.b32.xlu1 %v6900_v33, %s9577_s5  ;;  %v8926_v18 = vpop.f32.mrb[40].mxu1  ;;  %v6902_v20 = vsel %vm6870_vm10, %v6854_v3, %v6886_v23  ;;  %6919 = vst.msk [vmem:[%s11406_s7 + $0x28] sm:$0xff] %vm42_vm0, %v6903_v30 }
 0x657   :  { %v6836_v57 = vmul.f32 %v8926_v18, %v11216_v48  ;;  %6954 = vrot.lane.b32.xlu0 %v6902_v20, %s9577_s5  ;;  %6918 = vst.msk [vmem:[%s11406_s7 + $0x20] sm:$0xff] %vm42_vm0, %v6902_v20  ;;  %v6781_v41 = vpop.f32.mrb[41].mxu1  ;;  %vm6873_vm11 = vcmp.gt.f32.partialorder %v6857_v51, 0.0  ;;  %v6889_v52 = vmul.f32 0.01, %v6857_v51 }
 0x658   :  { %v6835_v55 = vmul.f32 %v11216_v48, %v6781_v41  ;;  %vm6872_vm12 = vcmp.gt.f32.partialorder %v6856_v10, 0.0  ;;  %v6888_v27 = vmul.f32 0.01, %v6856_v10 }
 0x659   :  { %v6859_v56 = vadd.f32 %v11221_v2, %v6836_v57  ;;  %v6905_v28 = vsel %vm6873_vm11, %v6857_v51, %v6889_v52 }
 0x65a   :  { %v6858_v32 = vadd.f32 %v11221_v2, %v6835_v55  ;;  %6956 = vrot.lane.b32.xlu1 %v6903_v30, %s9577_s5  ;;  %v8929_v34 = vpop.f32.mrb[42].mxu1  ;;  %v6904_v35 = vsel %vm6872_vm12, %v6856_v10, %v6888_v27  ;;  %6921 = vst.msk [vmem:[%s11406_s7 + $0x38] sm:$0xff] %vm42_vm0, %v6905_v28 }
 0x65b   :  { %v6838_v22 = vmul.f32 %v8929_v34, %v11216_v48  ;;  %6958 = vrot.lane.b32.xlu0 %v6904_v35, %s9577_s5  ;;  %6920 = vst.msk [vmem:[%s11406_s7 + $0x30] sm:$0xff] %vm42_vm0, %v6904_v35  ;;  %v6791_v36 = vpop.f32.mrb[43].mxu1  ;;  %vm6875_vm13 = vcmp.gt.f32.partialorder %v6859_v56, 0.0  ;;  %v6891_v38 = vmul.f32 0.01, %v6859_v56 }
 0x65c   :  { %v6837_v54 = vmul.f32 %v11216_v48, %v6791_v36  ;;  %vm6874_vm14 = vcmp.gt.f32.partialorder %v6858_v32, 0.0  ;;  %v6890_v13 = vmul.f32 0.01, %v6858_v32 }
 0x65d   :  { %v6861_v11 = vadd.f32 %v11221_v2, %v6838_v22  ;;  %v6907_v4 = vsel %vm6875_vm13, %v6859_v56, %v6891_v38 }
 0x65e   :  { %v6860_v44 = vadd.f32 %v11221_v2, %v6837_v54  ;;  %6960 = vrot.lane.b32.xlu1 %v6905_v28, %s9577_s5  ;;  %v8932_v61 = vpop.f32.mrb[44].mxu1  ;;  %v6906_v62 = vsel %vm6874_vm14, %v6858_v32, %v6890_v13  ;;  %6923 = vst.msk [vmem:[%s11406_s7 + $0x48] sm:$0xff] %vm42_vm0, %v6907_v4 }
 0x65f   :  { %v6840_v7 = vmul.f32 %v8932_v61, %v11216_v48  ;;  %6962 = vrot.lane.b32.xlu0 %v6906_v62, %s9577_s5  ;;  %6922 = vst.msk [vmem:[%s11406_s7 + $0x40] sm:$0xff] %vm42_vm0, %v6906_v62  ;;  %v6801_v5 = vpop.f32.mrb[45].mxu1  ;;  %vm6877_vm15 = vcmp.gt.f32.partialorder %v6861_v11, 0.0  ;;  %v6893_v8 = vmul.f32 0.01, %v6861_v11 }
 0x660   :  { %v6839_v43 = vmul.f32 %v11216_v48, %v6801_v5  ;;  %vm6876_vm1 = vcmp.gt.f32.partialorder %v6860_v44, 0.0  ;;  %v6892_v49 = vmul.f32 0.01, %v6860_v44 }
 0x661   :  { %v6863_v0 = vadd.f32 %v11221_v2, %v6840_v7  ;;  %v6909_v50 = vsel %vm6877_vm15, %v6861_v11, %v6893_v8 }
 0x662   :  { %v6862_v24 = vadd.f32 %v11221_v2, %v6839_v43  ;;  %6964 = vrot.lane.b32.xlu1 %v6907_v4, %s9577_s5  ;;  %v8935_v58 = vpop.f32.mrb[46].mxu1  ;;  %v6908_v59 = vsel %vm6876_vm1, %v6860_v44, %v6892_v49  ;;  %6925 = vst.msk [vmem:[%s11406_s7 + $0x58] sm:$0xff] %vm42_vm0, %v6909_v50 }
 0x663   :  { %v6842_v16 = vmul.f32 %v8935_v58, %v11216_v48  ;;  %6966 = vrot.lane.b32.xlu0 %v6908_v59, %s9577_s5  ;;  %6924 = vst.msk [vmem:[%s11406_s7 + $0x50] sm:$0xff] %vm42_vm0, %v6908_v59  ;;  %v6811_v17 = vpop.f32.mrb[47].mxu1  ;;  %vm6879_vm2 = vcmp.gt.f32.partialorder %v6863_v0, 0.0  ;;  %v6895_v45 = vmul.f32 0.01, %v6863_v0 }
 0x664   :  { %v6841_v14 = vmul.f32 %v11216_v48, %v6811_v17  ;;  %vm6878_vm3 = vcmp.gt.f32.partialorder %v6862_v24, 0.0  ;;  %v6894_v60 = vmul.f32 0.01, %v6862_v24 }
 0x665   :  { %v6865_v29 = vadd.f32 %v11221_v2, %v6842_v16  ;;  %v6911_v40 = vsel %vm6879_vm2, %v6863_v0, %v6895_v45 }
 0x666   :  { %v6864_v19 = vadd.f32 %v11221_v2, %v6841_v14  ;;  %6968 = vrot.lane.b32.xlu1 %v6909_v50, %s9577_s5  ;;  %v6910_v63 = vsel %vm6878_vm3, %v6862_v24, %v6894_v60  ;;  %6927 = vst.msk [vmem:[%s11406_s7 + $0x68] sm:$0xff] %vm42_vm0, %v6911_v40 }
 0x667   :  { %6970 = vrot.lane.b32.xlu0 %v6910_v63, %s9577_s5  ;;  %6926 = vst.msk [vmem:[%s11406_s7 + $0x60] sm:$0xff] %vm42_vm0, %v6910_v63  ;;  %vm6881_vm4 = vcmp.gt.f32.partialorder %v6865_v29, 0.0  ;;  %v6897_v48 = vmul.f32 0.01, %v6865_v29 }
 0x668   :  { %vm6880_vm5 = vcmp.gt.f32.partialorder %v6864_v19, 0.0  ;;  %v6896_v53 = vmul.f32 0.01, %v6864_v19 }
 0x669   :  { %v6913_v2 = vsel %vm6881_vm4, %v6865_v29, %v6897_v48 }
 0x66a   :  { %6972 = vrot.lane.b32.xlu1 %v6911_v40, %s9577_s5  ;;  %v6912_v1 = vsel %vm6880_vm5, %v6864_v19, %v6896_v53  ;;  %6929 = vst.msk [vmem:[%s11406_s7 + $0x78] sm:$0xff] %vm42_vm0, %v6913_v2 }
 0x66b   :  { %6974 = vrot.lane.b32.xlu0 %v6912_v1, %s9577_s5  ;;  %6928 = vst.msk [vmem:[%s11406_s7 + $0x70] sm:$0xff] %vm42_vm0, %v6912_v1 }
 0x66e   :  { %6976 = vrot.lane.b32.xlu1 %v6913_v2, %s9577_s5 }
 0x6c0   :  { %v6949_v9 = vpop.permute.xlu0 %6948 }
 0x6c1   :  { %6996 = vst.msk [vmem:[%s11407_s8 + $0x8] sm:$0xff] %vm6994_vm6, %v6949_v9 }
 0x6c4   :  { %v6947_v46 = vpop.permute.xlu0 %6946  ;;  %v6953_v47 = vpop.permute.xlu1 %6952 }
 0x6c5   :  { %6995 = vst.msk [vmem:[%s11407_s8] sm:$0xff] %vm6994_vm6, %v6947_v46  ;;  %6998 = vst.msk [vmem:[%s11407_s8 + $0x18] sm:$0xff] %vm6994_vm6, %v6953_v47 }
 0x6c8   :  { %v6951_v42 = vpop.permute.xlu1 %6950 }
 0x6c9   :  { %6997 = vst.msk [vmem:[%s11407_s8 + $0x10] sm:$0xff] %vm6994_vm6, %v6951_v42  ;;  %v6955_v21 = vpop.permute.xlu0 %6954 }
 0x6ca   :  { %6999 = vst.msk [vmem:[%s11407_s8 + $0x20] sm:$0xff] %vm6994_vm6, %v6955_v21 }
 0x6cc   :  { %v6957_v39 = vpop.permute.xlu1 %6956 }
 0x6cd   :  { %7000 = vst.msk [vmem:[%s11407_s8 + $0x28] sm:$0xff] %vm6994_vm6, %v6957_v39  ;;  %v6959_v25 = vpop.permute.xlu0 %6958 }
 0x6ce   :  { %7001 = vst.msk [vmem:[%s11407_s8 + $0x30] sm:$0xff] %vm6994_vm6, %v6959_v25 }
 0x6d0   :  { %v6961_v15 = vpop.permute.xlu1 %6960 }
 0x6d1   :  { %7002 = vst.msk [vmem:[%s11407_s8 + $0x38] sm:$0xff] %vm6994_vm6, %v6961_v15  ;;  %v6963_v3 = vpop.permute.xlu0 %6962 }
 0x6d2   :  { %7003 = vst.msk [vmem:[%s11407_s8 + $0x40] sm:$0xff] %vm6994_vm6, %v6963_v3 }
 0x6d4   :  { %v6965_v37 = vpop.permute.xlu1 %6964 }
 0x6d5   :  { %7004 = vst.msk [vmem:[%s11407_s8 + $0x48] sm:$0xff] %vm6994_vm6, %v6965_v37  ;;  %v6967_v33 = vpop.permute.xlu0 %6966 }
 0x6d6   :  { %7005 = vst.msk [vmem:[%s11407_s8 + $0x50] sm:$0xff] %vm6994_vm6, %v6967_v33 }
 0x6d8   :  { %v6969_v31 = vpop.permute.xlu1 %6968 }
 0x6d9   :  { %7006 = vst.msk [vmem:[%s11407_s8 + $0x58] sm:$0xff] %vm6994_vm6, %v6969_v31  ;;  %v6971_v6 = vpop.permute.xlu0 %6970 }
 0x6da   :  { %7007 = vst.msk [vmem:[%s11407_s8 + $0x60] sm:$0xff] %vm6994_vm6, %v6971_v6 }
 0x6dc   :  { %v6973_v12 = vpop.permute.xlu1 %6972 }
 0x6dd   :  { %7008 = vst.msk [vmem:[%s11407_s8 + $0x68] sm:$0xff] %vm6994_vm6, %v6973_v12  ;;  %v6975_v26 = vpop.permute.xlu0 %6974 }
 0x6de   :  { %7009 = vst.msk [vmem:[%s11407_s8 + $0x70] sm:$0xff] %vm6994_vm6, %v6975_v26 }
 0x6e0   :  { %v6977_v23 = vpop.permute.xlu1 %6976 }
 0x6e1   :  { %7010 = vst.msk [vmem:[%s11407_s8 + $0x78] sm:$0xff] %vm6994_vm6, %v6977_v23 }
 0x6e2   :  { %7019 = vsyncpa [#allocation5], 1 }

</bundles_post_ra>
